<compile_context>
chip_gen: v6e
topology: v6e:2x2x1
jax: 0.10.0
libtpu: 0.0.40
codegen_flags: <defaults>
</compile_context>

<pallas_src>
import functools

import numpy as np

import jax
import jax.numpy as jnp
from jax.experimental import pallas as pl
from jax.experimental.pallas import tpu as pltpu

NEG_SLOPE = 0.01  # nn.LeakyReLU default


def _leaky_relu(v):
    return jnp.where(v >= 0, v, NEG_SLOPE * v)


def _resblock_kernel(xp_ref, w_ref, b_ref, coord_ref, o_ref, *, D, H, W, S):
    """Fused ResBlock forward for one batch element.

    xp_ref    : (1, C, Nc)    reflect-padded input (f32); Nc = Dp*S + 128 slack
    w_ref     : (C, 9*Kp)     bf16 weights; per-tap block of width 3*C at lane
                              offset tap*Kp, columns ordered (kd, cin)
    b_ref     : (C, 1)        f32 bias
    coord_ref : (3, Nc)       int32 rows pd, ph, pw of every flat column
    o_ref     : (1, C, Dm)    output frame, Dm = D*S; valid voxel (d, h, w) at
                              column d*S + h*Wp + w (rest sliced off host-side)
    """
    Dp, Hp, Wp = D + 2, H + 2, W + 2
    Np = Dp * S                     # extent of the real padded frame
    Dm = D * S                      # output-frame width (multiple of 128)
    o_c = S + Wp + 1                # flat offset of padded voxel (1, 1, 1)
    C = xp_ref.shape[1]
    Nc = xp_ref.shape[2]            # Np + slack so tap slices stay in bounds
    Kp = w_ref.shape[1] // 9        # lane stride between the 9 tap blocks

    x_pad = xp_ref[0]               # (C, Nc) f32
    b = b_ref[...]                  # (C, 1)  f32
    pd = coord_ref[0:1, :]          # (1, Nc) int32
    ph = coord_ref[1:2, :]
    pw = coord_ref[2:3, :]

    def conv(z):
        """3x3x3 conv of a padded-frame buffer z (C, Nc) -> (C, Dm) f32.

        Columns d*S + h*Wp + w with d<D, h<H, w<W are the real conv outputs;
        the remaining columns hold harmless garbage (never read downstream in
        a way that reaches valid outputs).
        """
        zb = z.astype(jnp.bfloat16)                      # bf16 MXU operands
        acc = jnp.zeros((C, Dm), jnp.float32)            # f32 accumulation
        for kh in range(3):
            for kw in range(3):
                off = kh * Wp + kw
                # One misaligned lane shift shared by the three kd taps...
                sh = zb[:, off:off + Np]                 # (C, Np) bf16
                # ...whose kd*S offsets are free 128-aligned slices.
                patch = jnp.concatenate(
                    [sh[:, 0:Dm], sh[:, S:S + Dm], sh[:, 2 * S:2 * S + Dm]],
                    axis=0)                              # (3*C, Dm) bf16
                t0 = (kh * 3 + kw) * Kp
                w_tap = w_ref[:, t0:t0 + 3 * C]          # (C, 3*C) bf16
                acc = acc + jnp.dot(w_tap, patch,
                                    preferred_element_type=jnp.float32)
        return acc + b

    # ---- conv #1 + LeakyReLU (intermediate never leaves VMEM) --------------
    y1 = _leaky_relu(conv(x_pad))                        # (C, Dm) f32

    # ---- rebuild the reflect-padded volume of y1 in the padded frame -------
    # Garbage columns of y1 land only on face/dead positions, which are either
    # overwritten by the reflect masks below or never read as taps.
    z2 = jnp.concatenate(
        [jnp.zeros((C, o_c), jnp.float32), y1,
         jnp.zeros((C, Nc - o_c - Dm), jnp.float32)], axis=1)   # (C, Nc)

    def pulled(v, k):
        # result[:, n] = v[:, n + k]; columns pulled in from beyond the edge
        # are zero and are never selected by the face masks.
        if k >= 0:
            return jnp.concatenate(
                [v[:, k:], jnp.zeros((C, k), v.dtype)], axis=1)
        kk = -k
        return jnp.concatenate(
            [jnp.zeros((C, kk), v.dtype), v[:, :-kk]], axis=1)

    # Axis-by-axis (W, then H, then D) so edge/corner reflections compose.
    z2 = jnp.where(pw == 0,      pulled(z2, 2),       z2)
    z2 = jnp.where(pw == Wp - 1, pulled(z2, -2),      z2)
    z2 = jnp.where(ph == 0,      pulled(z2, 2 * Wp),  z2)
    z2 = jnp.where(ph == Hp - 1, pulled(z2, -2 * Wp), z2)
    z2 = jnp.where(pd == 0,      pulled(z2, 2 * S),   z2)
    z2 = jnp.where(pd == Dp - 1, pulled(z2, -2 * S),  z2)

    # ---- conv #2 + residual + LeakyReLU (elementwise math stays f32) -------
    residual = x_pad[:, o_c:o_c + Dm]                    # x at output coords
    out = _leaky_relu(conv(z2) + residual)               # (C, Dm) f32
    o_ref[0] = out.astype(o_ref.dtype)


def res_block(x_ncdhw, weight_oidhw, bias):
    """ResBlock forward. x: (N, C, D, H, W); weight: (C, C, 3, 3, 3); bias: (C,)."""
    N, C, D, H, W = x_ncdhw.shape
    Dp, Hp, Wp = D + 2, H + 2, W + 2
    plane = Hp * Wp
    S = ((plane + 127) // 128) * 128     # lane-aligned per-depth-plane stride
    EXT = 128                            # slack so in-kernel tap slices stay in bounds
    assert 2 * Wp + 2 <= EXT
    Np = Dp * S
    Nc = Np + EXT
    Dm = D * S

    # One reflect pad per ResBlock (conv #2's padding is rebuilt in-kernel),
    # laid out with the lane-aligned plane stride S.
    xp = jnp.pad(x_ncdhw, ((0, 0), (0, 0), (1, 1), (1, 1), (1, 1)),
                 mode="reflect")
    xp = xp.reshape(N, C, Dp, plane)
    xp = jnp.pad(xp, ((0, 0), (0, 0), (0, 0), (0, S - plane)))
    xp_flat = jnp.pad(xp.reshape(N, C, Np), ((0, 0), (0, 0), (0, EXT)))

    # Shared conv weight (O, I, kd, kh, kw) -> bf16 (C, 9*Kp): per-(kh,kw) tap
    # block of width 3*C at lane offset tap*Kp (Kp 128-aligned so in-kernel
    # weight slices start on a lane boundary), columns ordered (kd, cin).
    K = 3 * C
    Kp = ((K + 127) // 128) * 128
    w_taps = jnp.transpose(weight_oidhw, (3, 4, 0, 2, 1)).reshape(9, C, K)
    w_taps = jnp.pad(w_taps, ((0, 0), (0, 0), (0, Kp - K)))
    w2 = jnp.transpose(w_taps, (1, 0, 2)).reshape(C, 9 * Kp).astype(jnp.bfloat16)
    b2 = bias.reshape(C, 1).astype(jnp.float32)

    # Static (pd, ph, pw) decode of every flat padded column (host constant).
    n_idx = np.arange(Nc)
    rem = n_idx % S
    coords = jnp.asarray(
        np.stack([n_idx // S, rem // Wp, rem % Wp]).astype(np.int32))

    kernel = functools.partial(_resblock_kernel, D=D, H=H, W=W, S=S)
    out_flat = pl.pallas_call(
        kernel,
        out_shape=jax.ShapeDtypeStruct((N, C, Dm), x_ncdhw.dtype),
        grid_spec=pltpu.PrefetchScalarGridSpec(
            num_scalar_prefetch=0,
            grid=(N,),
            in_specs=[
                pl.BlockSpec((1, C, Nc), lambda n: (n, 0, 0)),
                pl.BlockSpec((C, 9 * Kp), lambda n: (0, 0)),   # weights: resident
                pl.BlockSpec((C, 1), lambda n: (0, 0)),
                pl.BlockSpec((3, Nc), lambda n: (0, 0)),
            ],
            out_specs=pl.BlockSpec((1, C, Dm), lambda n: (n, 0, 0)),
        ),
        compiler_params=pltpu.CompilerParams(
            dimension_semantics=("parallel",)),
    )(xp_flat, w2, b2, coords)

    # Valid voxel (d, h, w) lives at output-frame column d*S + h*Wp + w.
    out = out_flat.reshape(N, C, D, S)[..., :H * Wp]
    return out.reshape(N, C, D, H, Wp)[..., :W]


def res_block_reference(x, weight, bias, *, bf16_operands=False):
    """Pure-JAX reference matching PyTorch semantics (NCDHW).

    With bf16_operands=True the conv operands are rounded to bf16 (accumulate
    f32), matching the kernel's MXU precision, so a tight tolerance applies.
    """
    if bf16_operands:
        weight = weight.astype(jnp.bfloat16).astype(jnp.float32)

    def conv(inp):
        if bf16_operands:
            inp = inp.astype(jnp.bfloat16).astype(jnp.float32)
        p = jnp.pad(inp, ((0, 0), (0, 0), (1, 1), (1, 1), (1, 1)),
                    mode="reflect")
        y = jax.lax.conv_general_dilated(
            p, weight, window_strides=(1, 1, 1), padding="VALID",
            dimension_numbers=("NCDHW", "OIDHW", "NCDHW"),
            precision=jax.lax.Precision.HIGHEST)
        return y + bias[None, :, None, None, None]

    out = _leaky_relu(conv(x))
    out = conv(out) + x
    return _leaky_relu(out)


if __name__ == "__main__":
    key = jax.random.PRNGKey(0)
    kx, kw, kb = jax.random.split(key, 3)

    # Small shapes consistent with the module's Conv3d forward (NCDHW).
    N, C, D, H, W = 2, 8, 8, 8, 8
    x = jax.random.normal(kx, (N, C, D, H, W), dtype=jnp.float32)

    # PyTorch Conv3d weight layout: (O, I, kD, kH, kW), shared across both convs.
    fan_in = C * 3 * 3 * 3
    weight = jax.random.normal(kw, (C, C, 3, 3, 3), dtype=jnp.float32) / jnp.sqrt(
        jnp.float32(fan_in))
    bias = 0.01 * jax.random.normal(kb, (C,), dtype=jnp.float32)

    out = jax.block_until_ready(res_block(x, weight, bias))
    assert out.shape == x.shape and out.dtype == x.dtype

    # Tight check vs a reference whose conv operands are rounded to bf16
    # exactly like the kernel's MXU operands (differences = f32 sum order).
    ref_bf16 = res_block_reference(x, weight, bias, bf16_operands=True)
    assert jnp.allclose(out, ref_bf16, atol=2e-3, rtol=2e-3), \
        "mismatch vs bf16-matched reference"

    # Loose sanity check vs the pure-f32 PyTorch-semantics reference
    # (bf16 MXU operands => ~1e-2 expected deviation).
    ref_f32 = res_block_reference(x, weight, bias, bf16_operands=False)
    assert jnp.allclose(out, ref_f32, atol=5e-2, rtol=5e-2), \
        "mismatch vs f32 reference"

    print("KERNEL_OK")
</pallas_src>

<mosaic_0001>
module attributes {stable_mosaic.version = 11 : i64} {
  func.func @_resblock_kernel(%arg0: i32, %arg1: memref<1x8x1408xf32, #tpu.memory_space<vmem>>, %arg2: memref<8x1152xbf16, #tpu.memory_space<vmem>>, %arg3: memref<8x1xf32, #tpu.memory_space<vmem>>, %arg4: memref<3x1408xi32, #tpu.memory_space<vmem>>, %arg5: memref<1x8x1024xf32, #tpu.memory_space<vmem>>) attributes {dimension_semantics = [#tpu.dimension_semantics<parallel>], iteration_bounds = array<i64: 2>, scalar_prefetch = 0 : i64, scratch_operands = 0 : i64, tpu.core_type = #tpu.core_type<tc>, window_params = [{transform_indices = @transform_0, window_bounds = array<i64: 1, 8, 1408>}, {pipeline_mode = #tpu.pipeline_mode<synchronous>, transform_indices = @transform_1, window_bounds = array<i64: 8, 1152>}, {pipeline_mode = #tpu.pipeline_mode<synchronous>, transform_indices = @transform_2, window_bounds = array<i64: 8, 1>}, {pipeline_mode = #tpu.pipeline_mode<synchronous>, transform_indices = @transform_3, window_bounds = array<i64: 3, 1408>}, {transform_indices = @transform_4, window_bounds = array<i64: 1, 8, 1024>}]} {
    %c0 = arith.constant 0 : index
    %c0_0 = arith.constant 0 : index
    %c0_1 = arith.constant 0 : index
    %0 = vector.load %arg1[%c0, %c0_0, %c0_1] : memref<1x8x1408xf32, #tpu.memory_space<vmem>>, vector<1x8x1408xf32>
    %1 = vector.shape_cast %0 : vector<1x8x1408xf32> to vector<8x1408xf32>
    %c0_2 = arith.constant 0 : index
    %c0_3 = arith.constant 0 : index
    %2 = vector.load %arg3[%c0_2, %c0_3] : memref<8x1xf32, #tpu.memory_space<vmem>>, vector<8x1xf32>
    %c0_4 = arith.constant 0 : index
    %c0_5 = arith.constant 0 : index
    %3 = vector.load %arg4[%c0_4, %c0_5] : memref<3x1408xi32, #tpu.memory_space<vmem>>, vector<1x1408xi32>
    %c1 = arith.constant 1 : index
    %c0_6 = arith.constant 0 : index
    %4 = vector.load %arg4[%c1, %c0_6] : memref<3x1408xi32, #tpu.memory_space<vmem>>, vector<1x1408xi32>
    %c2 = arith.constant 2 : index
    %c0_7 = arith.constant 0 : index
    %5 = vector.load %arg4[%c2, %c0_7] : memref<3x1408xi32, #tpu.memory_space<vmem>>, vector<1x1408xi32>
    %6 = arith.truncf %1 : vector<8x1408xf32> to vector<8x1408xbf16>
    %cst = arith.constant 0.000000e+00 : f32
    %7 = vector.broadcast %cst : f32 to vector<8x1024xf32>
    %8 = vector.extract_strided_slice %6 {offsets = [0, 0], sizes = [8, 1280], strides = [1, 1]} : vector<8x1408xbf16> to vector<8x1280xbf16>
    %9 = vector.extract_strided_slice %8 {offsets = [0, 0], sizes = [8, 1024], strides = [1, 1]} : vector<8x1280xbf16> to vector<8x1024xbf16>
    %10 = vector.extract_strided_slice %8 {offsets = [0, 128], sizes = [8, 1024], strides = [1, 1]} : vector<8x1280xbf16> to vector<8x1024xbf16>
    %11 = vector.extract_strided_slice %8 {offsets = [0, 256], sizes = [8, 1024], strides = [1, 1]} : vector<8x1280xbf16> to vector<8x1024xbf16>
    %12 = tpu.concatenate %9, %10, %11 in 0 : vector<8x1024xbf16>, vector<8x1024xbf16>, vector<8x1024xbf16> -> vector<24x1024xbf16>
    %c0_8 = arith.constant 0 : index
    %c0_9 = arith.constant 0 : index
    %13 = vector.load %arg2[%c0_8, %c0_9] : memref<8x1152xbf16, #tpu.memory_space<vmem>>, vector<8x24xbf16>
    %cst_10 = arith.constant dense<0.000000e+00> : vector<8x1024xf32>
    %14 = tpu.matmul %13, %12, %cst_10 {dimension_numbers = #tpu.dot_dimension_numbers<[1], [0], [0], [1], [0, 0, 1, 1], [], []>} : vector<8x24xbf16>, vector<24x1024xbf16>, vector<8x1024xf32> -> vector<8x1024xf32>
    %15 = arith.addf %7, %14 : vector<8x1024xf32>
    %16 = vector.extract_strided_slice %6 {offsets = [0, 1], sizes = [8, 1280], strides = [1, 1]} : vector<8x1408xbf16> to vector<8x1280xbf16>
    %17 = vector.extract_strided_slice %16 {offsets = [0, 0], sizes = [8, 1024], strides = [1, 1]} : vector<8x1280xbf16> to vector<8x1024xbf16>
    %18 = vector.extract_strided_slice %16 {offsets = [0, 128], sizes = [8, 1024], strides = [1, 1]} : vector<8x1280xbf16> to vector<8x1024xbf16>
    %19 = vector.extract_strided_slice %16 {offsets = [0, 256], sizes = [8, 1024], strides = [1, 1]} : vector<8x1280xbf16> to vector<8x1024xbf16>
    %20 = tpu.concatenate %17, %18, %19 in 0 : vector<8x1024xbf16>, vector<8x1024xbf16>, vector<8x1024xbf16> -> vector<24x1024xbf16>
    %c0_11 = arith.constant 0 : index
    %c128 = arith.constant 128 : index
    %21 = vector.load %arg2[%c0_11, %c128] : memref<8x1152xbf16, #tpu.memory_space<vmem>>, vector<8x24xbf16>
    %cst_12 = arith.constant dense<0.000000e+00> : vector<8x1024xf32>
    %22 = tpu.matmul %21, %20, %cst_12 {dimension_numbers = #tpu.dot_dimension_numbers<[1], [0], [0], [1], [0, 0, 1, 1], [], []>} : vector<8x24xbf16>, vector<24x1024xbf16>, vector<8x1024xf32> -> vector<8x1024xf32>
    %23 = arith.addf %15, %22 : vector<8x1024xf32>
    %24 = vector.extract_strided_slice %6 {offsets = [0, 2], sizes = [8, 1280], strides = [1, 1]} : vector<8x1408xbf16> to vector<8x1280xbf16>
    %25 = vector.extract_strided_slice %24 {offsets = [0, 0], sizes = [8, 1024], strides = [1, 1]} : vector<8x1280xbf16> to vector<8x1024xbf16>
    %26 = vector.extract_strided_slice %24 {offsets = [0, 128], sizes = [8, 1024], strides = [1, 1]} : vector<8x1280xbf16> to vector<8x1024xbf16>
    %27 = vector.extract_strided_slice %24 {offsets = [0, 256], sizes = [8, 1024], strides = [1, 1]} : vector<8x1280xbf16> to vector<8x1024xbf16>
    %28 = tpu.concatenate %25, %26, %27 in 0 : vector<8x1024xbf16>, vector<8x1024xbf16>, vector<8x1024xbf16> -> vector<24x1024xbf16>
    %c0_13 = arith.constant 0 : index
    %c256 = arith.constant 256 : index
    %29 = vector.load %arg2[%c0_13, %c256] : memref<8x1152xbf16, #tpu.memory_space<vmem>>, vector<8x24xbf16>
    %cst_14 = arith.constant dense<0.000000e+00> : vector<8x1024xf32>
    %30 = tpu.matmul %29, %28, %cst_14 {dimension_numbers = #tpu.dot_dimension_numbers<[1], [0], [0], [1], [0, 0, 1, 1], [], []>} : vector<8x24xbf16>, vector<24x1024xbf16>, vector<8x1024xf32> -> vector<8x1024xf32>
    %31 = arith.addf %23, %30 : vector<8x1024xf32>
    %32 = vector.extract_strided_slice %6 {offsets = [0, 10], sizes = [8, 1280], strides = [1, 1]} : vector<8x1408xbf16> to vector<8x1280xbf16>
    %33 = vector.extract_strided_slice %32 {offsets = [0, 0], sizes = [8, 1024], strides = [1, 1]} : vector<8x1280xbf16> to vector<8x1024xbf16>
    %34 = vector.extract_strided_slice %32 {offsets = [0, 128], sizes = [8, 1024], strides = [1, 1]} : vector<8x1280xbf16> to vector<8x1024xbf16>
    %35 = vector.extract_strided_slice %32 {offsets = [0, 256], sizes = [8, 1024], strides = [1, 1]} : vector<8x1280xbf16> to vector<8x1024xbf16>
    %36 = tpu.concatenate %33, %34, %35 in 0 : vector<8x1024xbf16>, vector<8x1024xbf16>, vector<8x1024xbf16> -> vector<24x1024xbf16>
    %c0_15 = arith.constant 0 : index
    %c384 = arith.constant 384 : index
    %37 = vector.load %arg2[%c0_15, %c384] : memref<8x1152xbf16, #tpu.memory_space<vmem>>, vector<8x24xbf16>
    %cst_16 = arith.constant dense<0.000000e+00> : vector<8x1024xf32>
    %38 = tpu.matmul %37, %36, %cst_16 {dimension_numbers = #tpu.dot_dimension_numbers<[1], [0], [0], [1], [0, 0, 1, 1], [], []>} : vector<8x24xbf16>, vector<24x1024xbf16>, vector<8x1024xf32> -> vector<8x1024xf32>
    %39 = arith.addf %31, %38 : vector<8x1024xf32>
    %40 = vector.extract_strided_slice %6 {offsets = [0, 11], sizes = [8, 1280], strides = [1, 1]} : vector<8x1408xbf16> to vector<8x1280xbf16>
    %41 = vector.extract_strided_slice %40 {offsets = [0, 0], sizes = [8, 1024], strides = [1, 1]} : vector<8x1280xbf16> to vector<8x1024xbf16>
    %42 = vector.extract_strided_slice %40 {offsets = [0, 128], sizes = [8, 1024], strides = [1, 1]} : vector<8x1280xbf16> to vector<8x1024xbf16>
    %43 = vector.extract_strided_slice %40 {offsets = [0, 256], sizes = [8, 1024], strides = [1, 1]} : vector<8x1280xbf16> to vector<8x1024xbf16>
    %44 = tpu.concatenate %41, %42, %43 in 0 : vector<8x1024xbf16>, vector<8x1024xbf16>, vector<8x1024xbf16> -> vector<24x1024xbf16>
    %c0_17 = arith.constant 0 : index
    %c512 = arith.constant 512 : index
    %45 = vector.load %arg2[%c0_17, %c512] : memref<8x1152xbf16, #tpu.memory_space<vmem>>, vector<8x24xbf16>
    %cst_18 = arith.constant dense<0.000000e+00> : vector<8x1024xf32>
    %46 = tpu.matmul %45, %44, %cst_18 {dimension_numbers = #tpu.dot_dimension_numbers<[1], [0], [0], [1], [0, 0, 1, 1], [], []>} : vector<8x24xbf16>, vector<24x1024xbf16>, vector<8x1024xf32> -> vector<8x1024xf32>
    %47 = arith.addf %39, %46 : vector<8x1024xf32>
    %48 = vector.extract_strided_slice %6 {offsets = [0, 12], sizes = [8, 1280], strides = [1, 1]} : vector<8x1408xbf16> to vector<8x1280xbf16>
    %49 = vector.extract_strided_slice %48 {offsets = [0, 0], sizes = [8, 1024], strides = [1, 1]} : vector<8x1280xbf16> to vector<8x1024xbf16>
    %50 = vector.extract_strided_slice %48 {offsets = [0, 128], sizes = [8, 1024], strides = [1, 1]} : vector<8x1280xbf16> to vector<8x1024xbf16>
    %51 = vector.extract_strided_slice %48 {offsets = [0, 256], sizes = [8, 1024], strides = [1, 1]} : vector<8x1280xbf16> to vector<8x1024xbf16>
    %52 = tpu.concatenate %49, %50, %51 in 0 : vector<8x1024xbf16>, vector<8x1024xbf16>, vector<8x1024xbf16> -> vector<24x1024xbf16>
    %c0_19 = arith.constant 0 : index
    %c640 = arith.constant 640 : index
    %53 = vector.load %arg2[%c0_19, %c640] : memref<8x1152xbf16, #tpu.memory_space<vmem>>, vector<8x24xbf16>
    %cst_20 = arith.constant dense<0.000000e+00> : vector<8x1024xf32>
    %54 = tpu.matmul %53, %52, %cst_20 {dimension_numbers = #tpu.dot_dimension_numbers<[1], [0], [0], [1], [0, 0, 1, 1], [], []>} : vector<8x24xbf16>, vector<24x1024xbf16>, vector<8x1024xf32> -> vector<8x1024xf32>
    %55 = arith.addf %47, %54 : vector<8x1024xf32>
    %56 = vector.extract_strided_slice %6 {offsets = [0, 20], sizes = [8, 1280], strides = [1, 1]} : vector<8x1408xbf16> to vector<8x1280xbf16>
    %57 = vector.extract_strided_slice %56 {offsets = [0, 0], sizes = [8, 1024], strides = [1, 1]} : vector<8x1280xbf16> to vector<8x1024xbf16>
    %58 = vector.extract_strided_slice %56 {offsets = [0, 128], sizes = [8, 1024], strides = [1, 1]} : vector<8x1280xbf16> to vector<8x1024xbf16>
    %59 = vector.extract_strided_slice %56 {offsets = [0, 256], sizes = [8, 1024], strides = [1, 1]} : vector<8x1280xbf16> to vector<8x1024xbf16>
    %60 = tpu.concatenate %57, %58, %59 in 0 : vector<8x1024xbf16>, vector<8x1024xbf16>, vector<8x1024xbf16> -> vector<24x1024xbf16>
    %c0_21 = arith.constant 0 : index
    %c768 = arith.constant 768 : index
    %61 = vector.load %arg2[%c0_21, %c768] : memref<8x1152xbf16, #tpu.memory_space<vmem>>, vector<8x24xbf16>
    %cst_22 = arith.constant dense<0.000000e+00> : vector<8x1024xf32>
    %62 = tpu.matmul %61, %60, %cst_22 {dimension_numbers = #tpu.dot_dimension_numbers<[1], [0], [0], [1], [0, 0, 1, 1], [], []>} : vector<8x24xbf16>, vector<24x1024xbf16>, vector<8x1024xf32> -> vector<8x1024xf32>
    %63 = arith.addf %55, %62 : vector<8x1024xf32>
    %64 = vector.extract_strided_slice %6 {offsets = [0, 21], sizes = [8, 1280], strides = [1, 1]} : vector<8x1408xbf16> to vector<8x1280xbf16>
    %65 = vector.extract_strided_slice %64 {offsets = [0, 0], sizes = [8, 1024], strides = [1, 1]} : vector<8x1280xbf16> to vector<8x1024xbf16>
    %66 = vector.extract_strided_slice %64 {offsets = [0, 128], sizes = [8, 1024], strides = [1, 1]} : vector<8x1280xbf16> to vector<8x1024xbf16>
    %67 = vector.extract_strided_slice %64 {offsets = [0, 256], sizes = [8, 1024], strides = [1, 1]} : vector<8x1280xbf16> to vector<8x1024xbf16>
    %68 = tpu.concatenate %65, %66, %67 in 0 : vector<8x1024xbf16>, vector<8x1024xbf16>, vector<8x1024xbf16> -> vector<24x1024xbf16>
    %c0_23 = arith.constant 0 : index
    %c896 = arith.constant 896 : index
    %69 = vector.load %arg2[%c0_23, %c896] : memref<8x1152xbf16, #tpu.memory_space<vmem>>, vector<8x24xbf16>
    %cst_24 = arith.constant dense<0.000000e+00> : vector<8x1024xf32>
    %70 = tpu.matmul %69, %68, %cst_24 {dimension_numbers = #tpu.dot_dimension_numbers<[1], [0], [0], [1], [0, 0, 1, 1], [], []>} : vector<8x24xbf16>, vector<24x1024xbf16>, vector<8x1024xf32> -> vector<8x1024xf32>
    %71 = arith.addf %63, %70 : vector<8x1024xf32>
    %72 = vector.extract_strided_slice %6 {offsets = [0, 22], sizes = [8, 1280], strides = [1, 1]} : vector<8x1408xbf16> to vector<8x1280xbf16>
    %73 = vector.extract_strided_slice %72 {offsets = [0, 0], sizes = [8, 1024], strides = [1, 1]} : vector<8x1280xbf16> to vector<8x1024xbf16>
    %74 = vector.extract_strided_slice %72 {offsets = [0, 128], sizes = [8, 1024], strides = [1, 1]} : vector<8x1280xbf16> to vector<8x1024xbf16>
    %75 = vector.extract_strided_slice %72 {offsets = [0, 256], sizes = [8, 1024], strides = [1, 1]} : vector<8x1280xbf16> to vector<8x1024xbf16>
    %76 = tpu.concatenate %73, %74, %75 in 0 : vector<8x1024xbf16>, vector<8x1024xbf16>, vector<8x1024xbf16> -> vector<24x1024xbf16>
    %c0_25 = arith.constant 0 : index
    %c1024 = arith.constant 1024 : index
    %77 = vector.load %arg2[%c0_25, %c1024] : memref<8x1152xbf16, #tpu.memory_space<vmem>>, vector<8x24xbf16>
    %cst_26 = arith.constant dense<0.000000e+00> : vector<8x1024xf32>
    %78 = tpu.matmul %77, %76, %cst_26 {dimension_numbers = #tpu.dot_dimension_numbers<[1], [0], [0], [1], [0, 0, 1, 1], [], []>} : vector<8x24xbf16>, vector<24x1024xbf16>, vector<8x1024xf32> -> vector<8x1024xf32>
    %79 = arith.addf %71, %78 : vector<8x1024xf32>
    %80 = vector.broadcast %2 : vector<8x1xf32> to vector<8x1024xf32>
    %81 = arith.addf %79, %80 : vector<8x1024xf32>
    %cst_27 = arith.constant 0.000000e+00 : f32
    %82 = vector.broadcast %cst_27 : f32 to vector<8x1024xf32>
    %83 = arith.cmpf oge, %81, %82 : vector<8x1024xf32>
    %cst_28 = arith.constant 0.00999999977 : f32
    %84 = vector.broadcast %cst_28 : f32 to vector<8x1024xf32>
    %85 = arith.mulf %84, %81 : vector<8x1024xf32>
    %86 = arith.select %83, %81, %85 : vector<8x1024xi1>, vector<8x1024xf32>
    %cst_29 = arith.constant 0.000000e+00 : f32
    %87 = vector.broadcast %cst_29 : f32 to vector<8x139xf32>
    %cst_30 = arith.constant 0.000000e+00 : f32
    %88 = vector.broadcast %cst_30 : f32 to vector<8x245xf32>
    %89 = tpu.concatenate %87, %86, %88 in 1 : vector<8x139xf32>, vector<8x1024xf32>, vector<8x245xf32> -> vector<8x1408xf32>
    %c0_i32 = arith.constant 0 : i32
    %90 = vector.broadcast %c0_i32 : i32 to vector<1x1408xi32>
    %91 = arith.cmpi eq, %5, %90 : vector<1x1408xi32>
    %92 = vector.extract_strided_slice %89 {offsets = [0, 2], sizes = [8, 1406], strides = [1, 1]} : vector<8x1408xf32> to vector<8x1406xf32>
    %cst_31 = arith.constant 0.000000e+00 : f32
    %93 = vector.broadcast %cst_31 : f32 to vector<8x2xf32>
    %94 = tpu.concatenate %92, %93 in 1 : vector<8x1406xf32>, vector<8x2xf32> -> vector<8x1408xf32>
    %95 = vector.shape_cast %91 : vector<1x1408xi1> to vector<1x1408xi1>
    %96 = vector.broadcast %95 : vector<1x1408xi1> to vector<8x1408xi1>
    %97 = arith.select %96, %94, %89 : vector<8x1408xi1>, vector<8x1408xf32>
    %c9_i32 = arith.constant 9 : i32
    %98 = vector.broadcast %c9_i32 : i32 to vector<1x1408xi32>
    %99 = arith.cmpi eq, %5, %98 : vector<1x1408xi32>
    %cst_32 = arith.constant 0.000000e+00 : f32
    %100 = vector.broadcast %cst_32 : f32 to vector<8x2xf32>
    %101 = vector.extract_strided_slice %97 {offsets = [0, 0], sizes = [8, 1406], strides = [1, 1]} : vector<8x1408xf32> to vector<8x1406xf32>
    %102 = tpu.concatenate %100, %101 in 1 : vector<8x2xf32>, vector<8x1406xf32> -> vector<8x1408xf32>
    %103 = vector.shape_cast %99 : vector<1x1408xi1> to vector<1x1408xi1>
    %104 = vector.broadcast %103 : vector<1x1408xi1> to vector<8x1408xi1>
    %105 = arith.select %104, %102, %97 : vector<8x1408xi1>, vector<8x1408xf32>
    %c0_i32_33 = arith.constant 0 : i32
    %106 = vector.broadcast %c0_i32_33 : i32 to vector<1x1408xi32>
    %107 = arith.cmpi eq, %4, %106 : vector<1x1408xi32>
    %108 = vector.extract_strided_slice %105 {offsets = [0, 20], sizes = [8, 1388], strides = [1, 1]} : vector<8x1408xf32> to vector<8x1388xf32>
    %cst_34 = arith.constant 0.000000e+00 : f32
    %109 = vector.broadcast %cst_34 : f32 to vector<8x20xf32>
    %110 = tpu.concatenate %108, %109 in 1 : vector<8x1388xf32>, vector<8x20xf32> -> vector<8x1408xf32>
    %111 = vector.shape_cast %107 : vector<1x1408xi1> to vector<1x1408xi1>
    %112 = vector.broadcast %111 : vector<1x1408xi1> to vector<8x1408xi1>
    %113 = arith.select %112, %110, %105 : vector<8x1408xi1>, vector<8x1408xf32>
    %c9_i32_35 = arith.constant 9 : i32
    %114 = vector.broadcast %c9_i32_35 : i32 to vector<1x1408xi32>
    %115 = arith.cmpi eq, %4, %114 : vector<1x1408xi32>
    %cst_36 = arith.constant 0.000000e+00 : f32
    %116 = vector.broadcast %cst_36 : f32 to vector<8x20xf32>
    %117 = vector.extract_strided_slice %113 {offsets = [0, 0], sizes = [8, 1388], strides = [1, 1]} : vector<8x1408xf32> to vector<8x1388xf32>
    %118 = tpu.concatenate %116, %117 in 1 : vector<8x20xf32>, vector<8x1388xf32> -> vector<8x1408xf32>
    %119 = vector.shape_cast %115 : vector<1x1408xi1> to vector<1x1408xi1>
    %120 = vector.broadcast %119 : vector<1x1408xi1> to vector<8x1408xi1>
    %121 = arith.select %120, %118, %113 : vector<8x1408xi1>, vector<8x1408xf32>
    %c0_i32_37 = arith.constant 0 : i32
    %122 = vector.broadcast %c0_i32_37 : i32 to vector<1x1408xi32>
    %123 = arith.cmpi eq, %3, %122 : vector<1x1408xi32>
    %124 = vector.extract_strided_slice %121 {offsets = [0, 256], sizes = [8, 1152], strides = [1, 1]} : vector<8x1408xf32> to vector<8x1152xf32>
    %cst_38 = arith.constant 0.000000e+00 : f32
    %125 = vector.broadcast %cst_38 : f32 to vector<8x256xf32>
    %126 = tpu.concatenate %124, %125 in 1 : vector<8x1152xf32>, vector<8x256xf32> -> vector<8x1408xf32>
    %127 = vector.shape_cast %123 : vector<1x1408xi1> to vector<1x1408xi1>
    %128 = vector.broadcast %127 : vector<1x1408xi1> to vector<8x1408xi1>
    %129 = arith.select %128, %126, %121 : vector<8x1408xi1>, vector<8x1408xf32>
    %c9_i32_39 = arith.constant 9 : i32
    %130 = vector.broadcast %c9_i32_39 : i32 to vector<1x1408xi32>
    %131 = arith.cmpi eq, %3, %130 : vector<1x1408xi32>
    %cst_40 = arith.constant 0.000000e+00 : f32
    %132 = vector.broadcast %cst_40 : f32 to vector<8x256xf32>
    %133 = vector.extract_strided_slice %129 {offsets = [0, 0], sizes = [8, 1152], strides = [1, 1]} : vector<8x1408xf32> to vector<8x1152xf32>
    %134 = tpu.concatenate %132, %133 in 1 : vector<8x256xf32>, vector<8x1152xf32> -> vector<8x1408xf32>
    %135 = vector.shape_cast %131 : vector<1x1408xi1> to vector<1x1408xi1>
    %136 = vector.broadcast %135 : vector<1x1408xi1> to vector<8x1408xi1>
    %137 = arith.select %136, %134, %129 : vector<8x1408xi1>, vector<8x1408xf32>
    %138 = vector.extract_strided_slice %1 {offsets = [0, 139], sizes = [8, 1024], strides = [1, 1]} : vector<8x1408xf32> to vector<8x1024xf32>
    %139 = arith.truncf %137 : vector<8x1408xf32> to vector<8x1408xbf16>
    %cst_41 = arith.constant 0.000000e+00 : f32
    %140 = vector.broadcast %cst_41 : f32 to vector<8x1024xf32>
    %141 = vector.extract_strided_slice %139 {offsets = [0, 0], sizes = [8, 1280], strides = [1, 1]} : vector<8x1408xbf16> to vector<8x1280xbf16>
    %142 = vector.extract_strided_slice %141 {offsets = [0, 0], sizes = [8, 1024], strides = [1, 1]} : vector<8x1280xbf16> to vector<8x1024xbf16>
    %143 = vector.extract_strided_slice %141 {offsets = [0, 128], sizes = [8, 1024], strides = [1, 1]} : vector<8x1280xbf16> to vector<8x1024xbf16>
    %144 = vector.extract_strided_slice %141 {offsets = [0, 256], sizes = [8, 1024], strides = [1, 1]} : vector<8x1280xbf16> to vector<8x1024xbf16>
    %145 = tpu.concatenate %142, %143, %144 in 0 : vector<8x1024xbf16>, vector<8x1024xbf16>, vector<8x1024xbf16> -> vector<24x1024xbf16>
    %c0_42 = arith.constant 0 : index
    %c0_43 = arith.constant 0 : index
    %146 = vector.load %arg2[%c0_42, %c0_43] : memref<8x1152xbf16, #tpu.memory_space<vmem>>, vector<8x24xbf16>
    %cst_44 = arith.constant dense<0.000000e+00> : vector<8x1024xf32>
    %147 = tpu.matmul %146, %145, %cst_44 {dimension_numbers = #tpu.dot_dimension_numbers<[1], [0], [0], [1], [0, 0, 1, 1], [], []>} : vector<8x24xbf16>, vector<24x1024xbf16>, vector<8x1024xf32> -> vector<8x1024xf32>
    %148 = arith.addf %140, %147 : vector<8x1024xf32>
    %149 = vector.extract_strided_slice %139 {offsets = [0, 1], sizes = [8, 1280], strides = [1, 1]} : vector<8x1408xbf16> to vector<8x1280xbf16>
    %150 = vector.extract_strided_slice %149 {offsets = [0, 0], sizes = [8, 1024], strides = [1, 1]} : vector<8x1280xbf16> to vector<8x1024xbf16>
    %151 = vector.extract_strided_slice %149 {offsets = [0, 128], sizes = [8, 1024], strides = [1, 1]} : vector<8x1280xbf16> to vector<8x1024xbf16>
    %152 = vector.extract_strided_slice %149 {offsets = [0, 256], sizes = [8, 1024], strides = [1, 1]} : vector<8x1280xbf16> to vector<8x1024xbf16>
    %153 = tpu.concatenate %150, %151, %152 in 0 : vector<8x1024xbf16>, vector<8x1024xbf16>, vector<8x1024xbf16> -> vector<24x1024xbf16>
    %c0_45 = arith.constant 0 : index
    %c128_46 = arith.constant 128 : index
    %154 = vector.load %arg2[%c0_45, %c128_46] : memref<8x1152xbf16, #tpu.memory_space<vmem>>, vector<8x24xbf16>
    %cst_47 = arith.constant dense<0.000000e+00> : vector<8x1024xf32>
    %155 = tpu.matmul %154, %153, %cst_47 {dimension_numbers = #tpu.dot_dimension_numbers<[1], [0], [0], [1], [0, 0, 1, 1], [], []>} : vector<8x24xbf16>, vector<24x1024xbf16>, vector<8x1024xf32> -> vector<8x1024xf32>
    %156 = arith.addf %148, %155 : vector<8x1024xf32>
    %157 = vector.extract_strided_slice %139 {offsets = [0, 2], sizes = [8, 1280], strides = [1, 1]} : vector<8x1408xbf16> to vector<8x1280xbf16>
    %158 = vector.extract_strided_slice %157 {offsets = [0, 0], sizes = [8, 1024], strides = [1, 1]} : vector<8x1280xbf16> to vector<8x1024xbf16>
    %159 = vector.extract_strided_slice %157 {offsets = [0, 128], sizes = [8, 1024], strides = [1, 1]} : vector<8x1280xbf16> to vector<8x1024xbf16>
    %160 = vector.extract_strided_slice %157 {offsets = [0, 256], sizes = [8, 1024], strides = [1, 1]} : vector<8x1280xbf16> to vector<8x1024xbf16>
    %161 = tpu.concatenate %158, %159, %160 in 0 : vector<8x1024xbf16>, vector<8x1024xbf16>, vector<8x1024xbf16> -> vector<24x1024xbf16>
    %c0_48 = arith.constant 0 : index
    %c256_49 = arith.constant 256 : index
    %162 = vector.load %arg2[%c0_48, %c256_49] : memref<8x1152xbf16, #tpu.memory_space<vmem>>, vector<8x24xbf16>
    %cst_50 = arith.constant dense<0.000000e+00> : vector<8x1024xf32>
    %163 = tpu.matmul %162, %161, %cst_50 {dimension_numbers = #tpu.dot_dimension_numbers<[1], [0], [0], [1], [0, 0, 1, 1], [], []>} : vector<8x24xbf16>, vector<24x1024xbf16>, vector<8x1024xf32> -> vector<8x1024xf32>
    %164 = arith.addf %156, %163 : vector<8x1024xf32>
    %165 = vector.extract_strided_slice %139 {offsets = [0, 10], sizes = [8, 1280], strides = [1, 1]} : vector<8x1408xbf16> to vector<8x1280xbf16>
    %166 = vector.extract_strided_slice %165 {offsets = [0, 0], sizes = [8, 1024], strides = [1, 1]} : vector<8x1280xbf16> to vector<8x1024xbf16>
    %167 = vector.extract_strided_slice %165 {offsets = [0, 128], sizes = [8, 1024], strides = [1, 1]} : vector<8x1280xbf16> to vector<8x1024xbf16>
    %168 = vector.extract_strided_slice %165 {offsets = [0, 256], sizes = [8, 1024], strides = [1, 1]} : vector<8x1280xbf16> to vector<8x1024xbf16>
    %169 = tpu.concatenate %166, %167, %168 in 0 : vector<8x1024xbf16>, vector<8x1024xbf16>, vector<8x1024xbf16> -> vector<24x1024xbf16>
    %c0_51 = arith.constant 0 : index
    %c384_52 = arith.constant 384 : index
    %170 = vector.load %arg2[%c0_51, %c384_52] : memref<8x1152xbf16, #tpu.memory_space<vmem>>, vector<8x24xbf16>
    %cst_53 = arith.constant dense<0.000000e+00> : vector<8x1024xf32>
    %171 = tpu.matmul %170, %169, %cst_53 {dimension_numbers = #tpu.dot_dimension_numbers<[1], [0], [0], [1], [0, 0, 1, 1], [], []>} : vector<8x24xbf16>, vector<24x1024xbf16>, vector<8x1024xf32> -> vector<8x1024xf32>
    %172 = arith.addf %164, %171 : vector<8x1024xf32>
    %173 = vector.extract_strided_slice %139 {offsets = [0, 11], sizes = [8, 1280], strides = [1, 1]} : vector<8x1408xbf16> to vector<8x1280xbf16>
    %174 = vector.extract_strided_slice %173 {offsets = [0, 0], sizes = [8, 1024], strides = [1, 1]} : vector<8x1280xbf16> to vector<8x1024xbf16>
    %175 = vector.extract_strided_slice %173 {offsets = [0, 128], sizes = [8, 1024], strides = [1, 1]} : vector<8x1280xbf16> to vector<8x1024xbf16>
    %176 = vector.extract_strided_slice %173 {offsets = [0, 256], sizes = [8, 1024], strides = [1, 1]} : vector<8x1280xbf16> to vector<8x1024xbf16>
    %177 = tpu.concatenate %174, %175, %176 in 0 : vector<8x1024xbf16>, vector<8x1024xbf16>, vector<8x1024xbf16> -> vector<24x1024xbf16>
    %c0_54 = arith.constant 0 : index
    %c512_55 = arith.constant 512 : index
    %178 = vector.load %arg2[%c0_54, %c512_55] : memref<8x1152xbf16, #tpu.memory_space<vmem>>, vector<8x24xbf16>
    %cst_56 = arith.constant dense<0.000000e+00> : vector<8x1024xf32>
    %179 = tpu.matmul %178, %177, %cst_56 {dimension_numbers = #tpu.dot_dimension_numbers<[1], [0], [0], [1], [0, 0, 1, 1], [], []>} : vector<8x24xbf16>, vector<24x1024xbf16>, vector<8x1024xf32> -> vector<8x1024xf32>
    %180 = arith.addf %172, %179 : vector<8x1024xf32>
    %181 = vector.extract_strided_slice %139 {offsets = [0, 12], sizes = [8, 1280], strides = [1, 1]} : vector<8x1408xbf16> to vector<8x1280xbf16>
    %182 = vector.extract_strided_slice %181 {offsets = [0, 0], sizes = [8, 1024], strides = [1, 1]} : vector<8x1280xbf16> to vector<8x1024xbf16>
    %183 = vector.extract_strided_slice %181 {offsets = [0, 128], sizes = [8, 1024], strides = [1, 1]} : vector<8x1280xbf16> to vector<8x1024xbf16>
    %184 = vector.extract_strided_slice %181 {offsets = [0, 256], sizes = [8, 1024], strides = [1, 1]} : vector<8x1280xbf16> to vector<8x1024xbf16>
    %185 = tpu.concatenate %182, %183, %184 in 0 : vector<8x1024xbf16>, vector<8x1024xbf16>, vector<8x1024xbf16> -> vector<24x1024xbf16>
    %c0_57 = arith.constant 0 : index
    %c640_58 = arith.constant 640 : index
    %186 = vector.load %arg2[%c0_57, %c640_58] : memref<8x1152xbf16, #tpu.memory_space<vmem>>, vector<8x24xbf16>
    %cst_59 = arith.constant dense<0.000000e+00> : vector<8x1024xf32>
    %187 = tpu.matmul %186, %185, %cst_59 {dimension_numbers = #tpu.dot_dimension_numbers<[1], [0], [0], [1], [0, 0, 1, 1], [], []>} : vector<8x24xbf16>, vector<24x1024xbf16>, vector<8x1024xf32> -> vector<8x1024xf32>
    %188 = arith.addf %180, %187 : vector<8x1024xf32>
    %189 = vector.extract_strided_slice %139 {offsets = [0, 20], sizes = [8, 1280], strides = [1, 1]} : vector<8x1408xbf16> to vector<8x1280xbf16>
    %190 = vector.extract_strided_slice %189 {offsets = [0, 0], sizes = [8, 1024], strides = [1, 1]} : vector<8x1280xbf16> to vector<8x1024xbf16>
    %191 = vector.extract_strided_slice %189 {offsets = [0, 128], sizes = [8, 1024], strides = [1, 1]} : vector<8x1280xbf16> to vector<8x1024xbf16>
    %192 = vector.extract_strided_slice %189 {offsets = [0, 256], sizes = [8, 1024], strides = [1, 1]} : vector<8x1280xbf16> to vector<8x1024xbf16>
    %193 = tpu.concatenate %190, %191, %192 in 0 : vector<8x1024xbf16>, vector<8x1024xbf16>, vector<8x1024xbf16> -> vector<24x1024xbf16>
    %c0_60 = arith.constant 0 : index
    %c768_61 = arith.constant 768 : index
    %194 = vector.load %arg2[%c0_60, %c768_61] : memref<8x1152xbf16, #tpu.memory_space<vmem>>, vector<8x24xbf16>
    %cst_62 = arith.constant dense<0.000000e+00> : vector<8x1024xf32>
    %195 = tpu.matmul %194, %193, %cst_62 {dimension_numbers = #tpu.dot_dimension_numbers<[1], [0], [0], [1], [0, 0, 1, 1], [], []>} : vector<8x24xbf16>, vector<24x1024xbf16>, vector<8x1024xf32> -> vector<8x1024xf32>
    %196 = arith.addf %188, %195 : vector<8x1024xf32>
    %197 = vector.extract_strided_slice %139 {offsets = [0, 21], sizes = [8, 1280], strides = [1, 1]} : vector<8x1408xbf16> to vector<8x1280xbf16>
    %198 = vector.extract_strided_slice %197 {offsets = [0, 0], sizes = [8, 1024], strides = [1, 1]} : vector<8x1280xbf16> to vector<8x1024xbf16>
    %199 = vector.extract_strided_slice %197 {offsets = [0, 128], sizes = [8, 1024], strides = [1, 1]} : vector<8x1280xbf16> to vector<8x1024xbf16>
    %200 = vector.extract_strided_slice %197 {offsets = [0, 256], sizes = [8, 1024], strides = [1, 1]} : vector<8x1280xbf16> to vector<8x1024xbf16>
    %201 = tpu.concatenate %198, %199, %200 in 0 : vector<8x1024xbf16>, vector<8x1024xbf16>, vector<8x1024xbf16> -> vector<24x1024xbf16>
    %c0_63 = arith.constant 0 : index
    %c896_64 = arith.constant 896 : index
    %202 = vector.load %arg2[%c0_63, %c896_64] : memref<8x1152xbf16, #tpu.memory_space<vmem>>, vector<8x24xbf16>
    %cst_65 = arith.constant dense<0.000000e+00> : vector<8x1024xf32>
    %203 = tpu.matmul %202, %201, %cst_65 {dimension_numbers = #tpu.dot_dimension_numbers<[1], [0], [0], [1], [0, 0, 1, 1], [], []>} : vector<8x24xbf16>, vector<24x1024xbf16>, vector<8x1024xf32> -> vector<8x1024xf32>
    %204 = arith.addf %196, %203 : vector<8x1024xf32>
    %205 = vector.extract_strided_slice %139 {offsets = [0, 22], sizes = [8, 1280], strides = [1, 1]} : vector<8x1408xbf16> to vector<8x1280xbf16>
    %206 = vector.extract_strided_slice %205 {offsets = [0, 0], sizes = [8, 1024], strides = [1, 1]} : vector<8x1280xbf16> to vector<8x1024xbf16>
    %207 = vector.extract_strided_slice %205 {offsets = [0, 128], sizes = [8, 1024], strides = [1, 1]} : vector<8x1280xbf16> to vector<8x1024xbf16>
    %208 = vector.extract_strided_slice %205 {offsets = [0, 256], sizes = [8, 1024], strides = [1, 1]} : vector<8x1280xbf16> to vector<8x1024xbf16>
    %209 = tpu.concatenate %206, %207, %208 in 0 : vector<8x1024xbf16>, vector<8x1024xbf16>, vector<8x1024xbf16> -> vector<24x1024xbf16>
    %c0_66 = arith.constant 0 : index
    %c1024_67 = arith.constant 1024 : index
    %210 = vector.load %arg2[%c0_66, %c1024_67] : memref<8x1152xbf16, #tpu.memory_space<vmem>>, vector<8x24xbf16>
    %cst_68 = arith.constant dense<0.000000e+00> : vector<8x1024xf32>
    %211 = tpu.matmul %210, %209, %cst_68 {dimension_numbers = #tpu.dot_dimension_numbers<[1], [0], [0], [1], [0, 0, 1, 1], [], []>} : vector<8x24xbf16>, vector<24x1024xbf16>, vector<8x1024xf32> -> vector<8x1024xf32>
    %212 = arith.addf %204, %211 : vector<8x1024xf32>
    %213 = vector.broadcast %2 : vector<8x1xf32> to vector<8x1024xf32>
    %214 = arith.addf %212, %213 : vector<8x1024xf32>
    %215 = arith.addf %214, %138 : vector<8x1024xf32>
    %cst_69 = arith.constant 0.000000e+00 : f32
    %216 = vector.broadcast %cst_69 : f32 to vector<8x1024xf32>
    %217 = arith.cmpf oge, %215, %216 : vector<8x1024xf32>
    %cst_70 = arith.constant 0.00999999977 : f32
    %218 = vector.broadcast %cst_70 : f32 to vector<8x1024xf32>
    %219 = arith.mulf %218, %215 : vector<8x1024xf32>
    %220 = arith.select %217, %215, %219 : vector<8x1024xi1>, vector<8x1024xf32>
    %c0_71 = arith.constant 0 : index
    %c0_72 = arith.constant 0 : index
    %c0_73 = arith.constant 0 : index
    %221 = vector.load %arg5[%c0_71, %c0_72, %c0_73] : memref<1x8x1024xf32, #tpu.memory_space<vmem>>, vector<1x8x1024xf32>
    %222 = vector.shape_cast %221 : vector<1x8x1024xf32> to vector<8x1024xf32>
    %223 = vector.shape_cast %220 : vector<8x1024xf32> to vector<1x8x1024xf32>
    tpu.vector_store %arg5[%c0_71, %c0_72, %c0_73], %223 {strides = array<i32>} : memref<1x8x1024xf32, #tpu.memory_space<vmem>>, vector<1x8x1024xf32>,
    return
  }
  func.func @transform_0(%arg0: i32) -> (i32, i32, i32) {
    %c0_i32 = arith.constant 0 : i32
    %c0_i32_0 = arith.constant 0 : i32
    %c0_i32_1 = arith.constant 0 : i32
    return %arg0, %c0_i32, %c0_i32_0 : i32, i32, i32
  }
  func.func @transform_1(%arg0: i32) -> (i32, i32) {
    %c0_i32 = arith.constant 0 : i32
    %c0_i32_0 = arith.constant 0 : i32
    %c0_i32_1 = arith.constant 0 : i32
    return %c0_i32, %c0_i32_0 : i32, i32
  }
  func.func @transform_2(%arg0: i32) -> (i32, i32) {
    %c0_i32 = arith.constant 0 : i32
    %c0_i32_0 = arith.constant 0 : i32
    %c0_i32_1 = arith.constant 0 : i32
    return %c0_i32, %c0_i32_0 : i32, i32
  }
  func.func @transform_3(%arg0: i32) -> (i32, i32) {
    %c0_i32 = arith.constant 0 : i32
    %c0_i32_0 = arith.constant 0 : i32
    %c0_i32_1 = arith.constant 0 : i32
    return %c0_i32, %c0_i32_0 : i32, i32
  }
  func.func @transform_4(%arg0: i32) -> (i32, i32, i32) {
    %c0_i32 = arith.constant 0 : i32
    %c0_i32_0 = arith.constant 0 : i32
    %c0_i32_1 = arith.constant 0 : i32
    return %arg0, %c0_i32, %c0_i32_0 : i32, i32, i32
  }
}

</mosaic_0001>

<bundles_post_ra>
// kernel: tpu_custom_call.1
= control target key start
LH: loop header
LB: loop body
LE: loop exit
PB: predicated region body
PF: predicated region fallthrough
CT: control target
= control target key end

     0   :  { %9 = vsyncpa [#allocation3], 0  ;;  %s8951_s0 = inlined_call_operand.hbm [shape: f32[2,8,1408], index: 0, kind: input, shape index: {}]   ;;  %s8952_s1 = inlined_call_operand.hbm [shape: bf16[8,1152], index: 1, kind: input, shape index: {}]   ;;  %s8953_s2 = inlined_call_operand.vmem [shape: f32[8,1], index: 2, kind: input, shape index: {}]   ;;  %s8954_s3 = inlined_call_operand.hbm [shape: s32[3,1408], index: 3, kind: input, shape index: {}]   ;;  %s8955_s4 = inlined_call_operand.hbm [shape: f32[2,8,1024], index: 4, kind: output, shape index: {}]  }
   0x1   :  { %11 = vsyncpa [#allocation3 + $0x1], 0 }
   0x2   :  { %12 = vsyncpa [#allocation6], 0 }
   0x3   :  { %13 = vsyncpa [#allocation4], 0 }
   0x4   :  { %15 = vsyncpa [#allocation4 + $0x1], 0  ;;  %s6383_s15 = smov 0   ;;  %s6385_s16 = smov 0  }
   0x5   :  { %s6387_s17 = smov 0   ;;  %s6389_s18 = smov 0  }
   0x6 LB: > { %s6404_s19 = sadd.s32 4294967295, %s6339_s18   ;;  %s5809_s20 = sadd.s32 4294967294, %s6339_s18   ;;  %s6339_s18 = sphi %s6389_s18, %s9425_s18   ;;  %s6335_s17 = sphi %s6387_s17, %s9424_s17   ;;  %s6331_s16 = sphi %s6385_s16, %s9423_s16   ;;  %s6327_s15 = sphi %s6383_s15, %s9422_s15  }
   0x7   : > { %p41_p0 = scmp.ne.s32.totalorder %s6331_s16, %s6327_s15  ;;  %p8956_p1 = scmp.eq.s32.totalorder %s6404_s19, 0 }
   0x8   : > { %p134_p3 = scmp.eq.s32.totalorder %s5809_s20, 1  ;;  %p5810_p5 = scmp.ge.s32.totalorder %s6339_s18, 1 }
   0x9   : > { %p6413_p4 = por %p8956_p1, %p41_p0  ;;  %p141_p7 = scmp.lt.s32.totalorder %s6339_s18, 3 }
   0xa   : > { %p6418_p6 = por %p134_p3, %p41_p0  ;;  %s6341_s24 = smov [#allocation5]  }
   0xb   : > { %s8994_s21 = scalar_select %p6413_p4, 1, 0 }
   0xc   : > { %s8995_s22 = scalar_select %p6418_p6, 1, 0 }
   0xd   : > { %p6423_p8 = pnand %p5810_p5, %p141_p7  ;;  %s154_s25 = sshll.u32 %s6341_s24, 4  ;;  %s155_s25 = int_to_ptr.vmem [resolvable:$true] %s154_s25 }
   0xe   : > { %s6342_s26 = smov [#allocation7]   ;;  %s6437_s29 = sadd.s32 1, %s6339_s18  }
   0xf   : > { %s8996_s23 = scalar_select %p6423_p8, 1, 0 }
  0x10   : > { %p5984_p10 = pneg %p6423_p8  ;;  %s168_s27 = sshll.u32 %s6342_s26, 4  ;;  %s169_s27 = int_to_ptr.vmem [resolvable:$true] %s168_s27 }
  0x11   : > { %s25_s30 = ssub.s32 %s6339_s18, %s6437_s29  ;;  %s6202_s5 = scalar_lea.vmem %s155_s25, 576 }
  0x12   : > { %p6432_p11 = pnand %p5984_p10, %p8956_p1  ;;  %p6203_p13 = scmp.ne.s32.totalorder %s155_s25, %s6202_s5 }
  0x13   : > { %p6210_p5 = scmp.lt.s32.totalorder %s155_s25, %s155_s25  ;;  %p6211_p7 = scmp.lt.s32.totalorder %s6202_s5, %s6202_s5 }
  0x14   : > { %p6193_p12 = pneg %p6432_p11 }
  0x15   : > { %p6212_p10 = por %p6211_p7, %p6210_p5 }
  0x16   : > { %p6205_p0 = pnand %p6203_p13, %p6193_p12 }
  0x18   : > { %p6206_p3 = pneg %p6205_p0 }
  0x1a   : > { %p6213_p9 = pnand %p6212_p10, %p6206_p3 }
  0x1c   : > { %6216 = shalt.err (!%p6213_p9)
}
  0x1d   : > { %5987 = dma.hbm_to_vmem [thread:$0]  (!%p6432_p11), %s8952_s1, 576, %s155_s25, [#allocation6]  }
  0x1e   : > { %s6228_s8 = scalar_lea.vmem %s169_s27, 704  ;;  %p6236_p13 = scmp.lt.s32.totalorder %s169_s27, %s169_s27 }
  0x1f   : > { %p6229_p1 = scmp.ne.s32.totalorder %s169_s27, %s6228_s8  ;;  %p6237_p0 = scmp.lt.s32.totalorder %s6228_s8, %s6228_s8 }
  0x21   : > { %p6231_p2 = pnand %p6229_p1, %p6193_p12  ;;  %p6238_p4 = por %p6237_p0, %p6236_p13 }
  0x23   : > { %p6232_p6 = pneg %p6231_p2 }
  0x25   : > { %p6239_p8 = pnand %p6238_p4, %p6232_p6 }
  0x27   : > { %6242 = shalt.err (!%p6239_p8)
}
  0x28   : > { %5990 = dma.hbm_to_vmem [thread:$0]  (!%p6432_p11), %s8954_s3, 704, %s169_s27, [#allocation6]  }
  0x29   : > { %p26_p1 = scmp.eq.s32.totalorder %s25_s30, 0  ;;  %s28_s11 = sadd.s32 1, %s6335_s17 }
  0x2a   : > { %p35_p2 = scmp.ne.s32.totalorder %s6335_s17, %s6331_s16  ;;  %p36_p4 = scmp.eq.s32.totalorder %s6339_s18, 0 }
  0x2b   : > { %s6464_s12 = scalar_select %p26_p1, %s6335_s17, %s28_s11  }
  0x2c   : > { %p37_p6 = por %p36_p4, %p35_p2  ;;  %p8998_p8 = scmp.eq.s32.totalorder %s6404_s19, 1 }
  0x2d   : > { %p6001_p12 = scmp.lt.s32.totalorder %s6339_s18, 2  ;;  %s179_s14 = sand.u32 1, %s6335_s17  }
  0x2e   : > { %p6468_p9 = por %p8998_p8, %p35_p2  ;;  %s5969_s20 = smul.u32 88, %s179_s14 }
  0x2f   : > { %s5970_s24 = smul.u32 1408, %s6339_s18  ;;  %p6475_p3 = pnand %p6001_p12, %p37_p6 }
  0x30   : > { %s8999_s13 = scalar_select %p6468_p9, 1, 0 }
  0x31   : > { %s6482_s28 = scalar_lea.hbm %s8951_s0, %s5970_s24  ;;  %s183_s30 = scalar_lea.vmem [#allocation2], %s5969_s20 }
  0x32   : > { %s191_s5 = sshll.u32 %s183_s30, 4  ;;  %s180_s6 = scalar_lea.sflag [#allocation3], %s179_s14  ;;  %s192_s5 = int_to_ptr.vmem [resolvable:$true] %s191_s5 }
  0x33   : > { %s6243_s7 = scalar_lea.hbm %s6482_s28, 1408  ;;  %p6245_p5 = pneg %p6475_p3 }
  0x34   : > { %p6244_p11 = scmp.ne.s32.totalorder %s6482_s28, %s6243_s7  ;;  %s6248_s10 = scalar_lea.hbm %s8951_s0, 2816 }
  0x35   : > { %p6249_p13 = scmp.lt.s32.totalorder %s6482_s28, %s8951_s0  ;;  %p6250_p0 = scmp.lt.s32.totalorder %s6248_s10, %s6243_s7 }
  0x36   : > { %p6246_p7 = pnand %p6245_p5, %p6244_p11 }
  0x37   : > { %p6251_p1 = por %p6250_p0, %p6249_p13 }
  0x38   : > { %p6247_p10 = pneg %p6246_p7 }
  0x3a   : > { %p6252_p2 = pnand %p6251_p1, %p6247_p10 }
  0x3c   : > { %6255 = shalt.err (!%p6252_p2)
}
  0x3d   : > { %s6256_s20 = scalar_lea.vmem %s192_s5, 1408  ;;  %s6343_s14 = smov [#allocation2]  }
  0x3e   : > { %p6257_p4 = scmp.ne.s32.totalorder %s192_s5, %s6256_s20  ;;  %s6261_s26 = sshll.u32 %s6343_s14, 4  ;;  %s6262_s26 = int_to_ptr.vmem [resolvable:$false] %s6261_s26 }
  0x3f   : > { %s6263_s27 = scalar_lea.vmem %s6262_s26, 2816  ;;  %p6264_p12 = scmp.lt.s32.totalorder %s192_s5, %s6262_s26 }
  0x40   : > { %p6259_p6 = pnand %p6257_p4, %p6245_p5  ;;  %p6265_p11 = scmp.lt.s32.totalorder %s6263_s27, %s6256_s20 }
  0x42   : > { %p6260_p8 = pneg %p6259_p6  ;;  %p6266_p7 = por %p6265_p11, %p6264_p12 }
  0x44   : > { %p6267_p9 = pnand %p6266_p7, %p6260_p8 }
  0x46   : > { %6270 = shalt.err (!%p6267_p9)
}
  0x47   : > { %5994 = dma.hbm_to_vmem [thread:$0]  (!%p6475_p3), %s6482_s28, 1408, %s192_s5, %s180_s6  }
  0x48   : > { %p9001_p10 = scmp.ne.s32.totalorder %s8996_s23, 0 }
  0x4a   : > { %200 = sbr.rel (%p9001_p10) target bundleno = 1982 (0x7be), region = 36 }
  0x4f   : > { %s6501_s30 = sand.u32 1, %s6331_s16   ;;  %p9002_p5 = scmp.ne.s32.totalorder %s8994_s21, 0 }
  0x50   : > { %s5971_s7 = smul.u32 88, %s6501_s30  ;;  %s203_s8 = scalar_lea.sflag [#allocation3], %s6501_s30 }
  0x52   : > { %s6505_s9 = scalar_lea.vmem [#allocation2], %s5971_s7 }
  0x53   : > { %6314 = dma.done.wait (%p9002_p5), %s203_s8, 1408  }
  0x54   : > { %6316 = vsyncadd (%p9002_p5), %s203_s8, 4294965888  ;;  %p9003_p9 = scmp.eq.s32.totalorder %s6404_s19, 0 }
  0x56   : > { %6318 = dma.done.wait (%p9003_p9), [#allocation6], 1280   ;;  %p9004_p3 = pmov %p9003_p9 }
  0x57   : > { %v244_v0 = vld [vmem:[%s6505_s9 + $0x20] sm:$0xff]  ;;  %v242_v1 = vld [vmem:[%s6505_s9 + $0x10] sm:$0xff]  ;;  %v245_v2 = vld [vmem:[%s6505_s9 + $0x28] sm:$0xff]  ;;  %s6344_s21 = smov 127   ;;  %vm8969_vm0 = vcmask 1043456   ;;  %v8970_v22 = vmov 0  }
  0x58   : > { %6320 = vsyncadd (%p9004_p3), [#allocation6], 4294966016  ;;  %v6518_v3 = vpack.c.bf16 %v244_v0, %v244_v0  ;;  %v6520_v4 = vpack.c.bf16 %v242_v1, %v242_v1  ;;  %v243_v5 = vld [vmem:[%s6505_s9 + $0x18] sm:$0xff]  ;;  %v241_v6 = vld [vmem:[%s6505_s9 + $0x8] sm:$0xff]  ;;  %v6528_v7 = vpack.c.bf16 %v245_v2, %v245_v2  ;;  %461 = vmatprep.mubr.bf16.mxu0 %v8970_v22  ;;  %502 = vmatprep.mubr.bf16.mxu1 %v8970_v22  ;;  %s6346_s23 = smov 126   ;;  %s6347_s25 = smov 118  }
  0x59   : > { %v6530_v8 = vpack.c.bf16 %v243_v5, %v243_v5  ;;  %v246_v9 = vld [vmem:[%s6505_s9 + $0x30] sm:$0xff]  ;;  %v264_v10 = vpack.c.bf16 %v241_v6, %v241_v6  ;;  %v240_v16 = vld [vmem:[%s6505_s9] sm:$0xff]  ;;  %6052 = vset.pattern.permute.xlu0 %v8970_v22  ;;  %v247_v25 = vld [vmem:[%s6505_s9 + $0x38] sm:$0xff]  ;;  %s6348_s28 = smov 117   ;;  %vm8968_vm1 = vcmask 1039360   ;;  %vm8965_vm2 = vcmask 195584  }
  0x5a   : > { %362 = vrot.lane.b32.xlu1 %v6518_v3, %s6344_s21  ;;  %358 = vrot.lane.b32.xlu0 %v6520_v4, %s6344_s21  ;;  %v283_v11 = vrot.slane %v6520_v4, 4  ;;  %v6538_v12 = vpack.c.bf16 %v246_v9, %v246_v9  ;;  %v285_v15 = vrot.slane %v6518_v3, 4  ;;  %v286_v17 = vrot.slane %v6528_v7, 4  ;;  %v248_v26 = vld [vmem:[%s6505_s9 + $0x40] sm:$0xff]  ;;  %v249_v29 = vld [vmem:[%s6505_s9 + $0x48] sm:$0xff]  ;;  %s6349_s5 = smov 116  }
  0x5b   : > { %v284_v14 = vrot.slane %v6530_v8, 4  ;;  %v263_v20 = vpack.c.bf16 %v240_v16, %v240_v16  ;;  %v282_v21 = vrot.slane %v264_v10, 4  ;;  %v6579_v27 = vpack.c.bf16 %v247_v25, %v247_v25  ;;  %v250_v30 = vld [vmem:[%s6505_s9 + $0x50] sm:$0xff]  ;;  %s6350_s6 = smov 108   ;;  %s6351_s10 = smov 107  }
  0x5c   : > { %v6541_v13 = vsel %vm8969_vm0, %v264_v10, %v283_v11  ;;  %v6557_v19 = vsel %vm8969_vm0, %v6530_v8, %v285_v15  ;;  %v6568_v23 = vsel %vm8969_vm0, %v6518_v3, %v286_v17  ;;  %v6581_v28 = vpack.c.bf16 %v248_v26, %v248_v26  ;;  %v329_v63 = vld [vmem:[#allocation5 + $0x4] sm:$0xf]  ;;  %s6352_s11 = smov 106   ;;  %s6353_s14 = smov 11  }
  0x5d   : > { %v6553_v18 = vsel %vm8969_vm0, %v6520_v4, %v284_v14  ;;  %v6571_v24 = vsel %vm8969_vm0, %v263_v20, %v282_v21  ;;  %v6589_v31 = vpack.c.bf16 %v249_v29, %v249_v29  ;;  %v6591_v32 = vpack.c.bf16 %v250_v30, %v250_v30  ;;  %s6355_s26 = smov 2   ;;  %s6356_s27 = smov 20  }
  0x5e   : > { %364 = vrot.lane.b32.xlu1 %v6528_v7, %s6344_s21  ;;  %360 = vrot.lane.b32.xlu0 %v6530_v8, %s6344_s21  ;;  %v287_v33 = vrot.slane %v6538_v12, 4  ;;  %v288_v34 = vrot.slane %v6579_v27, 4  ;;  %v289_v37 = vrot.slane %v6581_v28, 4  ;;  %v596_v29 = vsel %vm8969_vm0, %v6520_v4, 0  ;;  %s5818_s7 = sshll.u32 %s6501_s30, 6  ;;  %p9419_p0 = scmp.ne.s32.totalorder %s8999_s13, 0 }
  0x5f   : > { %v325_v38 = vrot.slane %v6589_v31, 4  ;;  %vm8964_vm3 = vcmask 1031168   ;;  %vm8963_vm4 = vcmask 965632   ;;  %vm8961_vm5 = vcmask 957440   ;;  %s8888_s8 = scalar_lea.vmem [#allocation8], %s5818_s7 }
  0x60   : > { %v6601_v35 = vsel %vm8969_vm0, %v6528_v7, %v287_v33  ;;  %v6605_v36 = vsel %vm8969_vm0, %v6538_v12, %v288_v34  ;;  %v6615_v39 = vsel %vm8969_vm0, %v6579_v27, %v289_v37  ;;  %v600_v34 = vsel %vm8969_vm0, %v6518_v3, 0 }
  0x61   : > { %v6619_v40 = vsel %vm8969_vm0, %v6581_v28, %v325_v38  ;;  %vm8960_vm6 = vcmask 949248   ;;  %vm8962_vm7 = vcmask 883712   ;;  %vm8967_vm8 = vcmask 875520  }
  0x62   : > { %366 = vrot.lane.b32.xlu0 %v6538_v12, %s6344_s21  ;;  %342 = vrot.lane.b32.xlu1 %v6541_v13, %s6344_s21  ;;  %vm8966_vm9 = vcmask 867328  }
  0x66   : > { %344 = vrot.lane.b32.xlu0 %v6553_v18, %s6344_s21  ;;  %346 = vrot.lane.b32.xlu1 %v6557_v19, %s6344_s21 }
  0x6a   : > { %348 = vrot.lane.b32.xlu0 %v6568_v23, %s6344_s21  ;;  %340 = vrot.lane.b32.xlu1 %v6571_v24, %s6344_s21 }
  0x6e   : > { %368 = vrot.lane.b32.xlu0 %v6579_v27, %s6344_s21  ;;  %370 = vrot.lane.b32.xlu1 %v6581_v28, %s6344_s21 }
  0x72   : > { %372 = vrot.lane.b32.xlu0 %v6589_v31, %s6344_s21  ;;  %374 = vrot.lane.b32.xlu1 %v6591_v32, %s6344_s21 }
  0x76   : > { %350 = vrot.lane.b32.xlu0 %v6601_v35, %s6344_s21  ;;  %352 = vrot.lane.b32.xlu1 %v6605_v36, %s6344_s21 }
  0x7a   : > { %354 = vrot.lane.b32.xlu0 %v6615_v39, %s6344_s21  ;;  %356 = vrot.lane.b32.xlu1 %v6619_v40, %s6344_s21 }
  0x7e   : > { %796 = vrot.lane.b32.xlu0 %v6520_v4, %s6346_s23  ;;  %798 = vrot.lane.b32.xlu1 %v6530_v8, %s6346_s23 }
  0x82   : > { %800 = vrot.lane.b32.xlu0 %v6518_v3, %s6346_s23  ;;  %802 = vrot.lane.b32.xlu1 %v6528_v7, %s6346_s23 }
  0x86   : > { %804 = vrot.lane.b32.xlu0 %v6538_v12, %s6346_s23  ;;  %780 = vrot.lane.b32.xlu1 %v6541_v13, %s6346_s23 }
  0x8a   : > { %782 = vrot.lane.b32.xlu0 %v6553_v18, %s6346_s23  ;;  %784 = vrot.lane.b32.xlu1 %v6557_v19, %s6346_s23 }
  0x8e   : > { %786 = vrot.lane.b32.xlu0 %v6568_v23, %s6346_s23  ;;  %778 = vrot.lane.b32.xlu1 %v6571_v24, %s6346_s23 }
  0x92   : > { %806 = vrot.lane.b32.xlu0 %v6579_v27, %s6346_s23  ;;  %808 = vrot.lane.b32.xlu1 %v6581_v28, %s6346_s23 }
  0x96   : > { %810 = vrot.lane.b32.xlu0 %v6589_v31, %s6346_s23  ;;  %812 = vrot.lane.b32.xlu1 %v6591_v32, %s6346_s23 }
  0x9a   : > { %788 = vrot.lane.b32.xlu0 %v6601_v35, %s6346_s23  ;;  %790 = vrot.lane.b32.xlu1 %v6605_v36, %s6346_s23 }
  0x9e   : > { %792 = vrot.lane.b32.xlu0 %v6615_v39, %s6346_s23  ;;  %794 = vrot.lane.b32.xlu1 %v6619_v40, %s6346_s23 }
  0xa2   : > { %1057 = vrot.lane.b32.xlu0 %v6520_v4, %s6347_s25  ;;  %1059 = vrot.lane.b32.xlu1 %v6530_v8, %s6347_s25 }
  0xa6   : > { %1061 = vrot.lane.b32.xlu0 %v6518_v3, %s6347_s25  ;;  %1063 = vrot.lane.b32.xlu1 %v6528_v7, %s6347_s25 }
  0xaa   : > { %1065 = vrot.lane.b32.xlu0 %v6538_v12, %s6347_s25  ;;  %1041 = vrot.lane.b32.xlu1 %v6541_v13, %s6347_s25 }
  0xae   : > { %1043 = vrot.lane.b32.xlu0 %v6553_v18, %s6347_s25  ;;  %1045 = vrot.lane.b32.xlu1 %v6557_v19, %s6347_s25 }
  0xb2   : > { %1047 = vrot.lane.b32.xlu0 %v6568_v23, %s6347_s25  ;;  %1039 = vrot.lane.b32.xlu1 %v6571_v24, %s6347_s25 }
  0xb6   : > { %1067 = vrot.lane.b32.xlu0 %v6579_v27, %s6347_s25  ;;  %1069 = vrot.lane.b32.xlu1 %v6581_v28, %s6347_s25 }
  0xba   : > { %1071 = vrot.lane.b32.xlu0 %v6589_v31, %s6347_s25  ;;  %1073 = vrot.lane.b32.xlu1 %v6591_v32, %s6347_s25 }
  0xbe   : > { %1049 = vrot.lane.b32.xlu0 %v6601_v35, %s6347_s25  ;;  %1051 = vrot.lane.b32.xlu1 %v6605_v36, %s6347_s25 }
  0xc2   : > { %1053 = vrot.lane.b32.xlu0 %v6615_v39, %s6347_s25  ;;  %1055 = vrot.lane.b32.xlu1 %v6619_v40, %s6347_s25 }
  0xc6   : > { %1318 = vrot.lane.b32.xlu0 %v6520_v4, %s6348_s28  ;;  %1320 = vrot.lane.b32.xlu1 %v6530_v8, %s6348_s28 }
  0xca   : > { %1322 = vrot.lane.b32.xlu0 %v6518_v3, %s6348_s28  ;;  %1324 = vrot.lane.b32.xlu1 %v6528_v7, %s6348_s28 }
  0xcc   : > { %v363_v41 = vpop.permute.xlu1 %362  ;;  %v359_v42 = vpop.permute.xlu0 %358 }
  0xce   : > { %1326 = vrot.lane.b32.xlu0 %v6538_v12, %s6348_s28  ;;  %1302 = vrot.lane.b32.xlu1 %v6541_v13, %s6348_s28 }
  0xd0   : > { %v365_v43 = vpop.permute.xlu1 %364  ;;  %v361_v44 = vpop.permute.xlu0 %360 }
  0xd1   : > { %v386_v45 = vsel %vm8968_vm1, %v361_v44, %v363_v41  ;;  %v385_v46 = vsel %vm8968_vm1, %v359_v42, %v361_v44  ;;  %v387_v48 = vsel %vm8968_vm1, %v363_v41, %v365_v43  ;;  %v323_v41 = vld [vmem:[#allocation5] sm:$0xf]  ;;  %v604_v42 = vsel %vm8969_vm0, %v6538_v12, 0 }
  0xd2   : > { %5819 = vmatprep.subr.msk.bf16.mxu0 %vm8969_vm0, %v386_v45  ;;  %1304 = vrot.lane.b32.xlu0 %v6553_v18, %s6348_s28  ;;  %v406_v47 = vsel %vm8969_vm0, %v385_v46, 0  ;;  %v412_v52 = vsel %vm8969_vm0, %v387_v48, 0  ;;  %v608_v45 = vsel %vm8969_vm0, %v6581_v28, 0 }
  0xd3   : > { %1306 = vrot.lane.b32.xlu1 %v6557_v19, %s6348_s28  ;;  %442 = vmatpush1.bf16.msra.mxu0 %v406_v47 }
  0xd4   : > { %v367_v49 = vpop.permute.xlu0 %366  ;;  %v343_v50 = vpop.permute.xlu1 %342 }
  0xd5   : > { %v388_v51 = vsel %vm8968_vm1, %v365_v43, %v367_v49 }
  0xd6   : > { %5821 = vmatprep.subr.msk.bf16.mxu1 %vm8969_vm0, %v388_v51  ;;  %1308 = vrot.lane.b32.xlu0 %v6568_v23, %s6348_s28 }
  0xd7   : > { %1300 = vrot.lane.b32.xlu1 %v6571_v24, %s6348_s28  ;;  %483 = vmatpush1.bf16.msra.mxu1 %v412_v52 }
  0xd8   : > { %v345_v53 = vpop.permute.xlu0 %344  ;;  %v347_v54 = vpop.permute.xlu1 %346 }
  0xd9   : > { %v378_v55 = vsel %vm8968_vm1, %v343_v50, %v345_v53  ;;  %v379_v60 = vsel %vm8968_vm1, %v345_v53, %v347_v54 }
  0xda   : > { %1328 = vrot.lane.b32.xlu0 %v6579_v27, %s6348_s28  ;;  %443 = vmatprep.subr.bf16.mxu0 %v378_v55 }
  0xdb   : > { %1330 = vrot.lane.b32.xlu1 %v6581_v28, %s6348_s28 }
  0xdc   : > { %v349_v56 = vpop.permute.xlu0 %348  ;;  %v341_v57 = vpop.permute.xlu1 %340 }
  0xdd   : > { %v380_v58 = vsel %vm8968_vm1, %v347_v54, %v349_v56  ;;  %v377_v59 = vsel %vm8968_vm1, %v341_v57, %v343_v50 }
  0xde   : > { %1332 = vrot.lane.b32.xlu0 %v6589_v31, %s6348_s28  ;;  %484 = vmatprep.subr.bf16.mxu1 %v380_v58 }
  0xdf   : > { %1334 = vrot.lane.b32.xlu1 %v6591_v32, %s6348_s28  ;;  %444 = vmatpush1.bf16.msra.mxu0 %v377_v59 }
  0xe0   : > { %485 = vmatpush1.bf16.msra.mxu1 %v379_v60  ;;  %v369_v61 = vpop.permute.xlu0 %368  ;;  %v371_v62 = vpop.permute.xlu1 %370 }
  0xe1   : > { %v389_v0 = vsel %vm8968_vm1, %v367_v49, %v369_v61  ;;  %v390_v1 = vsel %vm8968_vm1, %v369_v61, %v371_v62  ;;  %v777_v61 = vld [vmem:[#allocation5 + $0x8] sm:$0xf] }
  0xe2   : > { %1310 = vrot.lane.b32.xlu0 %v6601_v35, %s6348_s28  ;;  %5823 = vmatprep.subr.msk.bf16.mxu0 %vm8969_vm0, %v390_v1  ;;  %v418_v2 = vsel %vm8969_vm0, %v389_v0, 0 }
  0xe3   : > { %1312 = vrot.lane.b32.xlu1 %v6605_v36, %s6348_s28  ;;  %5820 = vmatmul.mubr.msk.bf16.vlgmr.msra.gmra.mxu0 %vm8965_vm2, %v329_v63 }
  0xe4   : > { %524 = vmatpush1.bf16.msra.mxu0 %v418_v2  ;;  %v373_v5 = vpop.permute.xlu0 %372  ;;  %v375_v6 = vpop.permute.xlu1 %374  ;;  %5822 = vmatmul.mubr.msk.bf16.vlgmr.msra.gmra.mxu1 %vm8965_vm2, %v329_v63 }
  0xe5   : > { %v391_v9 = vsel %vm8968_vm1, %v371_v62, %v373_v5  ;;  %v392_v10 = vsel %vm8968_vm1, %v373_v5, %v375_v6  ;;  %543 = vmatprep.mubr.bf16.mxu0 %v8970_v22  ;;  %584 = vmatprep.mubr.bf16.mxu1 %v8970_v22 }
  0xe6   : > { %1314 = vrot.lane.b32.xlu0 %v6615_v39, %s6348_s28  ;;  %5825 = vmatprep.subr.msk.bf16.mxu1 %vm8969_vm0, %v392_v10  ;;  %v424_v11 = vsel %vm8969_vm0, %v391_v9, 0 }
  0xe7   : > { %1316 = vrot.lane.b32.xlu1 %v6619_v40, %s6348_s28  ;;  %565 = vmatpush1.bf16.msra.mxu1 %v424_v11 }
  0xe8   : > { %v351_v14 = vpop.permute.xlu0 %350  ;;  %v353_v15 = vpop.permute.xlu1 %352 }
  0xe9   : > { %v382_v16 = vsel %vm8968_vm1, %v351_v14, %v353_v15  ;;  %v381_v17 = vsel %vm8968_vm1, %v349_v56, %v351_v14 }
  0xea   : > { %1579 = vrot.lane.b32.xlu0 %v6520_v4, %s6349_s5  ;;  %525 = vmatprep.subr.bf16.mxu0 %v382_v16 }
  0xeb   : > { %1581 = vrot.lane.b32.xlu1 %v6530_v8, %s6349_s5  ;;  %526 = vmatpush1.bf16.msra.mxu0 %v381_v17 }
  0xec   : > { %v355_v20 = vpop.permute.xlu0 %354  ;;  %v357_v21 = vpop.permute.xlu1 %356  ;;  %5827 = vmatprep.subr.msk.bf16.mxu0 %vm8969_vm0, %v6530_v8 }
  0xed   : > { %v384_v25 = vsel %vm8968_vm1, %v355_v20, %v357_v21  ;;  %v383_v26 = vsel %vm8968_vm1, %v353_v15, %v355_v20 }
  0xee   : > { %1583 = vrot.lane.b32.xlu0 %v6518_v3, %s6349_s5  ;;  %566 = vmatprep.subr.bf16.mxu1 %v384_v25 }
  0xef   : > { %1585 = vrot.lane.b32.xlu1 %v6528_v7, %s6349_s5  ;;  %5824 = vmatmul.mubr.msk.bf16.vlgmr.msra.gmra.mxu0 %vm8965_vm2, %v329_v63 }
  0xf0   : > { %567 = vmatpush1.bf16.msra.mxu1 %v383_v26  ;;  %626 = vmatpush1.bf16.msra.mxu0 %v596_v29  ;;  %v797_v30 = vpop.permute.xlu0 %796  ;;  %v799_v33 = vpop.permute.xlu1 %798 }
  0xf1   : > { %627 = vmatprep.subr.bf16.mxu0 %v6541_v13  ;;  %5829 = vmatprep.subr.msk.bf16.mxu1 %vm8969_vm0, %v6528_v7  ;;  %v823_v46 = vsel %vm8964_vm3, %v797_v30, %v799_v33 }
  0xf2   : > { %1587 = vrot.lane.b32.xlu0 %v6538_v12, %s6349_s5  ;;  %645 = vmatprep.mubr.bf16.mxu0 %v8970_v22  ;;  %v843_v50 = vsel %vm8969_vm0, %v823_v46, 0 }
  0xf3   : > { %1563 = vrot.lane.b32.xlu1 %v6541_v13, %s6349_s5  ;;  %5826 = vmatmul.mubr.msk.bf16.vlgmr.msra.gmra.mxu1 %vm8965_vm2, %v329_v63 }
  0xf4   : > { %628 = vmatpush1.bf16.msra.mxu0 %v6571_v24  ;;  %667 = vmatpush1.bf16.msra.mxu1 %v600_v34  ;;  %v801_v37 = vpop.permute.xlu0 %800  ;;  %v803_v38 = vpop.permute.xlu1 %802 }
  0xf5   : > { %668 = vmatprep.subr.bf16.mxu1 %v6557_v19  ;;  %5831 = vmatprep.subr.msk.bf16.mxu0 %vm8969_vm0, %v6579_v27  ;;  %v824_v48 = vsel %vm8964_vm3, %v799_v33, %v801_v37  ;;  %v825_v51 = vsel %vm8964_vm3, %v801_v37, %v803_v38 }
  0xf6   : > { %1565 = vrot.lane.b32.xlu0 %v6553_v18, %s6349_s5  ;;  %686 = vmatprep.mubr.bf16.mxu1 %v8970_v22  ;;  %v849_v57 = vsel %vm8969_vm0, %v825_v51, 0 }
  0xf7   : > { %1567 = vrot.lane.b32.xlu1 %v6557_v19, %s6349_s5  ;;  %5828 = vmatmul.mubr.msk.bf16.vlgmr.msra.gmra.mxu0 %vm8965_vm2, %v323_v41 }
  0xf8   : > { %669 = vmatpush1.bf16.msra.mxu1 %v6553_v18  ;;  %708 = vmatpush1.bf16.msra.mxu0 %v604_v42  ;;  %v805_v43 = vpop.permute.xlu0 %804  ;;  %v781_v44 = vpop.permute.xlu1 %780 }
  0xf9   : > { %709 = vmatprep.subr.bf16.mxu0 %v6601_v35  ;;  %5833 = vmatprep.subr.msk.bf16.mxu1 %vm8969_vm0, %v6589_v31  ;;  %v826_v54 = vsel %vm8964_vm3, %v803_v38, %v805_v43 }
  0xfa   : > { %1569 = vrot.lane.b32.xlu0 %v6568_v23, %s6349_s5  ;;  %727 = vmatprep.mubr.bf16.mxu0 %v8970_v22 }
  0xfb   : > { %1561 = vrot.lane.b32.xlu1 %v6571_v24, %s6349_s5  ;;  %5830 = vmatmul.mubr.msk.bf16.vlgmr.msra.gmra.mxu1 %vm8965_vm2, %v323_v41 }
  0xfc   : > { %710 = vmatpush1.bf16.msra.mxu0 %v6568_v23  ;;  %749 = vmatpush1.bf16.msra.mxu1 %v608_v45  ;;  %v783_v47 = vpop.permute.xlu0 %782  ;;  %v785_v49 = vpop.permute.xlu1 %784 }
  0xfd   : > { %5835 = vmatprep.subr.msk.bf16.mxu0 %vm8969_vm0, %v824_v48  ;;  %750 = vmatprep.subr.bf16.mxu1 %v6615_v39  ;;  %v816_v53 = vsel %vm8964_vm3, %v781_v44, %v783_v47  ;;  %v817_v1 = vsel %vm8964_vm3, %v783_v47, %v785_v49 }
  0xfe   : > { %1589 = vrot.lane.b32.xlu0 %v6579_v27, %s6349_s5  ;;  %768 = vmatprep.mubr.bf16.mxu1 %v8970_v22 }
  0xff   : > { %1591 = vrot.lane.b32.xlu1 %v6581_v28, %s6349_s5  ;;  %5832 = vmatmul.mubr.msk.bf16.vlgmr.msra.gmra.mxu0 %vm8965_vm2, %v323_v41 }
 0x100   : > { %751 = vmatpush1.bf16.msra.mxu1 %v6605_v36  ;;  %879 = vmatpush1.bf16.msra.mxu0 %v843_v50  ;;  %v787_v52 = vpop.permute.xlu0 %786  ;;  %v779_v55 = vpop.permute.xlu1 %778 }
 0x101   : > { %880 = vmatprep.subr.bf16.mxu0 %v816_v53  ;;  %5837 = vmatprep.subr.msk.bf16.mxu1 %vm8969_vm0, %v826_v54  ;;  %v815_v56 = vsel %vm8964_vm3, %v779_v55, %v781_v44  ;;  %v818_v59 = vsel %vm8964_vm3, %v785_v49, %v787_v52  ;;  %v1038_v53 = vld [vmem:[#allocation5 + $0xc] sm:$0xf] }
 0x102   : > { %1593 = vrot.lane.b32.xlu0 %v6589_v31, %s6349_s5  ;;  %898 = vmatprep.mubr.bf16.mxu0 %v8970_v22 }
 0x103   : > { %1595 = vrot.lane.b32.xlu1 %v6591_v32, %s6349_s5  ;;  %5834 = vmatmul.mubr.msk.bf16.vlgmr.msra.gmra.mxu1 %vm8965_vm2, %v323_v41 }
 0x104   : > { %881 = vmatpush1.bf16.msra.mxu0 %v815_v56  ;;  %920 = vmatpush1.bf16.msra.mxu1 %v849_v57  ;;  %v807_v58 = vpop.permute.xlu0 %806  ;;  %v809_v60 = vpop.permute.xlu1 %808 }
 0x105   : > { %v827_v62 = vsel %vm8964_vm3, %v805_v43, %v807_v58  ;;  %921 = vmatprep.subr.bf16.mxu1 %v818_v59  ;;  %v828_v63 = vsel %vm8964_vm3, %v807_v58, %v809_v60  ;;  %939 = vmatprep.mubr.bf16.mxu1 %v8970_v22 }
 0x106   : > { %1571 = vrot.lane.b32.xlu0 %v6601_v35, %s6349_s5  ;;  %5839 = vmatprep.subr.msk.bf16.mxu0 %vm8969_vm0, %v828_v63  ;;  %v855_v0 = vsel %vm8969_vm0, %v827_v62, 0 }
 0x107   : > { %1573 = vrot.lane.b32.xlu1 %v6605_v36, %s6349_s5  ;;  %5836 = vmatmul.mubr.msk.bf16.vlgmr.msra.gmra.mxu0 %vm8965_vm2, %v777_v61 }
 0x108   : > { %922 = vmatpush1.bf16.msra.mxu1 %v817_v1  ;;  %961 = vmatpush1.bf16.msra.mxu0 %v855_v0  ;;  %v811_v2 = vpop.permute.xlu0 %810  ;;  %v813_v5 = vpop.permute.xlu1 %812 }
 0x109   : > { %v829_v6 = vsel %vm8964_vm3, %v809_v60, %v811_v2  ;;  %v830_v9 = vsel %vm8964_vm3, %v811_v2, %v813_v5  ;;  %980 = vmatprep.mubr.bf16.mxu0 %v8970_v22 }
 0x10a   : > { %1575 = vrot.lane.b32.xlu0 %v6615_v39, %s6349_s5  ;;  %5841 = vmatprep.subr.msk.bf16.mxu1 %vm8969_vm0, %v830_v9  ;;  %v861_v10 = vsel %vm8969_vm0, %v829_v6, 0 }
 0x10b   : > { %1577 = vrot.lane.b32.xlu1 %v6619_v40, %s6349_s5  ;;  %5838 = vmatmul.mubr.msk.bf16.vlgmr.msra.gmra.mxu1 %vm8965_vm2, %v777_v61 }
 0x10c   : > { %1002 = vmatpush1.bf16.msra.mxu1 %v861_v10  ;;  %v789_v11 = vpop.permute.xlu0 %788  ;;  %v791_v14 = vpop.permute.xlu1 %790  ;;  %1021 = vmatprep.mubr.bf16.mxu1 %v8970_v22 }
 0x10d   : > { %v820_v15 = vsel %vm8964_vm3, %v789_v11, %v791_v14  ;;  %v819_v16 = vsel %vm8964_vm3, %v787_v52, %v789_v11 }
 0x10e   : > { %1840 = vrot.lane.b32.xlu0 %v6520_v4, %s6350_s6  ;;  %962 = vmatprep.subr.bf16.mxu0 %v820_v15 }
 0x10f   : > { %1842 = vrot.lane.b32.xlu1 %v6530_v8, %s6350_s6  ;;  %963 = vmatpush1.bf16.msra.mxu0 %v819_v16 }
 0x110   : > { %v793_v17 = vpop.permute.xlu0 %792  ;;  %v795_v20 = vpop.permute.xlu1 %794 }
 0x111   : > { %v822_v21 = vsel %vm8964_vm3, %v793_v17, %v795_v20  ;;  %v821_v25 = vsel %vm8964_vm3, %v791_v14, %v793_v17 }
 0x112   : > { %1844 = vrot.lane.b32.xlu0 %v6518_v3, %s6350_s6  ;;  %1003 = vmatprep.subr.bf16.mxu1 %v822_v21 }
 0x113   : > { %1846 = vrot.lane.b32.xlu1 %v6528_v7, %s6350_s6  ;;  %1004 = vmatpush1.bf16.msra.mxu1 %v821_v25 }
 0x114   : > { %v1058_v26 = vpop.permute.xlu0 %1057  ;;  %v1060_v29 = vpop.permute.xlu1 %1059  ;;  %5840 = vmatmul.mubr.msk.bf16.vlgmr.msra.gmra.mxu0 %vm8965_vm2, %v777_v61 }
 0x115   : > { %1159 = vmatprep.mubr.bf16.mxu0 %v8970_v22  ;;  %v1084_v30 = vsel %vm8963_vm4, %v1058_v26, %v1060_v29 }
 0x116   : > { %1848 = vrot.lane.b32.xlu0 %v6538_v12, %s6350_s6  ;;  %5842 = vmatmul.mubr.msk.bf16.vlgmr.msra.gmra.mxu1 %vm8965_vm2, %v777_v61  ;;  %v1104_v38 = vsel %vm8969_vm0, %v1084_v30, 0 }
 0x117   : > { %1824 = vrot.lane.b32.xlu1 %v6541_v13, %s6350_s6  ;;  %1200 = vmatprep.mubr.bf16.mxu1 %v8970_v22 }
 0x118   : > { %v1062_v33 = vpop.permute.xlu0 %1061  ;;  %v1064_v34 = vpop.permute.xlu1 %1063 }
 0x119   : > { %v1085_v37 = vsel %vm8963_vm4, %v1060_v29, %v1062_v33  ;;  %v1086_v41 = vsel %vm8963_vm4, %v1062_v33, %v1064_v34 }
 0x11a   : > { %1826 = vrot.lane.b32.xlu0 %v6553_v18, %s6350_s6  ;;  %5843 = vmatprep.subr.msk.bf16.mxu0 %vm8969_vm0, %v1085_v37  ;;  %v1110_v45 = vsel %vm8969_vm0, %v1086_v41, 0 }
 0x11b   : > { %1828 = vrot.lane.b32.xlu1 %v6557_v19, %s6350_s6  ;;  %1140 = vmatpush1.bf16.msra.mxu0 %v1104_v38 }
 0x11c   : > { %v1066_v42 = vpop.permute.xlu0 %1065  ;;  %v1042_v43 = vpop.permute.xlu1 %1041 }
 0x11d   : > { %v1087_v44 = vsel %vm8963_vm4, %v1064_v34, %v1066_v42 }
 0x11e   : > { %1830 = vrot.lane.b32.xlu0 %v6568_v23, %s6350_s6  ;;  %5845 = vmatprep.subr.msk.bf16.mxu1 %vm8969_vm0, %v1087_v44 }
 0x11f   : > { %1822 = vrot.lane.b32.xlu1 %v6571_v24, %s6350_s6  ;;  %1181 = vmatpush1.bf16.msra.mxu1 %v1110_v45 }
 0x120   : > { %v1044_v46 = vpop.permute.xlu0 %1043  ;;  %v1046_v47 = vpop.permute.xlu1 %1045 }
 0x121   : > { %v1077_v48 = vsel %vm8963_vm4, %v1042_v43, %v1044_v46  ;;  %v1078_v54 = vsel %vm8963_vm4, %v1044_v46, %v1046_v47 }
 0x122   : > { %1850 = vrot.lane.b32.xlu0 %v6579_v27, %s6350_s6  ;;  %1141 = vmatprep.subr.bf16.mxu0 %v1077_v48  ;;  %v1299_v48 = vld [vmem:[#allocation5 + $0x10] sm:$0xf] }
 0x123   : > { %1852 = vrot.lane.b32.xlu1 %v6581_v28, %s6350_s6 }
 0x124   : > { %v1048_v49 = vpop.permute.xlu0 %1047  ;;  %v1040_v50 = vpop.permute.xlu1 %1039 }
 0x125   : > { %v1076_v51 = vsel %vm8963_vm4, %v1040_v50, %v1042_v43  ;;  %v1079_v52 = vsel %vm8963_vm4, %v1046_v47, %v1048_v49 }
 0x126   : > { %1854 = vrot.lane.b32.xlu0 %v6589_v31, %s6350_s6  ;;  %1142 = vmatpush1.bf16.msra.mxu0 %v1076_v51 }
 0x127   : > { %1856 = vrot.lane.b32.xlu1 %v6591_v32, %s6350_s6  ;;  %1182 = vmatprep.subr.bf16.mxu1 %v1079_v52 }
 0x128   : > { %1183 = vmatpush1.bf16.msra.mxu1 %v1078_v54  ;;  %v1068_v55 = vpop.permute.xlu0 %1067  ;;  %v1070_v56 = vpop.permute.xlu1 %1069 }
 0x129   : > { %v1088_v57 = vsel %vm8963_vm4, %v1066_v42, %v1068_v55  ;;  %v1089_v58 = vsel %vm8963_vm4, %v1068_v55, %v1070_v56  ;;  %5844 = vmatmul.mubr.msk.bf16.vlgmr.msra.gmra.mxu0 %vm8965_vm2, %v1038_v53 }
 0x12a   : > { %1832 = vrot.lane.b32.xlu0 %v6601_v35, %s6350_s6  ;;  %5847 = vmatprep.subr.msk.bf16.mxu0 %vm8969_vm0, %v1089_v58  ;;  %v1116_v59 = vsel %vm8969_vm0, %v1088_v57, 0 }
 0x12b   : > { %1834 = vrot.lane.b32.xlu1 %v6605_v36, %s6350_s6  ;;  %1222 = vmatpush1.bf16.msra.mxu0 %v1116_v59 }
 0x12c   : > { %v1072_v60 = vpop.permute.xlu0 %1071  ;;  %v1074_v61 = vpop.permute.xlu1 %1073  ;;  %5846 = vmatmul.mubr.msk.bf16.vlgmr.msra.gmra.mxu1 %vm8965_vm2, %v1038_v53  ;;  %1241 = vmatprep.mubr.bf16.mxu0 %v8970_v22 }
 0x12d   : > { %v1090_v62 = vsel %vm8963_vm4, %v1070_v56, %v1072_v60  ;;  %v1091_v63 = vsel %vm8963_vm4, %v1072_v60, %v1074_v61  ;;  %1282 = vmatprep.mubr.bf16.mxu1 %v8970_v22 }
 0x12e   : > { %1836 = vrot.lane.b32.xlu0 %v6615_v39, %s6350_s6  ;;  %5849 = vmatprep.subr.msk.bf16.mxu1 %vm8969_vm0, %v1091_v63  ;;  %v1122_v0 = vsel %vm8969_vm0, %v1090_v62, 0 }
 0x12f   : > { %1838 = vrot.lane.b32.xlu1 %v6619_v40, %s6350_s6  ;;  %1263 = vmatpush1.bf16.msra.mxu1 %v1122_v0 }
 0x130   : > { %v1050_v1 = vpop.permute.xlu0 %1049  ;;  %v1052_v2 = vpop.permute.xlu1 %1051 }
 0x131   : > { %v1081_v5 = vsel %vm8963_vm4, %v1050_v1, %v1052_v2  ;;  %v1080_v6 = vsel %vm8963_vm4, %v1048_v49, %v1050_v1 }
 0x132   : > { %2101 = vrot.lane.b32.xlu0 %v6520_v4, %s6351_s10  ;;  %1223 = vmatprep.subr.bf16.mxu0 %v1081_v5 }
 0x133   : > { %2103 = vrot.lane.b32.xlu1 %v6530_v8, %s6351_s10  ;;  %1224 = vmatpush1.bf16.msra.mxu0 %v1080_v6 }
 0x134   : > { %v1054_v9 = vpop.permute.xlu0 %1053  ;;  %v1056_v10 = vpop.permute.xlu1 %1055 }
 0x135   : > { %v1083_v11 = vsel %vm8963_vm4, %v1054_v9, %v1056_v10  ;;  %v1082_v14 = vsel %vm8963_vm4, %v1052_v2, %v1054_v9 }
 0x136   : > { %2105 = vrot.lane.b32.xlu0 %v6518_v3, %s6351_s10  ;;  %1264 = vmatprep.subr.bf16.mxu1 %v1083_v11 }
 0x137   : > { %2107 = vrot.lane.b32.xlu1 %v6528_v7, %s6351_s10  ;;  %1265 = vmatpush1.bf16.msra.mxu1 %v1082_v14 }
 0x138   : > { %v1319_v15 = vpop.permute.xlu0 %1318  ;;  %v1321_v16 = vpop.permute.xlu1 %1320  ;;  %5848 = vmatmul.mubr.msk.bf16.vlgmr.msra.gmra.mxu0 %vm8965_vm2, %v1038_v53 }
 0x139   : > { %1420 = vmatprep.mubr.bf16.mxu0 %v8970_v22  ;;  %v1345_v17 = vsel %vm8961_vm5, %v1319_v15, %v1321_v16 }
 0x13a   : > { %2109 = vrot.lane.b32.xlu0 %v6538_v12, %s6351_s10  ;;  %5850 = vmatmul.mubr.msk.bf16.vlgmr.msra.gmra.mxu1 %vm8965_vm2, %v1038_v53  ;;  %v1365_v26 = vsel %vm8969_vm0, %v1345_v17, 0 }
 0x13b   : > { %2085 = vrot.lane.b32.xlu1 %v6541_v13, %s6351_s10  ;;  %1461 = vmatprep.mubr.bf16.mxu1 %v8970_v22 }
 0x13c   : > { %v1323_v20 = vpop.permute.xlu0 %1322  ;;  %v1325_v21 = vpop.permute.xlu1 %1324 }
 0x13d   : > { %v1346_v25 = vsel %vm8961_vm5, %v1321_v16, %v1323_v20  ;;  %v1347_v29 = vsel %vm8961_vm5, %v1323_v20, %v1325_v21 }
 0x13e   : > { %2087 = vrot.lane.b32.xlu0 %v6553_v18, %s6351_s10  ;;  %5851 = vmatprep.subr.msk.bf16.mxu0 %vm8969_vm0, %v1346_v25  ;;  %v1371_v37 = vsel %vm8969_vm0, %v1347_v29, 0 }
 0x13f   : > { %2089 = vrot.lane.b32.xlu1 %v6557_v19, %s6351_s10  ;;  %1401 = vmatpush1.bf16.msra.mxu0 %v1365_v26 }
 0x140   : > { %v1327_v30 = vpop.permute.xlu0 %1326  ;;  %v1303_v33 = vpop.permute.xlu1 %1302 }
 0x141   : > { %v1348_v34 = vsel %vm8961_vm5, %v1325_v21, %v1327_v30 }
 0x142   : > { %2091 = vrot.lane.b32.xlu0 %v6568_v23, %s6351_s10  ;;  %5853 = vmatprep.subr.msk.bf16.mxu1 %vm8969_vm0, %v1348_v34 }
 0x143   : > { %2083 = vrot.lane.b32.xlu1 %v6571_v24, %s6351_s10  ;;  %1442 = vmatpush1.bf16.msra.mxu1 %v1371_v37 }
 0x144   : > { %v1305_v38 = vpop.permute.xlu0 %1304 }
 0x145   : > { %v1307_v41 = vpop.permute.xlu1 %1306  ;;  %v1338_v42 = vsel %vm8961_vm5, %v1303_v33, %v1305_v38 }
 0x146   : > { %2111 = vrot.lane.b32.xlu0 %v6579_v27, %s6351_s10  ;;  %1402 = vmatprep.subr.bf16.mxu0 %v1338_v42  ;;  %v1339_v47 = vsel %vm8961_vm5, %v1305_v38, %v1307_v41 }
 0x147   : > { %2113 = vrot.lane.b32.xlu1 %v6581_v28, %s6351_s10 }
 0x148   : > { %v1309_v43 = vpop.permute.xlu0 %1308 }
 0x149   : > { %v1301_v44 = vpop.permute.xlu1 %1300  ;;  %v1340_v45 = vsel %vm8961_vm5, %v1307_v41, %v1309_v43 }
 0x14a   : > { %v1337_v46 = vsel %vm8961_vm5, %v1301_v44, %v1303_v33  ;;  %2115 = vrot.lane.b32.xlu0 %v6589_v31, %s6351_s10  ;;  %1443 = vmatprep.subr.bf16.mxu1 %v1340_v45 }
 0x14b   : > { %2117 = vrot.lane.b32.xlu1 %v6591_v32, %s6351_s10  ;;  %1403 = vmatpush1.bf16.msra.mxu0 %v1337_v46 }
 0x14c   : > { %1444 = vmatpush1.bf16.msra.mxu1 %v1339_v47  ;;  %v1329_v49 = vpop.permute.xlu0 %1328 }
 0x14d   : > { %v1349_v50 = vsel %vm8961_vm5, %v1327_v30, %v1329_v49  ;;  %v1331_v51 = vpop.permute.xlu1 %1330 }
 0x14e   : > { %2093 = vrot.lane.b32.xlu0 %v6601_v35, %s6351_s10  ;;  %v1350_v52 = vsel %vm8961_vm5, %v1329_v49, %v1331_v51  ;;  %5852 = vmatmul.mubr.msk.bf16.vlgmr.msra.gmra.mxu0 %vm8965_vm2, %v1299_v48  ;;  %v1377_v53 = vsel %vm8969_vm0, %v1349_v50, 0 }
 0x14f   : > { %2095 = vrot.lane.b32.xlu1 %v6605_v36, %s6351_s10  ;;  %5855 = vmatprep.subr.msk.bf16.mxu0 %vm8969_vm0, %v1350_v52 }
 0x150   : > { %1483 = vmatpush1.bf16.msra.mxu0 %v1377_v53  ;;  %v1333_v54 = vpop.permute.xlu0 %1332  ;;  %5854 = vmatmul.mubr.msk.bf16.vlgmr.msra.gmra.mxu1 %vm8965_vm2, %v1299_v48 }
 0x151   : > { %v1351_v55 = vsel %vm8961_vm5, %v1331_v51, %v1333_v54  ;;  %v1335_v56 = vpop.permute.xlu1 %1334  ;;  %1502 = vmatprep.mubr.bf16.mxu0 %v8970_v22  ;;  %1543 = vmatprep.mubr.bf16.mxu1 %v8970_v22 }
 0x152   : > { %v1352_v57 = vsel %vm8961_vm5, %v1333_v54, %v1335_v56  ;;  %2097 = vrot.lane.b32.xlu0 %v6615_v39, %s6351_s10  ;;  %v1383_v58 = vsel %vm8969_vm0, %v1351_v55, 0 }
 0x153   : > { %2099 = vrot.lane.b32.xlu1 %v6619_v40, %s6351_s10  ;;  %5857 = vmatprep.subr.msk.bf16.mxu1 %vm8969_vm0, %v1352_v57 }
 0x154   : > { %1524 = vmatpush1.bf16.msra.mxu1 %v1383_v58  ;;  %v1311_v59 = vpop.permute.xlu0 %1310 }
 0x155   : > { %v1313_v60 = vpop.permute.xlu1 %1312  ;;  %v1341_v61 = vsel %vm8961_vm5, %v1309_v43, %v1311_v59 }
 0x156   : > { %2362 = vrot.lane.b32.xlu0 %v6520_v4, %s6352_s11  ;;  %v1342_v62 = vsel %vm8961_vm5, %v1311_v59, %v1313_v60 }
 0x157   : > { %2364 = vrot.lane.b32.xlu1 %v6530_v8, %s6352_s11  ;;  %1484 = vmatprep.subr.bf16.mxu0 %v1342_v62 }
 0x158   : > { %1485 = vmatpush1.bf16.msra.mxu0 %v1341_v61  ;;  %v1315_v63 = vpop.permute.xlu0 %1314  ;;  %v251_v61 = vld [vmem:[%s8953_s2] sm:$0xff] }
 0x159   : > { %v1317_v0 = vpop.permute.xlu1 %1316  ;;  %v1343_v1 = vsel %vm8961_vm5, %v1313_v60, %v1315_v63 }
 0x15a   : > { %2366 = vrot.lane.b32.xlu0 %v6518_v3, %s6352_s11  ;;  %v1344_v2 = vsel %vm8961_vm5, %v1315_v63, %v1317_v0  ;;  %v1821_v0 = vld [vmem:[#allocation5 + $0x18] sm:$0xf] }
 0x15b   : > { %2368 = vrot.lane.b32.xlu1 %v6528_v7, %s6352_s11  ;;  %1525 = vmatprep.subr.bf16.mxu1 %v1344_v2 }
 0x15c   : > { %1526 = vmatpush1.bf16.msra.mxu1 %v1343_v1  ;;  %v1580_v4 = vpop.permute.xlu0 %1579  ;;  %5856 = vmatmul.mubr.msk.bf16.vlgmr.msra.gmra.mxu0 %vm8965_vm2, %v1299_v48 }
 0x15d   : > { %v1582_v8 = vpop.permute.xlu1 %1581  ;;  %1681 = vmatprep.mubr.bf16.mxu0 %v8970_v22 }
 0x15e   : > { %2370 = vrot.lane.b32.xlu0 %v6538_v12, %s6352_s11  ;;  %v1606_v5 = vsel %vm8960_vm6, %v1580_v4, %v1582_v8 }
 0x15f   : > { %2346 = vrot.lane.b32.xlu1 %v6541_v13, %s6352_s11  ;;  %5858 = vmatmul.mubr.msk.bf16.vlgmr.msra.gmra.mxu1 %vm8965_vm2, %v1299_v48  ;;  %v1626_v12 = vsel %vm8969_vm0, %v1606_v5, 0 }
 0x160   : > { %v1584_v3 = vpop.permute.xlu0 %1583  ;;  %1722 = vmatprep.mubr.bf16.mxu1 %v8970_v22 }
 0x161   : > { %v1586_v7 = vpop.permute.xlu1 %1585  ;;  %v1607_v6 = vsel %vm8960_vm6, %v1582_v8, %v1584_v3 }
 0x162   : > { %2348 = vrot.lane.b32.xlu0 %v6553_v18, %s6352_s11  ;;  %5859 = vmatprep.subr.msk.bf16.mxu0 %vm8969_vm0, %v1607_v6  ;;  %v1608_v9 = vsel %vm8960_vm6, %v1584_v3, %v1586_v7 }
 0x163   : > { %2350 = vrot.lane.b32.xlu1 %v6557_v19, %s6352_s11  ;;  %1662 = vmatpush1.bf16.msra.mxu0 %v1626_v12  ;;  %v1632_v18 = vsel %vm8969_vm0, %v1608_v9, 0 }
 0x164   : > { %v1588_v13 = vpop.permute.xlu0 %1587 }
 0x165   : > { %v1564_v10 = vpop.permute.xlu1 %1563  ;;  %v1609_v11 = vsel %vm8960_vm6, %v1586_v7, %v1588_v13 }
 0x166   : > { %2352 = vrot.lane.b32.xlu0 %v6568_v23, %s6352_s11  ;;  %5861 = vmatprep.subr.msk.bf16.mxu1 %vm8969_vm0, %v1609_v11 }
 0x167   : > { %2344 = vrot.lane.b32.xlu1 %v6571_v24, %s6352_s11  ;;  %1703 = vmatpush1.bf16.msra.mxu1 %v1632_v18 }
 0x168   : > { %v1566_v14 = vpop.permute.xlu0 %1565 }
 0x169   : > { %v1568_v15 = vpop.permute.xlu1 %1567  ;;  %v1599_v19 = vsel %vm8960_vm6, %v1564_v10, %v1566_v14 }
 0x16a   : > { %2372 = vrot.lane.b32.xlu0 %v6579_v27, %s6352_s11  ;;  %1663 = vmatprep.subr.bf16.mxu0 %v1599_v19  ;;  %v1600_v24 = vsel %vm8960_vm6, %v1566_v14, %v1568_v15  ;;  %v1560_v27 = vld [vmem:[#allocation5 + $0x14] sm:$0xf] }
 0x16b   : > { %2374 = vrot.lane.b32.xlu1 %v6581_v28, %s6352_s11 }
 0x16c   : > { %v1570_v23 = vpop.permute.xlu0 %1569 }
 0x16d   : > { %v1562_v16 = vpop.permute.xlu1 %1561  ;;  %v1601_v17 = vsel %vm8960_vm6, %v1568_v15, %v1570_v23 }
 0x16e   : > { %v1598_v20 = vsel %vm8960_vm6, %v1562_v16, %v1564_v10  ;;  %2376 = vrot.lane.b32.xlu0 %v6589_v31, %s6352_s11  ;;  %1704 = vmatprep.subr.bf16.mxu1 %v1601_v17 }
 0x16f   : > { %2378 = vrot.lane.b32.xlu1 %v6591_v32, %s6352_s11  ;;  %1664 = vmatpush1.bf16.msra.mxu0 %v1598_v20 }
 0x170   : > { %1705 = vmatpush1.bf16.msra.mxu1 %v1600_v24  ;;  %v1590_v21 = vpop.permute.xlu0 %1589 }
 0x171   : > { %v1610_v28 = vsel %vm8960_vm6, %v1588_v13, %v1590_v21  ;;  %v1592_v25 = vpop.permute.xlu1 %1591 }
 0x172   : > { %5860 = vmatmul.mubr.msk.bf16.vlgmr.msra.gmra.mxu0 %vm8965_vm2, %v1560_v27  ;;  %2354 = vrot.lane.b32.xlu0 %v6601_v35, %s6352_s11  ;;  %v1611_v31 = vsel %vm8960_vm6, %v1590_v21, %v1592_v25  ;;  %v1638_v26 = vsel %vm8969_vm0, %v1610_v28, 0 }
 0x173   : > { %2356 = vrot.lane.b32.xlu1 %v6605_v36, %s6352_s11  ;;  %5862 = vmatmul.mubr.msk.bf16.vlgmr.msra.gmra.mxu1 %vm8965_vm2, %v1560_v27 }
 0x174   : > { %5863 = vmatprep.subr.msk.bf16.mxu0 %vm8969_vm0, %v1611_v31  ;;  %v1594_v32 = vpop.permute.xlu0 %1593  ;;  %1763 = vmatprep.mubr.bf16.mxu0 %v8970_v22 }
 0x175   : > { %1744 = vmatpush1.bf16.msra.mxu0 %v1638_v26  ;;  %v1612_v29 = vsel %vm8960_vm6, %v1592_v25, %v1594_v32  ;;  %v1596_v30 = vpop.permute.xlu1 %1595  ;;  %1804 = vmatprep.mubr.bf16.mxu1 %v8970_v22 }
 0x176   : > { %v1613_v35 = vsel %vm8960_vm6, %v1594_v32, %v1596_v30  ;;  %2358 = vrot.lane.b32.xlu0 %v6615_v39, %s6352_s11  ;;  %v1644_v36 = vsel %vm8969_vm0, %v1612_v29, 0 }
 0x177   : > { %2360 = vrot.lane.b32.xlu1 %v6619_v40, %s6352_s11  ;;  %5865 = vmatprep.subr.msk.bf16.mxu1 %vm8969_vm0, %v1613_v35 }
 0x178   : > { %1785 = vmatpush1.bf16.msra.mxu1 %v1644_v36  ;;  %v1572_v33 = vpop.permute.xlu0 %1571 }
 0x179   : > { %v1574_v34 = vpop.permute.xlu1 %1573  ;;  %v1602_v37 = vsel %vm8960_vm6, %v1570_v23, %v1572_v33 }
 0x17a   : > { %v1603_v38 = vsel %vm8960_vm6, %v1572_v33, %v1574_v34  ;;  %2606 = vperm.xlu0 %6052, %v251_v61  }
 0x17b   : > { %1745 = vmatprep.subr.bf16.mxu0 %v1603_v38 }
 0x17c   : > { %1746 = vmatpush1.bf16.msra.mxu0 %v1602_v37  ;;  %v1576_v41 = vpop.permute.xlu0 %1575 }
 0x17d   : > { %v1578_v42 = vpop.permute.xlu1 %1577  ;;  %v1604_v39 = vsel %vm8960_vm6, %v1574_v34, %v1576_v41 }
 0x17e   : > { %v1605_v43 = vsel %vm8960_vm6, %v1576_v41, %v1578_v42 }
 0x17f   : > { %5864 = vmatmul.mubr.msk.bf16.vlgmr.msra.gmra.mxu0 %vm8965_vm2, %v1560_v27  ;;  %1786 = vmatprep.subr.bf16.mxu1 %v1605_v43 }
 0x180   : > { %1787 = vmatpush1.bf16.msra.mxu1 %v1604_v39  ;;  %v1841_v40 = vpop.permute.xlu0 %1840  ;;  %1942 = vmatprep.mubr.bf16.mxu0 %v8970_v22 }
 0x181   : > { %v1843_v44 = vpop.permute.xlu1 %1842 }
 0x182   : > { %v1867_v45 = vsel %vm8962_vm7, %v1841_v40, %v1843_v44 }
 0x183   : > { %5866 = vmatmul.mubr.msk.bf16.vlgmr.msra.gmra.mxu1 %vm8965_vm2, %v1560_v27  ;;  %v1887_v49 = vsel %vm8969_vm0, %v1867_v45, 0 }
 0x184   : > { %v1845_v46 = vpop.permute.xlu0 %1844  ;;  %1983 = vmatprep.mubr.bf16.mxu1 %v8970_v22 }
 0x185   : > { %v1847_v47 = vpop.permute.xlu1 %1846  ;;  %v1868_v48 = vsel %vm8962_vm7, %v1843_v44, %v1845_v46 }
 0x186   : > { %5867 = vmatprep.subr.msk.bf16.mxu0 %vm8969_vm0, %v1868_v48  ;;  %v1869_v50 = vsel %vm8962_vm7, %v1845_v46, %v1847_v47 }
 0x187   : > { %1923 = vmatpush1.bf16.msra.mxu0 %v1887_v49  ;;  %v1893_v54 = vsel %vm8969_vm0, %v1869_v50, 0 }
 0x188   : > { %v1849_v51 = vpop.permute.xlu0 %1848 }
 0x189   : > { %v1825_v52 = vpop.permute.xlu1 %1824  ;;  %v1870_v53 = vsel %vm8962_vm7, %v1847_v47, %v1849_v51 }
 0x18a   : > { %5869 = vmatprep.subr.msk.bf16.mxu1 %vm8969_vm0, %v1870_v53 }
 0x18b   : > { %1964 = vmatpush1.bf16.msra.mxu1 %v1893_v54  ;;  %v7118_v54 = vld [vmem:[#allocation5 + $0x1c] sm:$0xf] }
 0x18c   : > { %v1827_v55 = vpop.permute.xlu0 %1826 }
 0x18d   : > { %v1829_v56 = vpop.permute.xlu1 %1828  ;;  %v1860_v57 = vsel %vm8962_vm7, %v1825_v52, %v1827_v55 }
 0x18e   : > { %1924 = vmatprep.subr.bf16.mxu0 %v1860_v57  ;;  %v1861_v63 = vsel %vm8962_vm7, %v1827_v55, %v1829_v56 }
 0x190   : > { %v1831_v58 = vpop.permute.xlu0 %1830 }
 0x191   : > { %v1823_v59 = vpop.permute.xlu1 %1822  ;;  %v1862_v60 = vsel %vm8962_vm7, %v1829_v56, %v1831_v58 }
 0x192   : > { %v1859_v62 = vsel %vm8962_vm7, %v1823_v59, %v1825_v52  ;;  %1965 = vmatprep.subr.bf16.mxu1 %v1862_v60 }
 0x193   : > { %1925 = vmatpush1.bf16.msra.mxu0 %v1859_v62  ;;  %1966 = vmatpush1.bf16.msra.mxu1 %v1861_v63 }
 0x194   : > { %v1851_v1 = vpop.permute.xlu0 %1850 }
 0x195   : > { %v1871_v2 = vsel %vm8962_vm7, %v1849_v51, %v1851_v1  ;;  %v1853_v4 = vpop.permute.xlu1 %1852 }
 0x196   : > { %5868 = vmatmul.mubr.msk.bf16.vlgmr.msra.gmra.mxu0 %vm8965_vm2, %v1821_v0  ;;  %5870 = vmatmul.mubr.msk.bf16.vlgmr.msra.gmra.mxu1 %vm8965_vm2, %v1821_v0  ;;  %v1872_v8 = vsel %vm8962_vm7, %v1851_v1, %v1853_v4  ;;  %v1899_v5 = vsel %vm8969_vm0, %v1871_v2, 0 }
 0x197   : > { %5871 = vmatprep.subr.msk.bf16.mxu0 %vm8969_vm0, %v1872_v8  ;;  %2024 = vmatprep.mubr.bf16.mxu0 %v8970_v22 }
 0x198   : > { %2005 = vmatpush1.bf16.msra.mxu0 %v1899_v5  ;;  %v1855_v3 = vpop.permute.xlu0 %1854  ;;  %2065 = vmatprep.mubr.bf16.mxu1 %v8970_v22 }
 0x199   : > { %v1873_v7 = vsel %vm8962_vm7, %v1853_v4, %v1855_v3  ;;  %v1857_v6 = vpop.permute.xlu1 %1856 }
 0x19a   : > { %v1874_v12 = vsel %vm8962_vm7, %v1855_v3, %v1857_v6  ;;  %v1905_v9 = vsel %vm8969_vm0, %v1873_v7, 0 }
 0x19b   : > { %5873 = vmatprep.subr.msk.bf16.mxu1 %vm8969_vm0, %v1874_v12 }
 0x19c   : > { %2046 = vmatpush1.bf16.msra.mxu1 %v1905_v9  ;;  %v1833_v13 = vpop.permute.xlu0 %1832 }
 0x19d   : > { %v1835_v10 = vpop.permute.xlu1 %1834  ;;  %v1863_v11 = vsel %vm8962_vm7, %v1831_v58, %v1833_v13 }
 0x19e   : > { %v1864_v18 = vsel %vm8962_vm7, %v1833_v13, %v1835_v10 }
 0x19f   : > { %2006 = vmatprep.subr.bf16.mxu0 %v1864_v18 }
 0x1a0   : > { %2007 = vmatpush1.bf16.msra.mxu0 %v1863_v11  ;;  %v1837_v14 = vpop.permute.xlu0 %1836 }
 0x1a1   : > { %v1839_v15 = vpop.permute.xlu1 %1838  ;;  %v1865_v19 = vsel %vm8962_vm7, %v1835_v10, %v1837_v14 }
 0x1a2   : > { %v1866_v23 = vsel %vm8962_vm7, %v1837_v14, %v1839_v15 }
 0x1a3   : > { %5872 = vmatmul.mubr.msk.bf16.vlgmr.msra.gmra.mxu0 %vm8965_vm2, %v1821_v0  ;;  %2047 = vmatprep.subr.bf16.mxu1 %v1866_v23  ;;  %v463_v16 = vpop.f32.mrf.mxu0 }
 0x1a4   : > { %2048 = vmatpush1.bf16.msra.mxu1 %v1865_v19  ;;  %v2102_v17 = vpop.permute.xlu0 %2101  ;;  %2203 = vmatprep.mubr.bf16.mxu0 %v8970_v22  ;;  %v504_v20 = vpop.f32.mrf.mxu1 }
 0x1a5   : > { %v2104_v24 = vpop.permute.xlu1 %2103  ;;  %v465_v27 = vpop.f32.mrf.mxu0 }
 0x1a6   : > { %v7102_v21 = vpop.f32.mrf.mxu1  ;;  %v2128_v28 = vsel %vm8967_vm8, %v2102_v17, %v2104_v24 }
 0x1a7   : > { %5874 = vmatmul.mubr.msk.bf16.vlgmr.msra.gmra.mxu1 %vm8965_vm2, %v1821_v0  ;;  %v467_v25 = vpop.f32.mrf.mxu0  ;;  %v2148_v35 = vsel %vm8969_vm0, %v2128_v28, 0 }
 0x1a8   : > { %v2106_v31 = vpop.permute.xlu0 %2105  ;;  %2244 = vmatprep.mubr.bf16.mxu1 %v8970_v22  ;;  %v508_v26 = vpop.f32.mrf.mxu1 }
 0x1a9   : > { %v2108_v32 = vpop.permute.xlu1 %2107  ;;  %v2129_v29 = vsel %vm8967_vm8, %v2104_v24, %v2106_v31  ;;  %v468_v30 = vpop.f32.mrf.mxu0 }
 0x1aa   : > { %5875 = vmatprep.subr.msk.bf16.mxu0 %vm8969_vm0, %v2129_v29  ;;  %v509_v36 = vpop.f32.mrf.mxu1  ;;  %v2130_v33 = vsel %vm8967_vm8, %v2106_v31, %v2108_v32 }
 0x1ab   : > { %2184 = vmatpush1.bf16.msra.mxu0 %v2148_v35  ;;  %v2154_v41 = vsel %vm8969_vm0, %v2130_v33, 0 }
 0x1ac   : > { %v2110_v34 = vpop.permute.xlu0 %2109 }
 0x1ad   : > { %v2086_v37 = vpop.permute.xlu1 %2085  ;;  %v2131_v38 = vsel %vm8967_vm8, %v2108_v32, %v2110_v34 }
 0x1ae   : > { %5877 = vmatprep.subr.msk.bf16.mxu1 %vm8969_vm0, %v2131_v38 }
 0x1af   : > { %2225 = vmatpush1.bf16.msra.mxu1 %v2154_v41  ;;  %v545_v42 = vpop.f32.mrf.mxu0 }
 0x1b0   : > { %v2088_v39 = vpop.permute.xlu0 %2087 }
 0x1b1   : > { %v2090_v43 = vpop.permute.xlu1 %2089  ;;  %v2121_v40 = vsel %vm8967_vm8, %v2086_v37, %v2088_v39  ;;  %v547_v44 = vpop.f32.mrf.mxu0 }
 0x1b2   : > { %2185 = vmatprep.subr.bf16.mxu0 %v2121_v40  ;;  %v2122_v52 = vsel %vm8967_vm8, %v2088_v39, %v2090_v43 }
 0x1b3   : > { %v586_v45 = vpop.f32.mrf.mxu1  ;;  %v549_v46 = vpop.f32.mrf.mxu0 }
 0x1b4   : > { %v2092_v47 = vpop.permute.xlu0 %2091 }
 0x1b5   : > { %v2084_v48 = vpop.permute.xlu1 %2083  ;;  %v2123_v49 = vsel %vm8967_vm8, %v2090_v43, %v2092_v47  ;;  %v588_v50 = vpop.f32.mrf.mxu1 }
 0x1b6   : > { %v2120_v51 = vsel %vm8967_vm8, %v2084_v48, %v2086_v37  ;;  %2226 = vmatprep.subr.bf16.mxu1 %v2123_v49  ;;  %v550_v53 = vpop.f32.mrf.mxu0 }
 0x1b7   : > { %2186 = vmatpush1.bf16.msra.mxu0 %v2120_v51  ;;  %2227 = vmatpush1.bf16.msra.mxu1 %v2122_v52  ;;  %v590_v55 = vpop.f32.mrf.mxu1 }
 0x1b8   : > { %v2112_v56 = vpop.permute.xlu0 %2111  ;;  %v647_v57 = vpop.f32.mrf.mxu0 }
 0x1b9   : > { %v2132_v58 = vsel %vm8967_vm8, %v2110_v34, %v2112_v56  ;;  %v2114_v59 = vpop.permute.xlu1 %2113  ;;  %v591_v60 = vpop.f32.mrf.mxu1  ;;  %v648_v61 = vadd.f32 %v647_v57, %v463_v16 }
 0x1ba   : > { %5876 = vmatmul.mubr.msk.bf16.vlgmr.msra.gmra.mxu0 %vm8965_vm2, %v7118_v54  ;;  %5878 = vmatmul.mubr.msk.bf16.vlgmr.msra.gmra.mxu1 %vm8965_vm2, %v7118_v54  ;;  %v2133_v62 = vsel %vm8967_vm8, %v2112_v56, %v2114_v59  ;;  %v2160_v63 = vsel %vm8969_vm0, %v2132_v58, 0  ;;  %v649_v0 = vpop.f32.mrf.mxu0 }
 0x1bb   : > { %5879 = vmatprep.subr.msk.bf16.mxu0 %vm8969_vm0, %v2133_v62  ;;  %2285 = vmatprep.mubr.bf16.mxu0 %v8970_v22  ;;  %v688_v1 = vpop.f32.mrf.mxu1  ;;  %v650_v2 = vadd.f32 %v649_v0, %v465_v27 }
 0x1bc   : > { %2266 = vmatpush1.bf16.msra.mxu0 %v2160_v63  ;;  %v2116_v4 = vpop.permute.xlu0 %2115  ;;  %2326 = vmatprep.mubr.bf16.mxu1 %v8970_v22  ;;  %v689_v8 = vadd.f32 %v688_v1, %v504_v20  ;;  %v651_v5 = vpop.f32.mrf.mxu0 }
 0x1bd   : > { %v2134_v3 = vsel %vm8967_vm8, %v2114_v59, %v2116_v4  ;;  %v2118_v7 = vpop.permute.xlu1 %2117  ;;  %v690_v6 = vpop.f32.mrf.mxu1 }
 0x1be   : > { %v2135_v12 = vsel %vm8967_vm8, %v2116_v4, %v2118_v7  ;;  %v2166_v9 = vsel %vm8969_vm0, %v2134_v3, 0  ;;  %v691_v13 = vadd.f32 %v690_v6, %v7102_v21  ;;  %v652_v10 = vpop.f32.mrf.mxu0 }
 0x1bf   : > { %5881 = vmatprep.subr.msk.bf16.mxu1 %vm8969_vm0, %v2135_v12  ;;  %v692_v11 = vpop.f32.mrf.mxu1 }
 0x1c0   : > { %2307 = vmatpush1.bf16.msra.mxu1 %v2166_v9  ;;  %v2094_v18 = vpop.permute.xlu0 %2093  ;;  %v729_v14 = vpop.f32.mrf.mxu0 }
 0x1c1   : > { %v2096_v15 = vpop.permute.xlu1 %2095  ;;  %v2124_v19 = vsel %vm8967_vm8, %v2092_v47, %v2094_v18  ;;  %v693_v23 = vpop.f32.mrf.mxu1  ;;  %v730_v16 = vadd.f32 %v729_v14, %v545_v42 }
 0x1c2   : > { %v2125_v17 = vsel %vm8967_vm8, %v2094_v18, %v2096_v15  ;;  %v731_v20 = vpop.f32.mrf.mxu0  ;;  %v2343_v18 = vld [vmem:[#allocation5 + $0x20] sm:$0xf] }
 0x1c3   : > { %2267 = vmatprep.subr.bf16.mxu0 %v2125_v17  ;;  %v770_v24 = vpop.f32.mrf.mxu1  ;;  %v732_v27 = vadd.f32 %v731_v20, %v547_v44 }
 0x1c4   : > { %2268 = vmatpush1.bf16.msra.mxu0 %v2124_v19  ;;  %v2098_v21 = vpop.permute.xlu0 %2097  ;;  %v771_v28 = vadd.f32 %v770_v24, %v586_v45  ;;  %v733_v25 = vpop.f32.mrf.mxu0 }
 0x1c5   : > { %v2100_v31 = vpop.permute.xlu1 %2099  ;;  %v2126_v26 = vsel %vm8967_vm8, %v2096_v15, %v2098_v21  ;;  %v772_v32 = vpop.f32.mrf.mxu1 }
 0x1c6   : > { %v2127_v29 = vsel %vm8967_vm8, %v2098_v21, %v2100_v31  ;;  %v773_v30 = vadd.f32 %v772_v32, %v588_v50  ;;  %v734_v35 = vpop.f32.mrf.mxu0 }
 0x1c7   : > { %5880 = vmatmul.mubr.msk.bf16.vlgmr.msra.gmra.mxu0 %vm8965_vm2, %v7118_v54  ;;  %2308 = vmatprep.subr.bf16.mxu1 %v2127_v29  ;;  %v774_v36 = vpop.f32.mrf.mxu1 }
 0x1c8   : > { %2309 = vmatpush1.bf16.msra.mxu1 %v2126_v26  ;;  %v2363_v33 = vpop.permute.xlu0 %2362  ;;  %2464 = vmatprep.mubr.bf16.mxu0 %v8970_v22  ;;  %v900_v34 = vpop.f32.mrf.mxu0 }
 0x1c9   : > { %v2365_v37 = vpop.permute.xlu1 %2364  ;;  %v775_v38 = vpop.f32.mrf.mxu1  ;;  %v7142_v41 = vadd.f32 %v900_v34, %v648_v61 }
 0x1ca   : > { %v902_v42 = vpop.f32.mrf.mxu0  ;;  %v2389_v39 = vsel %vm8966_vm9, %v2363_v33, %v2365_v37 }
 0x1cb   : > { %5882 = vmatmul.mubr.msk.bf16.vlgmr.msra.gmra.mxu1 %vm8965_vm2, %v7118_v54  ;;  %v941_v43 = vpop.f32.mrf.mxu1  ;;  %v7147_v40 = vadd.f32 %v902_v42, %v650_v2  ;;  %v2409_v50 = vsel %vm8969_vm0, %v2389_v39, 0 }
 0x1cc   : > { %v2367_v44 = vpop.permute.xlu0 %2366  ;;  %2505 = vmatprep.mubr.bf16.mxu1 %v8970_v22  ;;  %v7150_v45 = vadd.f32 %v941_v43, %v689_v8  ;;  %v904_v46 = vpop.f32.mrf.mxu0 }
 0x1cd   : > { %v2369_v47 = vpop.permute.xlu1 %2368  ;;  %v2390_v48 = vsel %vm8966_vm9, %v2365_v37, %v2367_v44  ;;  %v943_v49 = vpop.f32.mrf.mxu1 }
 0x1ce   : > { %5883 = vmatprep.subr.msk.bf16.mxu0 %vm8969_vm0, %v2390_v48  ;;  %v7155_v51 = vadd.f32 %v943_v49, %v691_v13  ;;  %v905_v52 = vpop.f32.mrf.mxu0  ;;  %v2391_v53 = vsel %vm8966_vm9, %v2367_v44, %v2369_v47 }
 0x1cf   : > { %2445 = vmatpush1.bf16.msra.mxu0 %v2409_v50  ;;  %v945_v54 = vpop.f32.mrf.mxu1  ;;  %v2415_v59 = vsel %vm8969_vm0, %v2391_v53, 0 }
 0x1d0   : > { %v2371_v55 = vpop.permute.xlu0 %2370 }
 0x1d1   : > { %v2347_v56 = vpop.permute.xlu1 %2346  ;;  %v2392_v57 = vsel %vm8966_vm9, %v2369_v47, %v2371_v55  ;;  %v946_v58 = vpop.f32.mrf.mxu1 }
 0x1d2   : > { %5885 = vmatprep.subr.msk.bf16.mxu1 %vm8969_vm0, %v2392_v57 }
 0x1d3   : > { %2486 = vmatpush1.bf16.msra.mxu1 %v2415_v59 }
 0x1d4   : > { %v2349_v60 = vpop.permute.xlu0 %2348  ;;  %v982_v61 = vpop.f32.mrf.mxu0 }
 0x1d5   : > { %v2351_v62 = vpop.permute.xlu1 %2350  ;;  %v2382_v63 = vsel %vm8966_vm9, %v2347_v56, %v2349_v60  ;;  %v7162_v0 = vadd.f32 %v982_v61, %v730_v16 }
 0x1d6   : > { %2446 = vmatprep.subr.bf16.mxu0 %v2382_v63  ;;  %v1023_v1 = vpop.f32.mrf.mxu1  ;;  %v984_v2 = vpop.f32.mrf.mxu0  ;;  %v2383_v10 = vsel %vm8966_vm9, %v2349_v60, %v2351_v62 }
 0x1d7   : > { %v7164_v4 = vadd.f32 %v1023_v1, %v771_v28  ;;  %v7166_v8 = vadd.f32 %v984_v2, %v732_v27 }
 0x1d8   : > { %v2353_v5 = vpop.permute.xlu0 %2352  ;;  %v1025_v3 = vpop.f32.mrf.mxu1 }
 0x1d9   : > { %v2345_v7 = vpop.permute.xlu1 %2344  ;;  %v2384_v6 = vsel %vm8966_vm9, %v2351_v62, %v2353_v5  ;;  %v7169_v12 = vadd.f32 %v1025_v3, %v773_v30  ;;  %v986_v9 = vpop.f32.mrf.mxu0 }
 0x1da   : > { %v2381_v13 = vsel %vm8966_vm9, %v2345_v7, %v2347_v56  ;;  %2487 = vmatprep.subr.bf16.mxu1 %v2384_v6  ;;  %v1027_v11 = vpop.f32.mrf.mxu1 }
 0x1db   : > { %2447 = vmatpush1.bf16.msra.mxu0 %v2381_v13  ;;  %2488 = vmatpush1.bf16.msra.mxu1 %v2383_v10  ;;  %v987_v14 = vpop.f32.mrf.mxu0 }
 0x1dc   : > { %v2373_v15 = vpop.permute.xlu0 %2372  ;;  %v1028_v19 = vpop.f32.mrf.mxu1 }
 0x1dd   : > { %v2393_v23 = vsel %vm8966_vm9, %v2371_v55, %v2373_v15  ;;  %v2375_v16 = vpop.permute.xlu1 %2374 }
 0x1de   : > { %5884 = vmatmul.mubr.msk.bf16.vlgmr.msra.gmra.mxu0 %vm8965_vm2, %v2343_v18  ;;  %5886 = vmatmul.mubr.msk.bf16.vlgmr.msra.gmra.mxu1 %vm8965_vm2, %v2343_v18  ;;  %v2394_v17 = vsel %vm8966_vm9, %v2373_v15, %v2375_v16  ;;  %v2421_v20 = vsel %vm8969_vm0, %v2393_v23, 0 }
 0x1df   : > { %5887 = vmatprep.subr.msk.bf16.mxu0 %vm8969_vm0, %v2394_v17  ;;  %2546 = vmatprep.mubr.bf16.mxu0 %v8970_v22 }
 0x1e0   : > { %2527 = vmatpush1.bf16.msra.mxu0 %v2421_v20  ;;  %v2377_v24 = vpop.permute.xlu0 %2376  ;;  %2587 = vmatprep.mubr.bf16.mxu1 %v8970_v22 }
 0x1e1   : > { %v2395_v27 = vsel %vm8966_vm9, %v2375_v16, %v2377_v24  ;;  %v2379_v21 = vpop.permute.xlu1 %2378 }
 0x1e2   : > { %v2396_v28 = vsel %vm8966_vm9, %v2377_v24, %v2379_v21  ;;  %v2427_v25 = vsel %vm8969_vm0, %v2395_v27, 0 }
 0x1e3   : > { %5889 = vmatprep.subr.msk.bf16.mxu1 %vm8969_vm0, %v2396_v28 }
 0x1e4   : > { %2568 = vmatpush1.bf16.msra.mxu1 %v2427_v25  ;;  %v2355_v31 = vpop.permute.xlu0 %2354 }
 0x1e5   : > { %v2357_v26 = vpop.permute.xlu1 %2356  ;;  %v2385_v32 = vsel %vm8966_vm9, %v2353_v5, %v2355_v31 }
 0x1e6   : > { %v2386_v29 = vsel %vm8966_vm9, %v2355_v31, %v2357_v26 }
 0x1e7   : > { %2528 = vmatprep.subr.bf16.mxu0 %v2386_v29 }
 0x1e8   : > { %2529 = vmatpush1.bf16.msra.mxu0 %v2385_v32  ;;  %v2359_v30 = vpop.permute.xlu0 %2358 }
 0x1e9   : > { %v2361_v35 = vpop.permute.xlu1 %2360  ;;  %v2387_v36 = vsel %vm8966_vm9, %v2357_v26, %v2359_v30  ;;  %v1161_v33 = vpop.f32.mrf.mxu0 }
 0x1ea   : > { %v2388_v34 = vsel %vm8966_vm9, %v2359_v30, %v2361_v35  ;;  %v1291_v37 = vadd.f32 %v1161_v33, %v7142_v41 }
 0x1eb   : > { %5888 = vmatmul.mubr.msk.bf16.vlgmr.msra.gmra.mxu0 %vm8965_vm2, %v2343_v18  ;;  %2569 = vmatprep.subr.bf16.mxu1 %v2388_v34  ;;  %v1163_v38 = vpop.f32.mrf.mxu0 }
 0x1ec   : > { %2570 = vmatpush1.bf16.msra.mxu1 %v2387_v36  ;;  %v1202_v42 = vpop.f32.mrf.mxu1  ;;  %v1292_v39 = vadd.f32 %v1163_v38, %v7147_v40  ;;  %3508 = vmatprep.mubr.bf16.mxu0 %v8970_v22 }
 0x1ed   : > { %v1293_v43 = vadd.f32 %v1202_v42, %v7150_v45  ;;  %v1165_v44 = vpop.f32.mrf.mxu0 }
 0x1ee   : > { %v1204_v46 = vpop.f32.mrf.mxu1 }
 0x1ef   : > { %5890 = vmatmul.mubr.msk.bf16.vlgmr.msra.gmra.mxu1 %vm8965_vm2, %v2343_v18  ;;  %v1294_v47 = vadd.f32 %v1204_v46, %v7155_v51  ;;  %v1166_v48 = vpop.f32.mrf.mxu0 }
 0x1f0   : > { %v1206_v41 = vpop.f32.mrf.mxu1  ;;  %3549 = vmatprep.mubr.bf16.mxu1 %v8970_v22 }
 0x1f2   : > { %v1207_v49 = vpop.f32.mrf.mxu1 }
 0x1f8   : > { %v1243_v50 = vpop.f32.mrf.mxu0 }
 0x1f9   : > { %v1295_v52 = vadd.f32 %v1243_v50, %v7162_v0 }
 0x1fa   : > { %v1284_v53 = vpop.f32.mrf.mxu1  ;;  %v1245_v40 = vpop.f32.mrf.mxu0 }
 0x1fb   : > { %v1297_v54 = vadd.f32 %v1284_v53, %v7164_v4  ;;  %v1296_v45 = vadd.f32 %v1245_v40, %v7166_v8 }
 0x1fc   : > { %v1286_v55 = vpop.f32.mrf.mxu1  ;;  %v1247_v56 = vpop.f32.mrf.mxu0 }
 0x1fd   : > { %v1298_v57 = vadd.f32 %v1286_v55, %v7169_v12 }
 0x1fe   : > { %v1288_v58 = vpop.f32.mrf.mxu1  ;;  %v1248_v51 = vpop.f32.mrf.mxu0 }
 0x200   : > { %v1289_v59 = vpop.f32.mrf.mxu1 }
 0x20e   : > { %v1422_v60 = vpop.f32.mrf.mxu0 }
 0x20f   : > { %v1552_v61 = vadd.f32 %v1422_v60, %v1291_v37 }
 0x210   : > { %v1463_v62 = vpop.f32.mrf.mxu1  ;;  %v1424_v63 = vpop.f32.mrf.mxu0 }
 0x211   : > { %v1554_v1 = vadd.f32 %v1463_v62, %v1293_v43  ;;  %v1553_v2 = vadd.f32 %v1424_v63, %v1292_v39 }
 0x212   : > { %v1465_v0 = vpop.f32.mrf.mxu1  ;;  %v1426_v5 = vpop.f32.mrf.mxu0 }
 0x213   : > { %v1555_v3 = vadd.f32 %v1465_v0, %v1294_v47 }
 0x214   : > { %v1467_v7 = vpop.f32.mrf.mxu1  ;;  %v1427_v4 = vpop.f32.mrf.mxu0 }
 0x216   : > { %v1468_v6 = vpop.f32.mrf.mxu1 }
 0x21c   : > { %v1504_v8 = vpop.f32.mrf.mxu0 }
 0x21d   : > { %v1556_v9 = vadd.f32 %v1504_v8, %v1295_v52 }
 0x21e   : > { %v1506_v13 = vpop.f32.mrf.mxu0 }
 0x21f   : > { %v1545_v10 = vpop.f32.mrf.mxu1  ;;  %v1557_v12 = vadd.f32 %v1506_v13, %v1296_v45 }
 0x220   : > { %v1558_v11 = vadd.f32 %v1545_v10, %v1297_v54  ;;  %v1508_v18 = vpop.f32.mrf.mxu0 }
 0x221   : > { %v1547_v14 = vpop.f32.mrf.mxu1 }
 0x222   : > { %v1559_v15 = vadd.f32 %v1547_v14, %v1298_v57  ;;  %v1509_v19 = vpop.f32.mrf.mxu0 }
 0x223   : > { %v1549_v23 = vpop.f32.mrf.mxu1 }
 0x225   : > { %v1550_v16 = vpop.f32.mrf.mxu1 }
 0x232   : > { %v1683_v17 = vpop.f32.mrf.mxu0 }
 0x233   : > { %v1813_v20 = vadd.f32 %v1683_v17, %v1552_v61  ;;  %v1724_v24 = vpop.f32.mrf.mxu1 }
 0x234   : > { %v1815_v27 = vadd.f32 %v1724_v24, %v1554_v1  ;;  %v1685_v21 = vpop.f32.mrf.mxu0 }
 0x235   : > { %v1814_v28 = vadd.f32 %v1685_v21, %v1553_v2  ;;  %v1726_v25 = vpop.f32.mrf.mxu1 }
 0x236   : > { %v1816_v31 = vadd.f32 %v1726_v25, %v1555_v3  ;;  %v1687_v26 = vpop.f32.mrf.mxu0 }
 0x237   : > { %v1728_v32 = vpop.f32.mrf.mxu1 }
 0x238   : > { %v1688_v29 = vpop.f32.mrf.mxu0 }
 0x239   : > { %v1729_v30 = vpop.f32.mrf.mxu1 }
 0x23f   : > { %v1765_v35 = vpop.f32.mrf.mxu0 }
 0x240   : > { %v1817_v36 = vadd.f32 %v1765_v35, %v1556_v9 }
 0x241   : > { %v1767_v33 = vpop.f32.mrf.mxu0 }
 0x242   : > { %v1818_v34 = vadd.f32 %v1767_v33, %v1557_v12 }
 0x243   : > { %v1806_v37 = vpop.f32.mrf.mxu1  ;;  %v1769_v38 = vpop.f32.mrf.mxu0 }
 0x244   : > { %v1819_v42 = vadd.f32 %v1806_v37, %v1558_v11 }
 0x245   : > { %v1808_v39 = vpop.f32.mrf.mxu1  ;;  %v1770_v43 = vpop.f32.mrf.mxu0 }
 0x246   : > { %v1820_v44 = vadd.f32 %v1808_v39, %v1559_v15 }
 0x247   : > { %v1810_v46 = vpop.f32.mrf.mxu1 }
 0x249   : > { %v1811_v47 = vpop.f32.mrf.mxu1 }
 0x256   : > { %v1944_v48 = vpop.f32.mrf.mxu0  ;;  %v1985_v41 = vpop.f32.mrf.mxu1 }
 0x257   : > { %v2074_v49 = vadd.f32 %v1944_v48, %v1813_v20  ;;  %v2076_v50 = vadd.f32 %v1985_v41, %v1815_v27  ;;  %v7207_v27 = vpop.permute.xlu0 %2606 }
 0x258   : > { %v1946_v52 = vpop.f32.mrf.mxu0  ;;  %v1987_v53 = vpop.f32.mrf.mxu1  ;;  %9005 = vst [vmem:[#allocation12_spill] sm:$0xff] %v7207_v27 }
 0x259   : > { %v2075_v40 = vadd.f32 %v1946_v52, %v1814_v28  ;;  %v2077_v54 = vadd.f32 %v1987_v53, %v1816_v31 }
 0x25a   : > { %v1948_v45 = vpop.f32.mrf.mxu0  ;;  %v1989_v55 = vpop.f32.mrf.mxu1 }
 0x25c   : > { %v1949_v56 = vpop.f32.mrf.mxu0  ;;  %v1990_v57 = vpop.f32.mrf.mxu1 }
 0x263   : > { %v2026_v58 = vpop.f32.mrf.mxu0 }
 0x264   : > { %v2078_v51 = vadd.f32 %v2026_v58, %v1817_v36 }
 0x265   : > { %v2028_v59 = vpop.f32.mrf.mxu0 }
 0x266   : > { %v7201_v60 = vadd.f32 %v2028_v59, %v1818_v34 }
 0x267   : > { %v2067_v61 = vpop.f32.mrf.mxu1  ;;  %v2030_v62 = vpop.f32.mrf.mxu0 }
 0x268   : > { %v7203_v63 = vadd.f32 %v2067_v61, %v1819_v42 }
 0x269   : > { %v2069_v1 = vpop.f32.mrf.mxu1  ;;  %v2031_v2 = vpop.f32.mrf.mxu0 }
 0x26a   : > { %v7205_v0 = vadd.f32 %v2069_v1, %v1820_v44 }
 0x26b   : > { %v2071_v5 = vpop.f32.mrf.mxu1 }
 0x26d   : > { %v2072_v3 = vpop.f32.mrf.mxu1 }
 0x27a   : > { %v2205_v7 = vpop.f32.mrf.mxu0  ;;  %v2246_v4 = vpop.f32.mrf.mxu1 }
 0x27b   : > { %v2335_v20 = vadd.f32 %v2205_v7, %v2074_v49  ;;  %v2337_v24 = vadd.f32 %v2246_v4, %v2076_v50 }
 0x27c   : > { %v2207_v6 = vpop.f32.mrf.mxu0  ;;  %v2248_v8 = vpop.f32.mrf.mxu1 }
 0x27d   : > { %v2336_v25 = vadd.f32 %v2207_v6, %v2075_v40  ;;  %v2338_v31 = vadd.f32 %v2248_v8, %v2077_v54 }
 0x27e   : > { %v2209_v9 = vpop.f32.mrf.mxu0  ;;  %v2250_v13 = vpop.f32.mrf.mxu1 }
 0x280   : > { %v2210_v10 = vpop.f32.mrf.mxu0  ;;  %v2251_v12 = vpop.f32.mrf.mxu1 }
 0x287   : > { %v2287_v11 = vpop.f32.mrf.mxu0 }
 0x288   : > { %v2339_v45 = vadd.f32 %v2287_v11, %v2078_v51 }
 0x289   : > { %v2289_v18 = vpop.f32.mrf.mxu0 }
 0x28a   : > { %v2340_v56 = vadd.f32 %v2289_v18, %v7201_v60 }
 0x28b   : > { %v2328_v14 = vpop.f32.mrf.mxu1  ;;  %v2291_v15 = vpop.f32.mrf.mxu0 }
 0x28c   : > { %v2341_v59 = vadd.f32 %v2328_v14, %v7203_v63 }
 0x28d   : > { %v2330_v19 = vpop.f32.mrf.mxu1  ;;  %v2292_v23 = vpop.f32.mrf.mxu0 }
 0x28e   : > { %v2342_v7 = vadd.f32 %v2330_v19, %v7205_v0 }
 0x28f   : > { %v2332_v16 = vpop.f32.mrf.mxu1 }
 0x291   : > { %v2333_v17 = vpop.f32.mrf.mxu1 }
 0x29e   : > { %v2466_v21 = vpop.f32.mrf.mxu0  ;;  %v2507_v28 = vpop.f32.mrf.mxu1 }
 0x29f   : > { %v2596_v26 = vadd.f32 %v2466_v21, %v2335_v20  ;;  %v2598_v32 = vadd.f32 %v2507_v28, %v2337_v24  ;;  %v6354_v21 = vmov 0.0  }
 0x2a0   : > { %v2468_v29 = vpop.f32.mrf.mxu0  ;;  %v2509_v30 = vpop.f32.mrf.mxu1 }
 0x2a1   : > { %v2597_v35 = vadd.f32 %v2468_v29, %v2336_v25  ;;  %v2599_v36 = vadd.f32 %v2509_v30, %v2338_v31  ;;  %v2609_v33 = vadd.f32 %v7207_v27, %v2596_v26  ;;  %v2611_v34 = vadd.f32 %v7207_v27, %v2598_v32 }
 0x2a2   : > { %v2470_v37 = vpop.f32.mrf.mxu0  ;;  %v2511_v38 = vpop.f32.mrf.mxu1 }
 0x2a3   : > { %v2610_v42 = vadd.f32 %v7207_v27, %v2597_v35  ;;  %v2612_v39 = vadd.f32 %v7207_v27, %v2599_v36  ;;  %v2625_v43 = vmul.f32 0.01, %v2609_v33  ;;  %vm2617_vm10 = vcmp.ge.f32.partialorder %v2609_v33, 0.0 }
 0x2a4   : > { %v2471_v44 = vpop.f32.mrf.mxu0  ;;  %v2512_v46 = vpop.f32.mrf.mxu1  ;;  %vm2619_vm11 = vcmp.ge.f32.partialorder %v2611_v34, 0.0  ;;  %v2627_v47 = vmul.f32 0.01, %v2611_v34 }
 0x2a5   : > { %vm2618_vm12 = vcmp.ge.f32.partialorder %v2610_v42, 0.0  ;;  %v2626_v48 = vmul.f32 0.01, %v2610_v42  ;;  %vm2620_vm13 = vcmp.ge.f32.partialorder %v2612_v39, 0.0  ;;  %v2628_v41 = vmul.f32 0.01, %v2612_v39 }
 0x2a6   : > { %v2633_v52 = vsel %vm2617_vm10, %v2609_v33, %v2625_v43  ;;  %v2635_v53 = vsel %vm2619_vm11, %v2611_v34, %v2627_v47 }
 0x2a7   : > { %v2634_v49 = vsel %vm2618_vm12, %v2610_v42, %v2626_v48  ;;  %v2636_v50 = vsel %vm2620_vm13, %v2612_v39, %v2628_v41  ;;  %vm2665_vm12 = vcmask 89088  }
 0x2a8   : > { %v6053_v40 = vpack.i.bf16 %v2634_v49, %v2633_v52  ;;  %v6058_v54 = vpack.i.bf16 %v2636_v50, %v2635_v53  ;;  %v2734_v50 = vlaneseq  ;;  %v7262_v52 = vld [vmem:[#allocation7 + $0x2] ss:$4 sm:$0xff] }
 0x2a9   : > { %vm2684_vm13 = vcmp.eq.s32.totalorder %v7262_v52, 0 }
 0x2aa   : > { %6054 = vrot.lane.b32.xlu1 %v6053_v40, %s6353_s14  ;;  %v2735_v53 = vshrl.u32 %v2734_v50, 7 }
 0x2ab   : > { %v2548_v55 = vpop.f32.mrf.mxu0 }
 0x2ac   : > { %v2600_v57 = vadd.f32 %v2548_v55, %v2339_v45  ;;  %v7265_v40 = vsub.s32 0, %v2735_v53  ;;  %v7268_v45 = vsub.s32 1, %v2735_v53 }
 0x2ad   : > { %v2550_v58 = vpop.f32.mrf.mxu0 }
 0x2ae   : > { %v2613_v61 = vadd.f32 %v7207_v27, %v2600_v57  ;;  %v2601_v62 = vadd.f32 %v2550_v58, %v2340_v56  ;;  %6059 = vrot.lane.b32.xlu1 %v6058_v54, %s6353_s14  ;;  %v2732_v54 = vsel %vm2684_vm13, 1, %v8970_v22 }
 0x2af   : > { %v2552_v1 = vpop.f32.mrf.mxu0  ;;  %v2589_v2 = vpop.f32.mrf.mxu1  ;;  %v2737_v56 = vrot.slane %v2732_v54, %v7265_v40 }
 0x2b0   : > { %v2629_v5 = vmul.f32 0.01, %v2613_v61  ;;  %v2614_v51 = vadd.f32 %v7207_v27, %v2601_v62  ;;  %v2602_v3 = vadd.f32 %v2589_v2, %v2341_v59  ;;  %vm2621_vm14 = vcmp.ge.f32.partialorder %v2613_v61, 0.0 }
 0x2b1   : > { %v2553_v4 = vpop.f32.mrf.mxu0  ;;  %v2591_v60 = vpop.f32.mrf.mxu1  ;;  %v2741_v59 = vrot.slane %v2732_v54, %v7268_v45  ;;  %v7276_v2 = vsub.s32 3, %v2735_v53 }
 0x2b2   : > { %vm2622_vm15 = vcmp.ge.f32.partialorder %v2614_v51, 0.0  ;;  %v2630_v6 = vmul.f32 0.01, %v2614_v51  ;;  %v2615_v63 = vadd.f32 %v7207_v27, %v2602_v3  ;;  %v2603_v8 = vadd.f32 %v2591_v60, %v2342_v7 }
 0x2b3   : > { %v2593_v9 = vpop.f32.mrf.mxu1  ;;  %v2637_v13 = vsel %vm2621_vm14, %v2613_v61, %v2629_v5  ;;  %vm2778_vm14 = vcmp.eq.s32.totalorder %v2737_v56, 1  ;;  %v7278_v5 = vsub.s32 2, %v2735_v53 }
 0x2b4   : > { %v2638_v10 = vsel %vm2622_vm15, %v2614_v51, %v2630_v6  ;;  %v2631_v12 = vmul.f32 0.01, %v2615_v63  ;;  %v2616_v11 = vadd.f32 %v7207_v27, %v2603_v8  ;;  %vm2623_vm10 = vcmp.ge.f32.partialorder %v2615_v63, 0.0  ;;  %v7293_v9 = vld [vmem:[#allocation7 + $0x22] ss:$4 sm:$0x7] }
 0x2b5   : > { %v2594_v18 = vpop.f32.mrf.mxu1  ;;  %v6063_v14 = vpack.i.bf16 %v2638_v10, %v2637_v13  ;;  %vm2779_vm15 = vcmp.eq.s32.totalorder %v2741_v59, 1  ;;  %v2745_v4 = vrot.slane %v2732_v54, %v7278_v5  ;;  %v2749_v6 = vrot.slane %v2732_v54, %v7276_v2 }
 0x2b6   : > { %vm2624_vm11 = vcmp.ge.f32.partialorder %v2616_v11, 0.0  ;;  %v2632_v15 = vmul.f32 0.01, %v2616_v11  ;;  %v2639_v0 = vsel %vm2623_vm10, %v2615_v63, %v2631_v12  ;;  %v7289_v63 = vsub.s32 7, %v2735_v53 }
 0x2b7   : > { %6064 = vrot.lane.b32.xlu0 %v6063_v14, %s6353_s14  ;;  %v7291_v8 = vsub.s32 4, %v2735_v53  ;;  %v7295_v10 = vsub.s32 5, %v2735_v53  ;;  %v7298_v12 = vsub.s32 6, %v2735_v53  ;;  %vm2685_vm10 = vcmp.eq.s32.totalorder %v7293_v9, 0 }
 0x2b8   : > { %v2640_v19 = vsel %vm2624_vm11, %v2616_v11, %v2632_v15  ;;  %vm2780_vm11 = vcmp.eq.s32.totalorder %v2745_v4, 1  ;;  %v2765_v18 = vrot.slane %v2732_v54, %v7289_v63 }
 0x2b9   : > { %v6068_v23 = vpack.i.bf16 %v2640_v19, %v2639_v0  ;;  %v2753_v14 = vrot.slane %v2732_v54, %v7291_v8 }
 0x2bb   : > { %6069 = vrot.lane.b32.xlu1 %v6068_v23, %s6353_s14  ;;  %v2757_v23 = vrot.slane %v2732_v54, %v7295_v10  ;;  %vm7316_vm13 = vcmp.eq.s32.totalorder %v2753_v14, 1 }
 0x31c   : > { %v6055_v16 = vpop.permute.xlu1 %6054 }
 0x31d   : > { %v6056_v17 = vunpack.i.l.bf16 %v6055_v16  ;;  %v6057_v20 = vunpack.i.h.bf16 %v6055_v16  ;;  %v2733_v16 = vsel %vm2685_vm10, 1, %v8970_v22 }
 0x31f   : > { %v2682_v24 = vsel %vm2665_vm12, 0.0, %v6056_v17  ;;  %v7227_v26 = vsel %vm2665_vm12, %v6056_v17, %v6057_v20 }
 0x320   : > { %v6073_v28 = vpack.i.bf16 %v2682_v24, %v6354_v21  ;;  %v6060_v25 = vpop.permute.xlu1 %6059  ;;  %v2773_v21 = vrot.slane %v2733_v16, %v7268_v45 }
 0x321   : > { %v6061_v31 = vunpack.i.l.bf16 %v6060_v25  ;;  %v6062_v30 = vunpack.i.h.bf16 %v6060_v25 }
 0x322   : > { %6074 = vrot.lane.b32.xlu0 %v6073_v28, %s6346_s23 }
 0x323   : > { %v7230_v32 = vsel %vm2665_vm12, %v6057_v20, %v6061_v31  ;;  %v7236_v33 = vsel %vm2665_vm12, %v6061_v31, %v6062_v30  ;;  %v2761_v20 = vrot.slane %v2732_v54, %v7298_v12 }
 0x324   : > { %v6078_v29 = vpack.i.bf16 %v7230_v32, %v7227_v26 }
 0x325   : > { %vm2784_vm10 = vcmp.eq.s32.totalorder %v2761_v20, 1 }
 0x326   : > { %6079 = vrot.lane.b32.xlu1 %v6078_v29, %s6346_s23 }
 0x329   : > { %v6065_v35 = vpop.permute.xlu0 %6064 }
 0x32a   : > { %v6066_v36 = vunpack.i.l.bf16 %v6065_v35  ;;  %v6067_v37 = vunpack.i.h.bf16 %v6065_v35 }
 0x32c   : > { %v7239_v34 = vsel %vm2665_vm12, %v6062_v30, %v6066_v36  ;;  %v7245_v44 = vsel %vm2665_vm12, %v6066_v36, %v6067_v37 }
 0x32d   : > { %v6083_v38 = vpack.i.bf16 %v7239_v34, %v7236_v33  ;;  %v6070_v42 = vpop.permute.xlu1 %6069 }
 0x32e   : > { %v6072_v39 = vunpack.i.h.bf16 %v6070_v42  ;;  %v6071_v43 = vunpack.i.l.bf16 %v6070_v42 }
 0x32f   : > { %6084 = vrot.lane.b32.xlu0 %v6083_v38, %s6346_s23 }
 0x330   : > { %v7248_v46 = vsel %vm2665_vm12, %v6072_v39, 0.0  ;;  %v7251_v47 = vsel %vm2665_vm12, %v6071_v43, %v6072_v39  ;;  %v7254_v48 = vsel %vm2665_vm12, %v6067_v37, %v6071_v43  ;;  %vm2781_vm12 = vcmp.eq.s32.totalorder %v2749_v6, 1 }
 0x331   : > { %v6093_v41 = vpack.i.bf16 %v7248_v46, %v7251_v47  ;;  %v6088_v49 = vpack.i.bf16 %v7254_v48, %v7245_v44  ;;  %v2777_v43 = vrot.slane %v2733_v16, %v7278_v5 }
 0x333   : > { %6094 = vrot.lane.b32.xlu0 %v6093_v41, %s6346_s23  ;;  %6089 = vrot.lane.b32.xlu1 %v6088_v49, %s6346_s23 }
 0x394   : > { %v6075_v55 = vpop.permute.xlu0 %6074 }
 0x395   : > { %v6077_v57 = vunpack.i.h.bf16 %v6075_v55  ;;  %v7271_v58 = vunpack.i.l.bf16 %v6075_v55 }
 0x397   : > { %v2710_v62 = vsel %vm8964_vm3, %v7271_v58, %v6077_v57 }
 0x398   : > { %v6080_v61 = vpop.permute.xlu1 %6079  ;;  %v7281_v3 = vsel %vm2778_vm14, %v2710_v62, 0.0  ;;  %vm7323_vm14 = vcmp.eq.s32.totalorder %v2765_v18, 1 }
 0x399   : > { %v6081_v1 = vunpack.i.l.bf16 %v6080_v61  ;;  %v6082_v13 = vunpack.i.h.bf16 %v6080_v61 }
 0x39b   : > { %v2711_v51 = vsel %vm8964_vm3, %v6077_v57, %v6081_v1  ;;  %v2712_v15 = vsel %vm8964_vm3, %v6081_v1, %v6082_v13 }
 0x39c   : > { %v7283_v7 = vsel %vm2779_vm15, %v2711_v51, %v2682_v24  ;;  %v2769_v24 = vrot.slane %v2733_v16, %v7265_v40  ;;  %v7311_v28 = vsel %vm2780_vm11, %v2712_v15, %v7227_v26  ;;  %vm7327_vm15 = vcmp.eq.s32.totalorder %v2757_v23, 1 }
 0x39d   : > { %v6098_v60 = vpack.i.bf16 %v7283_v7, %v7281_v3 }
 0x39e   : > { %vm2786_vm11 = vcmp.eq.s32.totalorder %v2769_v24, 1 }
 0x39f   : > { %6099 = vrot.lane.b32.xlu1 %v6098_v60, %s6355_s26 }
 0x3a1   : > { %v6085_v11 = vpop.permute.xlu0 %6084 }
 0x3a2   : > { %v6087_v0 = vunpack.i.h.bf16 %v6085_v11  ;;  %v6086_v19 = vunpack.i.l.bf16 %v6085_v11 }
 0x3a4   : > { %v2713_v17 = vsel %vm8964_vm3, %v6082_v13, %v6086_v19  ;;  %v2714_v29 = vsel %vm8964_vm3, %v6086_v19, %v6087_v0 }
 0x3a5   : > { %v7314_v25 = vsel %vm2781_vm12, %v2713_v17, %v7230_v32  ;;  %v6095_v30 = vpop.permute.xlu0 %6094  ;;  %v6090_v35 = vpop.permute.xlu1 %6089  ;;  %vm2787_vm12 = vcmp.eq.s32.totalorder %v2773_v21, 1  ;;  %v7347_v56 = vsel %vm7316_vm13, %v2714_v29, %v7236_v33  ;;  %vm2788_vm13 = vcmp.eq.s32.totalorder %v2777_v43, 1 }
 0x3a6   : > { %v6103_v36 = vpack.i.bf16 %v7314_v25, %v7311_v28  ;;  %v6097_v32 = vunpack.i.h.bf16 %v6095_v30  ;;  %v6096_v38 = vunpack.i.l.bf16 %v6095_v30  ;;  %v6092_v42 = vunpack.i.h.bf16 %v6090_v35 }
 0x3a7   : > { %v6091_v39 = vunpack.i.l.bf16 %v6090_v35 }
 0x3a8   : > { %6104 = vrot.lane.b32.xlu0 %v6103_v36, %s6355_s26  ;;  %v2718_v41 = vsel %vm8964_vm3, %v6096_v38, %v6097_v32  ;;  %v2719_v49 = vsel %vm8964_vm3, %v6097_v32, %v7271_v58  ;;  %v2717_v50 = vsel %vm8964_vm3, %v6092_v42, %v6096_v38 }
 0x3a9   : > { %v2715_v53 = vsel %vm8964_vm3, %v6087_v0, %v6091_v39  ;;  %v2716_v54 = vsel %vm8964_vm3, %v6091_v39, %v6092_v42  ;;  %v7342_v55 = vsel %vm7323_vm14, %v2717_v50, %v7254_v48  ;;  %v7362_v62 = vsel %vm2786_vm11, %v2718_v41, %v7251_v47  ;;  %v254_v41 = vld [vmem:[#allocation7 + $0x20] ss:$4 sm:$0x7] }
 0x3aa   : > { %v7352_v57 = vsel %vm7327_vm15, %v2715_v53, %v7239_v34  ;;  %v7355_v59 = vsel %vm2784_vm10, %v2716_v54, %v7245_v44  ;;  %v7365_v33 = vsel %vm2787_vm12, %v2719_v49, %v7248_v46  ;;  %v2731_v34 = vsel %vm8964_vm3, %v7271_v58, 0.0 }
 0x3ab   : > { %v6108_v61 = vpack.i.bf16 %v7352_v57, %v7347_v56  ;;  %v6113_v48 = vpack.i.bf16 %v7342_v55, %v7355_v59  ;;  %v6118_v44 = vpack.i.bf16 %v7365_v33, %v7362_v62  ;;  %v7373_v1 = vsel %vm2788_vm13, %v2731_v34, 0.0 }
 0x3ac   : > { %vm2800_vm14 = vcmp.eq.s32.totalorder %v7262_v52, 9  ;;  %vm2835_vm15 = vcmask 15360   ;;  %vm2801_vm12 = vcmp.eq.s32.totalorder %v7293_v9, 9  ;;  %vm3179_vm3 = vcmp.eq.s32.totalorder %v254_v41, 0 }
 0x3ad   : > { %6109 = vrot.lane.b32.xlu1 %v6108_v61, %s6355_s26  ;;  %6114 = vrot.lane.b32.xlu0 %v6113_v48, %s6355_s26  ;;  %v2858_v46 = vsel %vm2800_vm14, 1, %v8970_v22 }
 0x3ae   : > { %v2863_v47 = vrot.slane %v2858_v46, %v7265_v40  ;;  %v2867_v51 = vrot.slane %v2858_v46, %v7268_v45  ;;  %v2871_v14 = vrot.slane %v2858_v46, %v7278_v5  ;;  %v2875_v15 = vrot.slane %v2858_v46, %v7276_v2 }
 0x3af   : > { %v2887_v23 = vrot.slane %v2858_v46, %v7298_v12  ;;  %v2879_v16 = vrot.slane %v2858_v46, %v7291_v8  ;;  %v2883_v17 = vrot.slane %v2858_v46, %v7295_v10  ;;  %v2891_v21 = vrot.slane %v2858_v46, %v7289_v63 }
 0x3b0   : > { %vm2904_vm10 = vcmp.eq.s32.totalorder %v2863_v47, 1  ;;  %vm2905_vm11 = vcmp.eq.s32.totalorder %v2867_v51, 1  ;;  %vm2906_vm13 = vcmp.eq.s32.totalorder %v2871_v14, 1  ;;  %vm2907_vm14 = vcmp.eq.s32.totalorder %v2875_v15, 1 }
 0x3b1   : > { %6119 = vrot.lane.b32.xlu1 %v6118_v44, %s6355_s26  ;;  %2833 = vrot.lane.b32.xlu0 %v7373_v1, %s6355_s26 }
 0x411   : > { %v6100_v58 = vpop.permute.xlu1 %6099 }
 0x412   : > { %v6102_v4 = vunpack.i.h.bf16 %v6100_v58  ;;  %v6101_v60 = vunpack.i.l.bf16 %v6100_v58 }
 0x414   : > { %v2836_v6 = vsel %vm2835_vm15, %v6101_v60, %v6102_v4  ;;  %v2857_v13 = vsel %vm2835_vm15, 0.0, %v6101_v60 }
 0x415   : > { %v7385_v11 = vsel %vm2904_vm10, %v2857_v13, %v7281_v3  ;;  %v7388_v52 = vsel %vm2905_vm11, %v2836_v6, %v7283_v7  ;;  %v2859_v7 = vsel %vm2801_vm12, 1, %v8970_v22  ;;  %vm7413_vm10 = vcmp.eq.s32.totalorder %v2887_v23, 1 }
 0x416   : > { %v6123_v18 = vpack.i.bf16 %v7388_v52, %v7385_v11  ;;  %v2895_v29 = vrot.slane %v2859_v7, %v7265_v40  ;;  %v2899_v30 = vrot.slane %v2859_v7, %v7268_v45  ;;  %vm2908_vm11 = vcmp.eq.s32.totalorder %v2879_v16, 1 }
 0x417   : > { %vm2909_vm12 = vcmp.eq.s32.totalorder %v2883_v17, 1  ;;  %v2903_v42 = vrot.slane %v2859_v7, %v7278_v5 }
 0x418   : > { %6124 = vrot.lane.b32.xlu1 %v6123_v18, %s6350_s6  ;;  %vm7425_vm6 = vcmp.eq.s32.totalorder %v2899_v30, 1  ;;  %v7472_v18 = vld [vmem:[#allocation7 + $0x1] ss:$4 sm:$0xff] }
 0x41a   : > { %v6105_v0 = vpop.permute.xlu0 %6104 }
 0x41b   : > { %v6107_v19 = vunpack.i.h.bf16 %v6105_v0  ;;  %v6106_v3 = vunpack.i.l.bf16 %v6105_v0 }
 0x41d   : > { %v2837_v20 = vsel %vm2835_vm15, %v6102_v4, %v6106_v3  ;;  %v2838_v24 = vsel %vm2835_vm15, %v6106_v3, %v6107_v19 }
 0x41e   : > { %v7404_v9 = vsel %vm2906_vm13, %v2837_v20, %v7311_v28  ;;  %v7407_v31 = vsel %vm2907_vm14, %v2838_v24, %v7314_v25  ;;  %vm2911_vm13 = vcmp.eq.s32.totalorder %v2891_v21, 1  ;;  %vm7421_vm14 = vcmp.eq.s32.totalorder %v2895_v29, 1 }
 0x41f   : > { %v6110_v35 = vpop.permute.xlu1 %6109  ;;  %v6128_v36 = vpack.i.bf16 %v7407_v31, %v7404_v9  ;;  %v6115_v26 = vpop.permute.xlu0 %6114 }
 0x420   : > { %v6112_v32 = vunpack.i.h.bf16 %v6110_v35  ;;  %v6111_v38 = vunpack.i.l.bf16 %v6110_v35  ;;  %v6117_v28 = vunpack.i.h.bf16 %v6115_v26  ;;  %v6116_v25 = vunpack.i.l.bf16 %v6115_v26 }
 0x421   : > { %6129 = vrot.lane.b32.xlu0 %v6128_v36, %s6350_s6 }
 0x422   : > { %v2839_v39 = vsel %vm2835_vm15, %v6107_v19, %v6111_v38  ;;  %v2840_v43 = vsel %vm2835_vm15, %v6111_v38, %v6112_v32  ;;  %v2842_v50 = vsel %vm2835_vm15, %v6116_v25, %v6117_v28  ;;  %v2841_v53 = vsel %vm2835_vm15, %v6112_v32, %v6116_v25 }
 0x423   : > { %v6120_v54 = vpop.permute.xlu1 %6119  ;;  %v7432_v61 = vsel %vm2908_vm11, %v2839_v39, %v7347_v56  ;;  %v7435_v48 = vsel %vm2909_vm12, %v2840_v43, %v7352_v57  ;;  %v7440_v46 = vsel %vm7413_vm10, %v2841_v53, %v7355_v59  ;;  %v7443_v47 = vsel %vm2911_vm13, %v2842_v50, %v7342_v55  ;;  %v2834_v58 = vpop.permute.xlu0 %2833 }
 0x424   : > { %v6122_v34 = vunpack.i.h.bf16 %v6120_v54  ;;  %v6121_v44 = vunpack.i.l.bf16 %v6120_v54  ;;  %v6138_v51 = vpack.i.bf16 %v7443_v47, %v7440_v46  ;;  %v6133_v56 = vpack.i.bf16 %v7435_v48, %v7432_v61 }
 0x425   : > { %vm2914_vm10 = vcmp.eq.s32.totalorder %v2903_v42, 1 }
 0x426   : > { %v2843_v57 = vsel %vm2835_vm15, %v6117_v28, %v6121_v44  ;;  %v2844_v4 = vsel %vm2835_vm15, %v6121_v44, %v6122_v34  ;;  %6139 = vrot.lane.b32.xlu0 %v6138_v51, %s6350_s6  ;;  %6134 = vrot.lane.b32.xlu1 %v6133_v56, %s6350_s6  ;;  %v2845_v59 = vsel %vm2835_vm15, %v6122_v34, %v2834_v58  ;;  %vm2926_vm15 = vcmp.eq.s32.totalorder %v7472_v18, 0 }
 0x427   : > { %v7457_v55 = vsel %vm7421_vm14, %v2843_v57, %v7362_v62  ;;  %v7462_v60 = vsel %vm7425_vm6, %v2844_v4, %v7365_v33  ;;  %v7467_v13 = vsel %vm2914_vm10, %v2845_v59, %v7373_v1  ;;  %v2984_v62 = vsel %vm2926_vm15, 1, %v8970_v22  ;;  %v7478_v1 = vld [vmem:[#allocation7 + $0x21] ss:$4 sm:$0x7] }
 0x428   : > { %v6143_v6 = vpack.i.bf16 %v7462_v60, %v7457_v55  ;;  %v2989_v33 = vrot.slane %v2984_v62, %v7265_v40  ;;  %v2993_v19 = vrot.slane %v2984_v62, %v7268_v45  ;;  %vm2927_vm11 = vcmp.eq.s32.totalorder %v7478_v1, 0 }
 0x429   : > { %v2997_v16 = vrot.slane %v2984_v62, %v7278_v5  ;;  %v3001_v20 = vrot.slane %v2984_v62, %v7276_v2  ;;  %v3005_v24 = vrot.slane %v2984_v62, %v7291_v8  ;;  %v3009_v21 = vrot.slane %v2984_v62, %v7295_v10 }
 0x42a   : > { %2959 = vrot.lane.b32.xlu0 %v7467_v13, %s6350_s6  ;;  %6144 = vrot.lane.b32.xlu1 %v6143_v6, %s6350_s6  ;;  %vm3030_vm6 = vcmp.eq.s32.totalorder %v2989_v33, 1  ;;  %vm3031_vm12 = vcmp.eq.s32.totalorder %v2993_v19, 1  ;;  %v3013_v30 = vrot.slane %v2984_v62, %v7298_v12  ;;  %v2985_v35 = vsel %vm2927_vm11, 1, %v8970_v22 }
 0x42b   : > { %v3017_v26 = vrot.slane %v2984_v62, %v7289_v63  ;;  %v3021_v32 = vrot.slane %v2985_v35, %v7265_v40  ;;  %vm7499_vm13 = vcmp.eq.s32.totalorder %v2997_v16, 1  ;;  %v3025_v25 = vrot.slane %v2985_v35, %v7268_v45 }
 0x42c   : > { %vm7505_vm14 = vcmp.eq.s32.totalorder %v3001_v20, 1  ;;  %vm7509_vm10 = vcmp.eq.s32.totalorder %v3005_v24, 1  ;;  %vm7513_vm15 = vcmp.eq.s32.totalorder %v3009_v21, 1 }
 0x42d   : > { %vm7522_vm11 = vcmp.eq.s32.totalorder %v3017_v26, 1  ;;  %vm7533_vm5 = vcmp.eq.s32.totalorder %v3025_v25, 1 }
 0x48a   : > { %v6125_v14 = vpop.permute.xlu1 %6124 }
 0x48b   : > { %v6127_v15 = vunpack.i.h.bf16 %v6125_v14  ;;  %v6126_v0 = vunpack.i.l.bf16 %v6125_v14 }
 0x48d   : > { %v2962_v23 = vsel %vm8962_vm7, %v6126_v0, %v6127_v15 }
 0x48e   : > { %v7490_v36 = vsel %vm3030_vm6, %v2962_v23, %v7385_v11  ;;  %vm7518_vm6 = vcmp.eq.s32.totalorder %v3013_v30, 1 }
 0x493   : > { %v6130_v3 = vpop.permute.xlu0 %6129 }
 0x494   : > { %v6131_v7 = vunpack.i.l.bf16 %v6130_v3  ;;  %v6132_v17 = vunpack.i.h.bf16 %v6130_v3 }
 0x496   : > { %v2963_v29 = vsel %vm8962_vm7, %v6127_v15, %v6131_v7  ;;  %v2964_v42 = vsel %vm8962_vm7, %v6131_v7, %v6132_v17 }
 0x497   : > { %v7493_v37 = vsel %vm3031_vm12, %v2963_v29, %v7388_v52  ;;  %vm7526_vm12 = vcmp.eq.s32.totalorder %v3021_v32, 1  ;;  %v7540_v6 = vsel %vm7499_vm13, %v2964_v42, %v7404_v9 }
 0x498   : > { %v6148_v38 = vpack.i.bf16 %v7493_v37, %v7490_v36  ;;  %v6140_v11 = vpop.permute.xlu0 %6139  ;;  %v6135_v39 = vpop.permute.xlu1 %6134 }
 0x499   : > { %v6142_v49 = vunpack.i.h.bf16 %v6140_v11  ;;  %v6141_v50 = vunpack.i.l.bf16 %v6140_v11  ;;  %v6137_v53 = vunpack.i.h.bf16 %v6135_v39  ;;  %v6136_v54 = vunpack.i.l.bf16 %v6135_v39 }
 0x49a   : > { %6149 = vrot.lane.b32.xlu1 %v6148_v38, %s6356_s27 }
 0x49b   : > { %v2967_v56 = vsel %vm8962_vm7, %v6137_v53, %v6141_v50  ;;  %v2965_v58 = vsel %vm8962_vm7, %v6132_v17, %v6136_v54  ;;  %v2966_v57 = vsel %vm8962_vm7, %v6136_v54, %v6137_v53  ;;  %v2968_v15 = vsel %vm8962_vm7, %v6141_v50, %v6142_v49 }
 0x49c   : > { %v6145_v59 = vpop.permute.xlu1 %6144  ;;  %v7545_v62 = vsel %vm7505_vm14, %v2965_v58, %v7407_v31  ;;  %v7550_v14 = vsel %vm7509_vm10, %v2966_v57, %v7432_v61  ;;  %v7555_v33 = vsel %vm7513_vm15, %v2967_v56, %v7435_v48  ;;  %v2960_v3 = vpop.permute.xlu0 %2959  ;;  %v3029_v48 = vrot.slane %v2985_v35, %v7278_v5 }
 0x49d   : > { %v6147_v0 = vunpack.i.h.bf16 %v6145_v59  ;;  %v6146_v9 = vunpack.i.l.bf16 %v6145_v59  ;;  %v6153_v19 = vpack.i.bf16 %v7545_v62, %v7540_v6  ;;  %v6158_v31 = vpack.i.bf16 %v7555_v33, %v7550_v14 }
 0x49e   : > { %v7571_v16 = vsel %vm7518_vm6, %v2968_v15, %v7440_v46  ;;  %v2983_v29 = vsel %vm8962_vm7, %v2960_v3, 0.0  ;;  %vm3040_vm13 = vcmp.eq.s32.totalorder %v3029_v48, 1  ;;  %v9060_v48 = vmov 0 }
 0x49f   : > { %v2971_v23 = vsel %vm8962_vm7, %v6147_v0, %v2960_v3  ;;  %v2969_v61 = vsel %vm8962_vm7, %v6142_v49, %v6146_v9  ;;  %v2970_v7 = vsel %vm8962_vm7, %v6146_v9, %v6147_v0  ;;  %6154 = vrot.lane.b32.xlu0 %v6153_v19, %s6356_s27  ;;  %6159 = vrot.lane.b32.xlu1 %v6158_v31, %s6356_s27  ;;  %v9056_v9 = vmov 0 }
 0x4a0   : > { %v7576_v17 = vsel %vm7522_vm11, %v2969_v61, %v7443_v47  ;;  %v7581_v20 = vsel %vm7526_vm12, %v2970_v7, %v7457_v55  ;;  %v7586_v24 = vsel %vm7533_vm5, %v2971_v23, %v7462_v60  ;;  %v7596_v47 = vsel %vm3040_vm13, %v2983_v29, %v7467_v13  ;;  %v252_v55 = vld [vmem:[#allocation7] ss:$4 sm:$0xff] }
 0x4a1   : > { %v6163_v21 = vpack.i.bf16 %v7576_v17, %v7571_v16  ;;  %v6168_v46 = vpack.i.bf16 %v7586_v24, %v7581_v20  ;;  %vm3052_vm5 = vcmp.eq.s32.totalorder %v7472_v18, 9  ;;  %vm3178_vm14 = vcmp.eq.s32.totalorder %v252_v55, 0 }
 0x4a2   : > { %v3110_v60 = vsel %vm3052_vm5, 1, %v8970_v22  ;;  %vm3248_vm10 = vcmp.eq.s32.totalorder %v252_v55, 9  ;;  %v7603_v30 = vsel %vm3178_vm14, 1, %v8970_v22  ;;  %vm3053_vm11 = vcmp.eq.s32.totalorder %v7478_v1, 9 }
 0x4a3   : > { %6164 = vrot.lane.b32.xlu0 %v6163_v21, %s6356_s27  ;;  %6169 = vrot.lane.b32.xlu1 %v6168_v46, %s6356_s27  ;;  %v3115_v35 = vrot.slane %v3110_v60, %v7265_v40  ;;  %v7607_v26 = vsel %vm3248_vm10, 1, %v8970_v22  ;;  %v3119_v13 = vrot.slane %v3110_v60, %v7268_v45  ;;  %v3123_v32 = vrot.slane %v3110_v60, %v7278_v5 }
 0x4a4   : > { %v3127_v38 = vrot.slane %v3110_v60, %v7276_v2  ;;  %v3185_v18 = vrot.slane %v7603_v30, %v7265_v40  ;;  %v3189_v28 = vrot.slane %v7603_v30, %v7268_v45  ;;  %v3131_v25 = vrot.slane %v3110_v60, %v7291_v8 }
 0x4a5   : > { %v3135_v42 = vrot.slane %v3110_v60, %v7295_v10  ;;  %v3255_v11 = vrot.slane %v7607_v26, %v7265_v40  ;;  %v3259_v39 = vrot.slane %v7607_v26, %v7268_v45  ;;  %v3193_v52 = vrot.slane %v7603_v30, %v7278_v5 }
 0x4a6   : > { %v3197_v43 = vrot.slane %v7603_v30, %v7276_v2  ;;  %vm7626_vm6 = vcmp.eq.s32.totalorder %v3115_v35, 1  ;;  %v3263_v50 = vrot.slane %v7607_v26, %v7278_v5  ;;  %vm7633_vm12 = vcmp.eq.s32.totalorder %v3119_v13, 1 }
 0x4a7   : > { %3085 = vrot.lane.b32.xlu0 %v7596_v47, %s6356_s27  ;;  %vm7637_vm13 = vcmp.eq.s32.totalorder %v3123_v32, 1  ;;  %vm7641_vm5 = vcmp.eq.s32.totalorder %v3127_v38, 1  ;;  %v3267_v44 = vrot.slane %v7607_v26, %v7276_v2  ;;  %vm7647_vm14 = vcmp.eq.s32.totalorder %v3185_v18, 1 }
 0x4a8   : > { %vm7651_vm10 = vcmp.eq.s32.totalorder %v3189_v28, 1  ;;  %vm7655_vm7 = vcmp.eq.s32.totalorder %v3131_v25, 1  ;;  %vm7659_vm4 = vcmp.eq.s32.totalorder %v3135_v42, 1  ;;  %v3139_v59 = vrot.slane %v3110_v60, %v7298_v12 }
 0x4a9   : > { %vm7664_vm2 = vcmp.eq.s32.totalorder %v3255_v11, 1  ;;  %vm7668_vm9 = vcmp.eq.s32.totalorder %v3259_v39, 1  ;;  %vm7672_vm8 = vcmp.eq.s32.totalorder %v3193_v52, 1  ;;  %vm7676_vm1 = vcmp.eq.s32.totalorder %v3197_v43, 1 }
 0x4aa   : > { %v9057_v9 = vsel %vm7676_vm1, 4294967295, %v9056_v9  ;;  %v3143_v19 = vrot.slane %v3110_v60, %v7289_v63  ;;  %v3111_v3 = vsel %vm3053_vm11, 1, %v8970_v22  ;;  %vm7684_vm0 = vcmp.eq.s32.totalorder %v3263_v50, 1 }
 0x4ab   : > { %v9058_v61 = vmov 0  ;;  %v3201_v7 = vrot.slane %v7603_v30, %v7291_v8  ;;  %vm7690_vm15 = vcmp.eq.s32.totalorder %v3267_v44, 1  ;;  %v3205_v21 = vrot.slane %v7603_v30, %v7295_v10 }
 0x4ac   : > { %v9059_v61 = vsel %vm7684_vm0, 4294967295, %v9058_v61  ;;  %v9061_v48 = vsel %vm7690_vm15, 4294967295, %v9060_v48  ;;  %v3271_v1 = vrot.slane %v7607_v26, %v7291_v8  ;;  %v7699_v46 = vsel %vm3179_vm3, 1, %v8970_v22 }
 0x4ad   : > { %v3275_v29 = vrot.slane %v7607_v26, %v7295_v10  ;;  %v3147_v55 = vrot.slane %v3111_v3, %v7265_v40  ;;  %v3151_v60 = vrot.slane %v3111_v3, %v7268_v45  ;;  %v3155_v35 = vrot.slane %v3111_v3, %v7278_v5 }
 0x4ae   : > { %v3209_v13 = vrot.slane %v7603_v30, %v7298_v12  ;;  %v3213_v32 = vrot.slane %v7603_v30, %v7289_v63  ;;  %v3217_v8 = vrot.slane %v7699_v46, %v7265_v40  ;;  %vm9062_vm3 = vcmask 162816  }
 0x4af   : > { %vm9063_vm15 = vmmov %vm9062_vm3  ;;  %vm7714_vm0 = vcmp.eq.s32.totalorder %v3139_v59, 1  ;;  %v9064_v28 = vmov 0  ;;  %vm7718_vm11 = vcmp.eq.s32.totalorder %v3143_v19, 1  ;;  %v9066_v25 = vmov 0 }
 0x4b0   : > { %v9065_v28 = vsel %vm7714_vm0, 4294967295, %v9064_v28  ;;  %v9067_v25 = vsel %vm7718_vm11, 4294967295, %v9066_v25  ;;  %v3221_v42 = vrot.slane %v7699_v46, %v7268_v45  ;;  %v3225_v30 = vrot.slane %v7699_v46, %v7278_v5 }
 0x4b1   : > { %v9068_v43 = vmov 0  ;;  %v9070_v50 = vmov 0  ;;  %vm9072_vm0 = vcmp.eq.s32.totalorder %v254_v41, 9  ;;  %vm7740_vm11 = vcmp.eq.s32.totalorder %v3271_v1, 1 }
 0x4b2   : > { %v7736_v44 = vsel %vm9072_vm0, 1, %v8970_v22  ;;  %vm7744_vm1 = vcmp.eq.s32.totalorder %v3275_v29, 1  ;;  %v9079_v41 = vmov 0  ;;  %vm9081_vm0 = vcmask 162816  }
 0x4b3   : > { %v3295_v0 = vrot.slane %v7736_v44, %v7278_v5 }
 0x50c   : > { %v6150_v51 = vpop.permute.xlu1 %6149 }
 0x50d   : > { %v6152_v31 = vunpack.i.h.bf16 %v6150_v51  ;;  %v6151_v23 = vunpack.i.l.bf16 %v6150_v51  ;;  %v3279_v51 = vrot.slane %v7607_v26, %v7298_v12  ;;  %v3283_v12 = vrot.slane %v7607_v26, %v7289_v63 }
 0x50f   : > { %v3088_v38 = vsel %vm9062_vm3, %v6151_v23, %v6152_v31  ;;  %v3109_v10 = vsel %vm9063_vm15, 0.0, %v6151_v23  ;;  %vm7726_vm3 = vcmp.eq.s32.totalorder %v3201_v7, 1  ;;  %vm7730_vm15 = vcmp.eq.s32.totalorder %v3205_v21, 1 }
 0x510   : > { %v9069_v43 = vsel %vm7726_vm3, 4294967295, %v9068_v43  ;;  %v9071_v50 = vsel %vm7730_vm15, 4294967295, %v9070_v50  ;;  %v9075_v23 = vmov 0  ;;  %vm7748_vm3 = vcmp.eq.s32.totalorder %v3147_v55, 1 }
 0x511   : > { %v6155_v18 = vpop.permute.xlu0 %6154  ;;  %v6160_v52 = vpop.permute.xlu1 %6159  ;;  %v9076_v23 = vsel %vm7744_vm1, 4294967295, %v9075_v23  ;;  %v9077_v7 = vmov 0  ;;  %vm7752_vm15 = vcmp.eq.s32.totalorder %v3151_v60, 1  ;;  %v3287_v21 = vrot.slane %v7736_v44, %v7265_v40 }
 0x512   : > { %v6157_v11 = vunpack.i.h.bf16 %v6155_v18  ;;  %v6156_v39 = vunpack.i.l.bf16 %v6155_v18  ;;  %v6162_v59 = vunpack.i.h.bf16 %v6160_v52  ;;  %v6161_v19 = vunpack.i.l.bf16 %v6160_v52 }
 0x513   : > { %v9078_v7 = vsel %vm7748_vm3, 4294967295, %v9077_v7  ;;  %v9080_v41 = vsel %vm7752_vm15, 4294967295, %v9079_v41  ;;  %v3167_v1 = vsel %vm7626_vm6, %v3109_v10, %v7490_v36  ;;  %v3168_v29 = vsel %vm7633_vm12, %v3088_v38, %v7493_v37  ;;  %vm9082_vm3 = vmmov %vm9081_vm0 }
 0x514   : > { %v3089_v55 = vsel %vm9081_vm0, %v6152_v31, %v6156_v39  ;;  %v3090_v60 = vsel %vm9082_vm3, %v6156_v39, %v6157_v11  ;;  %vm7768_vm1 = vcmp.eq.s32.totalorder %v3155_v35, 1  ;;  %vm7772_vm15 = vcmp.eq.s32.totalorder %v3209_v13, 1  ;;  %vm9087_vm6 = vmmov %vm9081_vm0 }
 0x515   : > { %v3169_v40 = vsel %vm7637_vm13, %v3089_v55, %v7540_v6  ;;  %v3170_v36 = vsel %vm7641_vm5, %v3090_v60, %v7545_v62  ;;  %v3091_v37 = vsel %vm9087_vm6, %v6157_v11, %v6161_v19  ;;  %vm9088_vm12 = vmmov %vm9081_vm0  ;;  %v6165_v53 = vpop.permute.xlu0 %6164  ;;  %vm7784_vm3 = vcmp.eq.s32.totalorder %v3217_v8, 1  ;;  %v6170_v57 = vpop.permute.xlu1 %6169 }
 0x516   : > { %v3092_v49 = vsel %vm9088_vm12, %v6161_v19, %v6162_v59  ;;  %v3237_v35 = vsel %vm7647_vm14, %v3169_v40, %v3167_v1  ;;  %v3238_v54 = vsel %vm7651_vm10, %v3170_v36, %v3168_v29  ;;  %v3171_v6 = vsel %vm7655_vm7, %v3091_v37, %v7550_v14 }
 0x517   : > { %v3172_v62 = vsel %vm7659_vm4, %v3092_v49, %v7555_v33  ;;  %vm7798_vm13 = vcmp.eq.s32.totalorder %v3213_v32, 1  ;;  %v3307_v13 = vsel %vm7664_vm2, 0.0, %v3237_v35  ;;  %v3308_v56 = vsel %vm7668_vm9, 0.0, %v3238_v54  ;;  %vm9099_vm9 = vmmov %vm9081_vm0 }
 0x518   : > { %v3239_v58 = vsel %vm7672_vm8, %v3171_v6, %v3169_v40  ;;  %vm9093_vm5 = vnez %v9057_v9  ;;  %vm7810_vm7 = vcmp.eq.s32.totalorder %v3225_v30, 1  ;;  %v7814_v33 = vpack.c.bf16 %v3308_v56, %v3308_v56  ;;  %vm9098_vm8 = vmmov %vm9081_vm0 }
 0x519   : > { %v3240_v14 = vsel %vm9093_vm5, %v3172_v62, %v3170_v36  ;;  %vm9096_vm4 = vnez %v9059_v61  ;;  %vm9097_vm2 = vnez %v9061_v48  ;;  %v6167_v8 = vunpack.i.h.bf16 %v6165_v53  ;;  %v3086_v19 = vpop.permute.xlu0 %3085  ;;  %vm9107_vm5 = vmmov %vm9098_vm8 }
 0x51a   : > { %v3309_v2 = vsel %vm9096_vm4, %v3237_v35, %v3239_v58  ;;  %v3310_v15 = vsel %vm9097_vm2, %v3238_v54, %v3240_v14  ;;  %v6166_v38 = vunpack.i.l.bf16 %v6165_v53  ;;  %v3318_v10 = vpack.c.bf16 %v3307_v13, %v3307_v13 }
 0x51b   : > { %v7822_v32 = vpack.c.bf16 %v3309_v2, %v3309_v2  ;;  %v7824_v9 = vpack.c.bf16 %v3310_v15, %v3310_v15  ;;  %v3337_v30 = vrot.slane %v7814_v33, 4  ;;  %v6172_v11 = vunpack.i.h.bf16 %v6170_v57 }
 0x51c   : > { %v6171_v39 = vunpack.i.l.bf16 %v6170_v57  ;;  %v3093_v61 = vsel %vm9098_vm8, %v6162_v59, %v6166_v38  ;;  %v3094_v48 = vsel %vm9099_vm9, %v6166_v38, %v6167_v8  ;;  %vm7829_vm14 = vcmp.eq.s32.totalorder %v3279_v51, 1  ;;  %vm9110_vm8 = vmmov %vm9107_vm5 }
 0x51d   : > { %vm7833_vm10 = vcmp.eq.s32.totalorder %v3287_v21, 1  ;;  %3410 = vrot.lane.b32.xlu1 %v7822_v32, %s6344_s21  ;;  %3412 = vrot.lane.b32.xlu0 %v7824_v9, %s6344_s21  ;;  %vm9104_vm0 = vcmask 1043456   ;;  %vm9105_vm6 = vnez %v9065_v28  ;;  %vm9106_vm12 = vnez %v9067_v25  ;;  %vm9111_vm9 = vmmov %vm9107_vm5 }
 0x51e   : > { %v7842_v29 = vsel %vm9104_vm0, %v3318_v10, %v3337_v30  ;;  %v3173_v51 = vsel %vm9105_vm6, %v3093_v61, %v7571_v16  ;;  %v3174_v59 = vsel %vm9106_vm12, %v3094_v48, %v7576_v17  ;;  %v3095_v21 = vsel %vm9107_vm5, %v6167_v8, %v6171_v39 }
 0x51f   : > { %vm9108_vm4 = vnez %v9069_v43  ;;  %vm9109_vm2 = vnez %v9071_v50  ;;  %v3096_v40 = vsel %vm9110_vm8, %v6171_v39, %v6172_v11  ;;  %v3097_v36 = vsel %vm9111_vm9, %v6172_v11, %v3086_v19 }
 0x520   : > { %v3241_v55 = vsel %vm9108_vm4, %v3173_v51, %v3171_v6  ;;  %v3242_v60 = vsel %vm9109_vm2, %v3174_v59, %v3172_v62  ;;  %vm9112_vm0 = vnez %v9076_v23  ;;  %vm9113_vm6 = vnez %v9078_v7 }
 0x521   : > { %v3311_v28 = vsel %vm7740_vm11, %v3239_v58, %v3241_v55  ;;  %v3312_v16 = vsel %vm9112_vm0, %v3240_v14, %v3242_v60  ;;  %v3175_v17 = vsel %vm9113_vm6, %v3095_v21, %v7581_v20  ;;  %vm9114_vm12 = vnez %v9080_v41 }
 0x522   : > { %v3176_v25 = vsel %vm9114_vm12, %v3096_v40, %v7586_v24  ;;  %v7867_v43 = vpack.c.bf16 %v3311_v28, %v3311_v28  ;;  %v7869_v50 = vpack.c.bf16 %v3312_v16, %v3312_v16  ;;  %v3177_v3 = vsel %vm7768_vm1, %v3097_v36, %v7596_v47 }
 0x523   : > { %v3243_v23 = vsel %vm7772_vm15, %v3175_v17, %v3173_v51  ;;  %v3291_v37 = vrot.slane %v7736_v44, %v7268_v45  ;;  %v3245_v20 = vsel %vm7784_vm3, %v3177_v3, %v3175_v17  ;;  %vm3303_vm11 = vcmp.eq.s32.totalorder %v3283_v12, 1 }
 0x524   : > { %v3244_v24 = vsel %vm7798_vm13, %v3176_v25, %v3174_v59  ;;  %v3313_v7 = vsel %vm7829_vm14, %v3241_v55, %v3243_v23  ;;  %v3315_v47 = vsel %vm7833_vm10, %v3243_v23, %v3245_v20  ;;  %3414 = vrot.lane.b32.xlu1 %v7867_v43, %s6344_s21  ;;  %vm3235_vm1 = vcmp.eq.s32.totalorder %v3221_v42, 1  ;;  %3416 = vrot.lane.b32.xlu0 %v7869_v50, %s6344_s21 }
 0x525   : > { %vm3306_vm15 = vcmp.eq.s32.totalorder %v3295_v0, 1  ;;  %v3247_v63 = vsel %vm7810_vm7, 0.0, %v3177_v3  ;;  %v7898_v26 = vpack.c.bf16 %v3313_v7, %v3313_v7  ;;  %v3314_v44 = vsel %vm3303_vm11, %v3242_v60, %v3244_v24 }
 0x526   : > { %v7900_v41 = vpack.c.bf16 %v3315_v47, %v3315_v47  ;;  %vm3305_vm3 = vcmp.eq.s32.totalorder %v3291_v37, 1  ;;  %v3246_v12 = vsel %vm3235_vm1, 0.0, %v3176_v25  ;;  %v3317_v18 = vsel %vm3306_vm15, %v3245_v20, %v3247_v63 }
 0x527   : > { %v7906_v45 = vpack.c.bf16 %v3314_v44, %v3314_v44  ;;  %v3316_v46 = vsel %vm3305_vm3, %v3244_v24, %v3246_v12  ;;  %v7908_v42 = vpack.c.bf16 %v3317_v18, %v3317_v18  ;;  %vm9115_vm13 = vcmask 1039360  }
 0x528   : > { %3418 = vrot.lane.b32.xlu1 %v7898_v26, %s6344_s21  ;;  %3422 = vrot.lane.b32.xlu0 %v7900_v41, %s6344_s21  ;;  %v7914_v52 = vpack.c.bf16 %v3316_v46, %v3316_v46  ;;  %vm9116_vm7 = vmmov %vm9115_vm13  ;;  %vm9117_vm14 = vcmask 1043456   ;;  %v3339_v30 = vrot.slane %v7824_v9, 4  ;;  %v3338_v11 = vrot.slane %v7822_v32, 4 }
 0x529   : > { %vm9118_vm10 = vmmov %vm9117_vm14  ;;  %v3341_v48 = vrot.slane %v7869_v50, 4  ;;  %v3340_v5 = vrot.slane %v7867_v43, 4  ;;  %v3342_v55 = vrot.slane %v7898_v26, 4  ;;  %v3343_v60 = vrot.slane %v7906_v45, 4 }
 0x52a   : > { %vm9119_vm5 = vmmov %vm9116_vm7  ;;  %v3344_v16 = vrot.slane %v7900_v41, 4  ;;  %v3378_v25 = vrot.slane %v7914_v52, 4 }
 0x52b   : > { %vm9120_vm4 = vmmov %vm9119_vm5 }
 0x52c   : > { %3420 = vrot.lane.b32.xlu1 %v7906_v45, %s6344_s21  ;;  %3426 = vrot.lane.b32.xlu0 %v7908_v42, %s6344_s21  ;;  %vm9121_vm2 = vmmov %vm9118_vm10 }
 0x52d   : > { %vm9122_vm8 = vmmov %vm9121_vm2 }
 0x52e   : > { %vm9123_vm9 = vmmov %vm9121_vm2 }
 0x52f   : > { %v8081_v61 = vsel %vm9123_vm9, %v7822_v32, %v3339_v30  ;;  %vm9124_vm0 = vmmov %vm9121_vm2 }
 0x530   : > { %3424 = vrot.lane.b32.xlu1 %v7914_v52, %s6344_s21  ;;  %3841 = vrot.lane.b32.xlu0 %v7824_v9, %s6346_s23  ;;  %v8088_v1 = vsel %vm9124_vm0, %v7814_v33, %v3338_v11  ;;  %vm9125_vm6 = vmmov %vm9124_vm0 }
 0x531   : > { %v8099_v21 = vsel %vm9125_vm6, %v7867_v43, %v3341_v48  ;;  %vm9126_vm12 = vmmov %vm9124_vm0  ;;  %vm9171_vm6 = vcmask 195584  }
 0x532   : > { %v8106_v33 = vsel %vm9126_vm12, %v7824_v9, %v3340_v5  ;;  %vm9127_vm11 = vmmov %vm9124_vm0 }
 0x533   : > { %v8117_v28 = vsel %vm9127_vm11, %v7869_v50, %v3342_v55  ;;  %vm9128_vm1 = vmmov %vm9124_vm0 }
 0x534   : > { %3839 = vrot.lane.b32.xlu1 %v7822_v32, %s6346_s23  ;;  %3845 = vrot.lane.b32.xlu0 %v7869_v50, %s6346_s23  ;;  %v8124_v17 = vsel %vm9128_vm1, %v7898_v26, %v3343_v60  ;;  %vm9129_vm15 = vmmov %vm9124_vm0 }
 0x535   : > { %v8135_v37 = vsel %vm9129_vm15, %v7906_v45, %v3344_v16  ;;  %vm9130_vm3 = vmmov %vm9124_vm0 }
 0x536   : > { %v8141_v20 = vsel %vm9130_vm3, %v7900_v41, %v3378_v25  ;;  %vm9172_vm12 = vmmov %vm9128_vm1 }
 0x538   : > { %3843 = vrot.lane.b32.xlu1 %v7867_v43, %s6346_s23  ;;  %3851 = vrot.lane.b32.xlu0 %v7900_v41, %s6346_s23 }
 0x53c   : > { %3847 = vrot.lane.b32.xlu1 %v7898_v26, %s6346_s23  ;;  %3855 = vrot.lane.b32.xlu0 %v7908_v42, %s6346_s23 }
 0x540   : > { %3849 = vrot.lane.b32.xlu1 %v7906_v45, %s6346_s23  ;;  %4097 = vrot.lane.b32.xlu0 %v7824_v9, %s6347_s25 }
 0x544   : > { %3853 = vrot.lane.b32.xlu1 %v7914_v52, %s6346_s23  ;;  %4101 = vrot.lane.b32.xlu0 %v7869_v50, %s6347_s25 }
 0x548   : > { %4095 = vrot.lane.b32.xlu1 %v7822_v32, %s6347_s25  ;;  %4107 = vrot.lane.b32.xlu0 %v7900_v41, %s6347_s25 }
 0x54c   : > { %4099 = vrot.lane.b32.xlu1 %v7867_v43, %s6347_s25  ;;  %4111 = vrot.lane.b32.xlu0 %v7908_v42, %s6347_s25 }
 0x550   : > { %4103 = vrot.lane.b32.xlu1 %v7898_v26, %s6347_s25  ;;  %4353 = vrot.lane.b32.xlu0 %v7824_v9, %s6348_s28 }
 0x554   : > { %4105 = vrot.lane.b32.xlu1 %v7906_v45, %s6347_s25  ;;  %4357 = vrot.lane.b32.xlu0 %v7869_v50, %s6348_s28 }
 0x558   : > { %4109 = vrot.lane.b32.xlu1 %v7914_v52, %s6347_s25  ;;  %4363 = vrot.lane.b32.xlu0 %v7900_v41, %s6348_s28 }
 0x55c   : > { %4351 = vrot.lane.b32.xlu1 %v7822_v32, %s6348_s28  ;;  %4367 = vrot.lane.b32.xlu0 %v7908_v42, %s6348_s28 }
 0x560   : > { %4355 = vrot.lane.b32.xlu1 %v7867_v43, %s6348_s28  ;;  %4609 = vrot.lane.b32.xlu0 %v7824_v9, %s6349_s5 }
 0x564   : > { %4359 = vrot.lane.b32.xlu1 %v7898_v26, %s6348_s28  ;;  %4613 = vrot.lane.b32.xlu0 %v7869_v50, %s6349_s5 }
 0x568   : > { %4361 = vrot.lane.b32.xlu1 %v7906_v45, %s6348_s28  ;;  %4619 = vrot.lane.b32.xlu0 %v7900_v41, %s6349_s5 }
 0x56c   : > { %4365 = vrot.lane.b32.xlu1 %v7914_v52, %s6348_s28  ;;  %4623 = vrot.lane.b32.xlu0 %v7908_v42, %s6349_s5 }
 0x570   : > { %4607 = vrot.lane.b32.xlu1 %v7822_v32, %s6349_s5  ;;  %4865 = vrot.lane.b32.xlu0 %v7824_v9, %s6350_s6 }
 0x574   : > { %4611 = vrot.lane.b32.xlu1 %v7867_v43, %s6349_s5  ;;  %4869 = vrot.lane.b32.xlu0 %v7869_v50, %s6350_s6 }
 0x578   : > { %4615 = vrot.lane.b32.xlu1 %v7898_v26, %s6349_s5  ;;  %4875 = vrot.lane.b32.xlu0 %v7900_v41, %s6350_s6 }
 0x57c   : > { %4617 = vrot.lane.b32.xlu1 %v7906_v45, %s6349_s5  ;;  %4879 = vrot.lane.b32.xlu0 %v7908_v42, %s6350_s6 }
 0x580   : > { %4621 = vrot.lane.b32.xlu1 %v7914_v52, %s6349_s5  ;;  %5121 = vrot.lane.b32.xlu0 %v7824_v9, %s6351_s10 }
 0x584   : > { %4863 = vrot.lane.b32.xlu1 %v7822_v32, %s6350_s6  ;;  %5125 = vrot.lane.b32.xlu0 %v7869_v50, %s6351_s10 }
 0x588   : > { %4867 = vrot.lane.b32.xlu1 %v7867_v43, %s6350_s6  ;;  %5131 = vrot.lane.b32.xlu0 %v7900_v41, %s6351_s10 }
 0x58c   : > { %4871 = vrot.lane.b32.xlu1 %v7898_v26, %s6350_s6  ;;  %5135 = vrot.lane.b32.xlu0 %v7908_v42, %s6351_s10 }
 0x58f   : > { %v3411_v49 = vpop.permute.xlu1 %3410  ;;  %v3413_v53 = vpop.permute.xlu0 %3412 }
 0x590   : > { %4873 = vrot.lane.b32.xlu1 %v7906_v45, %s6350_s6  ;;  %5377 = vrot.lane.b32.xlu0 %v7824_v9, %s6352_s11  ;;  %v3436_v31 = vsel %vm9115_vm13, %v3411_v49, %v3413_v53  ;;  %vm9155_vm13 = vcmask 875520  }
 0x591   : > { %v3453_v62 = vsel %vm9118_vm10, %v3436_v31, 0  ;;  %vm9165_vm10 = vmmov %vm9120_vm4 }
 0x594   : > { %4877 = vrot.lane.b32.xlu1 %v7914_v52, %s6350_s6  ;;  %3392 = vrot.lane.b32.xlu0 %v7842_v29, %s6344_s21 }
 0x596   : > { %v3415_v35 = vpop.permute.xlu1 %3414  ;;  %v3417_v54 = vpop.permute.xlu0 %3416 }
 0x597   : > { %v3437_v6 = vsel %vm9116_vm7, %v3413_v53, %v3415_v35  ;;  %v3438_v34 = vsel %vm9119_vm5, %v3415_v35, %v3417_v54  ;;  %vm9159_vm7 = vmmov %vm9155_vm13 }
 0x598   : > { %5119 = vrot.lane.b32.xlu1 %v7822_v32, %s6351_s10  ;;  %5891 = vmatprep.subr.msk.bf16.mxu0 %vm9117_vm14, %v3437_v6  ;;  %v3459_v14 = vsel %vm9122_vm8, %v3438_v34, 0  ;;  %vm9162_vm14 = vcmask 867328   ;;  %vm9166_vm5 = vmmov %vm9120_vm4 }
 0x599   : > { %3821 = vrot.lane.b32.xlu0 %v7842_v29, %s6346_s23  ;;  %3489 = vmatpush1.bf16.msra.mxu0 %v3453_v62  ;;  %vm9168_vm8 = vmmov %vm9124_vm0 }
 0x59a   : > { %v8029_v13 = vpop.permute.xlu1 %3418  ;;  %v8031_v56 = vpop.permute.xlu0 %3422 }
 0x59b   : > { %v3439_v58 = vsel %vm9120_vm4, %v3417_v54, %v8029_v13 }
 0x59c   : > { %5123 = vrot.lane.b32.xlu1 %v7867_v43, %s6351_s10  ;;  %5893 = vmatprep.subr.msk.bf16.mxu1 %vm9121_vm2, %v3439_v58  ;;  %vm9167_vm2 = vmmov %vm9120_vm4 }
 0x59d   : > { %4077 = vrot.lane.b32.xlu0 %v7842_v29, %s6347_s25  ;;  %3530 = vmatpush1.bf16.msra.mxu1 %v3459_v14  ;;  %vm9169_vm9 = vmmov %vm9167_vm2 }
 0x59e   : > { %v8041_v57 = vpop.permute.xlu1 %3420  ;;  %v8043_v4 = vpop.permute.xlu0 %3426  ;;  %vm9170_vm0 = vmmov %vm9167_vm2 }
 0x59f   : > { %vm9173_vm11 = vmmov %vm9170_vm0 }
 0x5a0   : > { %5127 = vrot.lane.b32.xlu1 %v7898_v26, %s6351_s10  ;;  %vm9174_vm1 = vmmov %vm9170_vm0 }
 0x5a1   : > { %4333 = vrot.lane.b32.xlu0 %v7842_v29, %s6348_s28  ;;  %vm9175_vm15 = vmmov %vm9170_vm0 }
 0x5a2   : > { %v8049_v2 = vpop.permute.xlu1 %3424  ;;  %v8051_v15 = vpop.permute.xlu0 %3841 }
 0x5a4   : > { %5129 = vrot.lane.b32.xlu1 %v7906_v45, %s6351_s10 }
 0x5a5   : > { %4589 = vrot.lane.b32.xlu0 %v7842_v29, %s6349_s5 }
 0x5a6   : > { %v8057_v0 = vpop.permute.xlu1 %3839  ;;  %v8059_v8 = vpop.permute.xlu0 %3845 }
 0x5a8   : > { %5133 = vrot.lane.b32.xlu1 %v7914_v52, %s6351_s10 }
 0x5a9   : > { %4845 = vrot.lane.b32.xlu0 %v7842_v29, %s6350_s6 }
 0x5aa   : > { %v8065_v38 = vpop.permute.xlu1 %3843  ;;  %v8067_v10 = vpop.permute.xlu0 %3851 }
 0x5ac   : > { %5375 = vrot.lane.b32.xlu1 %v7822_v32, %s6352_s11 }
 0x5ad   : > { %5101 = vrot.lane.b32.xlu0 %v7842_v29, %s6351_s10 }
 0x5ae   : > { %v8075_v39 = vpop.permute.xlu1 %3847  ;;  %v8077_v19 = vpop.permute.xlu0 %3855 }
 0x5b0   : > { %3396 = vrot.lane.b32.xlu1 %v8081_v61, %s6344_s21 }
 0x5b1   : > { %3394 = vrot.lane.b32.xlu0 %v8088_v1, %s6344_s21 }
 0x5b2   : > { %v8093_v51 = vpop.permute.xlu1 %3849  ;;  %v8095_v59 = vpop.permute.xlu0 %4097 }
 0x5b4   : > { %3400 = vrot.lane.b32.xlu1 %v8099_v21, %s6344_s21 }
 0x5b5   : > { %3398 = vrot.lane.b32.xlu0 %v8106_v33, %s6344_s21 }
 0x5b6   : > { %v8111_v40 = vpop.permute.xlu1 %3853  ;;  %v8113_v36 = vpop.permute.xlu0 %4101 }
 0x5b8   : > { %3402 = vrot.lane.b32.xlu1 %v8117_v28, %s6344_s21 }
 0x5b9   : > { %3404 = vrot.lane.b32.xlu0 %v8124_v17, %s6344_s21 }
 0x5ba   : > { %v8129_v3 = vpop.permute.xlu1 %4095  ;;  %v8131_v23 = vpop.permute.xlu0 %4107 }
 0x5bc   : > { %3406 = vrot.lane.b32.xlu1 %v8135_v37, %s6344_s21 }
 0x5bd   : > { %3408 = vrot.lane.b32.xlu0 %v8141_v20, %s6344_s21  ;;  %s5720_s21 = sshll.u32 %s8888_s8, 4  ;;  %s5721_s21 = int_to_ptr.vmem [resolvable:$true] %s5720_s21 }
 0x5be   : > { %v8145_v24 = vpop.permute.xlu1 %4099  ;;  %v8147_v7 = vpop.permute.xlu0 %4111 }
 0x5c0   : > { %5379 = vrot.lane.b32.xlu1 %v7867_v43, %s6352_s11 }
 0x5c1   : > { %5381 = vrot.lane.b32.xlu0 %v7869_v50, %s6352_s11 }
 0x5c2   : > { %v8153_v47 = vpop.permute.xlu1 %4103  ;;  %v8155_v63 = vpop.permute.xlu0 %4353 }
 0x5c4   : > { %5383 = vrot.lane.b32.xlu1 %v7898_v26, %s6352_s11 }
 0x5c5   : > { %5357 = vrot.lane.b32.xlu0 %v7842_v29, %s6352_s11 }
 0x5c6   : > { %v8161_v44 = vpop.permute.xlu1 %4105  ;;  %v8163_v12 = vpop.permute.xlu0 %4357 }
 0x5c8   : > { %5385 = vrot.lane.b32.xlu1 %v7906_v45, %s6352_s11 }
 0x5c9   : > { %5387 = vrot.lane.b32.xlu0 %v7900_v41, %s6352_s11 }
 0x5ca   : > { %v8169_v18 = vpop.permute.xlu1 %4109  ;;  %v8171_v46 = vpop.permute.xlu0 %4363 }
 0x5cc   : > { %5389 = vrot.lane.b32.xlu1 %v7914_v52, %s6352_s11 }
 0x5cd   : > { %5391 = vrot.lane.b32.xlu0 %v7908_v42, %s6352_s11 }
 0x5ce   : > { %v8177_v49 = vpop.permute.xlu1 %4351  ;;  %v8179_v53 = vpop.permute.xlu0 %4367 }
 0x5d0   : > { %3825 = vrot.lane.b32.xlu1 %v8081_v61, %s6346_s23 }
 0x5d1   : > { %3823 = vrot.lane.b32.xlu0 %v8088_v1, %s6346_s23 }
 0x5d2   : > { %v8185_v31 = vpop.permute.xlu1 %4355  ;;  %v8187_v35 = vpop.permute.xlu0 %4609 }
 0x5d4   : > { %3829 = vrot.lane.b32.xlu1 %v8099_v21, %s6346_s23 }
 0x5d5   : > { %3827 = vrot.lane.b32.xlu0 %v8106_v33, %s6346_s23 }
 0x5d6   : > { %v8193_v42 = vpop.permute.xlu1 %4359  ;;  %v8195_v54 = vpop.permute.xlu0 %4613 }
 0x5d7   : > { %9131 = vst [vmem:[#allocation13_spill] sm:$0xff] %v8195_v54 }
 0x5d8   : > { %3831 = vrot.lane.b32.xlu1 %v8117_v28, %s6346_s23 }
 0x5d9   : > { %3833 = vrot.lane.b32.xlu0 %v8124_v17, %s6346_s23 }
 0x5da   : > { %v8201_v6 = vpop.permute.xlu1 %4361  ;;  %v8203_v62 = vpop.permute.xlu0 %4619 }
 0x5db   : > { %9132 = vst [vmem:[#allocation14_spill] sm:$0xff] %v8203_v62 }
 0x5dc   : > { %3835 = vrot.lane.b32.xlu1 %v8135_v37, %s6346_s23 }
 0x5dd   : > { %3837 = vrot.lane.b32.xlu0 %v8141_v20, %s6346_s23 }
 0x5de   : > { %v8209_v34 = vpop.permute.xlu1 %4365  ;;  %v8211_v58 = vpop.permute.xlu0 %4623 }
 0x5df   : > { %9133 = vst [vmem:[#allocation15_spill] sm:$0xff] %v8211_v58 }
 0x5e0   : > { %4081 = vrot.lane.b32.xlu1 %v8081_v61, %s6347_s25 }
 0x5e1   : > { %4079 = vrot.lane.b32.xlu0 %v8088_v1, %s6347_s25 }
 0x5e2   : > { %v8217_v14 = vpop.permute.xlu1 %4607  ;;  %v8219_v30 = vpop.permute.xlu0 %4865 }
 0x5e3   : > { %9134 = vst [vmem:[#allocation16_spill] sm:$0xff] %v8217_v14  ;;  %9135 = vst [vmem:[#allocation17_spill] sm:$0xff] %v8219_v30  ;;  %v9176_v14 = vmov 0  }
 0x5e4   : > { %4085 = vrot.lane.b32.xlu1 %v8099_v21, %s6347_s25 }
 0x5e5   : > { %4083 = vrot.lane.b32.xlu0 %v8106_v33, %s6347_s25 }
 0x5e6   : > { %v8225_v11 = vpop.permute.xlu1 %4611  ;;  %v8227_v48 = vpop.permute.xlu0 %4869 }
 0x5e7   : > { %9136 = vst [vmem:[#allocation18_spill] sm:$0xff] %v8225_v11  ;;  %9137 = vst [vmem:[#allocation19_spill] sm:$0xff] %v8227_v48 }
 0x5e8   : > { %4087 = vrot.lane.b32.xlu1 %v8117_v28, %s6347_s25 }
 0x5e9   : > { %4089 = vrot.lane.b32.xlu0 %v8124_v17, %s6347_s25 }
 0x5ea   : > { %v8233_v5 = vpop.permute.xlu1 %4615  ;;  %v8235_v55 = vpop.permute.xlu0 %4875 }
 0x5eb   : > { %9138 = vst [vmem:[#allocation20_spill] sm:$0xff] %v8233_v5  ;;  %9139 = vst [vmem:[#allocation21_spill] sm:$0xff] %v8235_v55 }
 0x5ec   : > { %4091 = vrot.lane.b32.xlu1 %v8135_v37, %s6347_s25 }
 0x5ed   : > { %4093 = vrot.lane.b32.xlu0 %v8141_v20, %s6347_s25 }
 0x5ee   : > { %v8241_v60 = vpop.permute.xlu1 %4617  ;;  %v8243_v16 = vpop.permute.xlu0 %4879 }
 0x5ef   : > { %9140 = vst [vmem:[#allocation22_spill] sm:$0xff] %v8241_v60  ;;  %9141 = vst [vmem:[#allocation23_spill] sm:$0xff] %v8243_v16 }
 0x5f0   : > { %4337 = vrot.lane.b32.xlu1 %v8081_v61, %s6348_s28 }
 0x5f1   : > { %4335 = vrot.lane.b32.xlu0 %v8088_v1, %s6348_s28 }
 0x5f2   : > { %v8249_v25 = vpop.permute.xlu1 %4621  ;;  %v8251_v22 = vpop.permute.xlu0 %5121 }
 0x5f3   : > { %9142 = vst [vmem:[#allocation24_spill] sm:$0xff] %v8249_v25  ;;  %9143 = vst [vmem:[#allocation25_spill] sm:$0xff] %v8251_v22 }
 0x5f4   : > { %4341 = vrot.lane.b32.xlu1 %v8099_v21, %s6348_s28 }
 0x5f5   : > { %4339 = vrot.lane.b32.xlu0 %v8106_v33, %s6348_s28 }
 0x5f6   : > { %v8257_v27 = vpop.permute.xlu1 %4863  ;;  %v8259_v55 = vpop.permute.xlu0 %5125 }
 0x5f7   : > { %9144 = vst [vmem:[#allocation26_spill] sm:$0xff] %v8257_v27  ;;  %9145 = vst [vmem:[#allocation27_spill] sm:$0xff] %v8259_v55 }
 0x5f8   : > { %4343 = vrot.lane.b32.xlu1 %v8117_v28, %s6348_s28 }
 0x5f9   : > { %4345 = vrot.lane.b32.xlu0 %v8124_v17, %s6348_s28 }
 0x5fa   : > { %v8265_v16 = vpop.permute.xlu1 %4867  ;;  %v8267_v48 = vpop.permute.xlu0 %5131 }
 0x5fb   : > { %9146 = vst [vmem:[#allocation28_spill] sm:$0xff] %v8265_v16  ;;  %9147 = vst [vmem:[#allocation29_spill] sm:$0xff] %v8267_v48 }
 0x5fc   : > { %4347 = vrot.lane.b32.xlu1 %v8135_v37, %s6348_s28 }
 0x5fd   : > { %4349 = vrot.lane.b32.xlu0 %v8141_v20, %s6348_s28 }
 0x5fe   : > { %v8273_v22 = vpop.permute.xlu1 %4871  ;;  %v5136_v27 = vpop.permute.xlu0 %5135 }
 0x5ff   : > { %9148 = vst [vmem:[#allocation30_spill] sm:$0xff] %v8273_v22 }
 0x600   : > { %4593 = vrot.lane.b32.xlu1 %v8081_v61, %s6349_s5 }
 0x601   : > { %4591 = vrot.lane.b32.xlu0 %v8088_v1, %s6349_s5 }
 0x602   : > { %v8279_v55 = vpop.permute.xlu1 %4873  ;;  %v8281_v16 = vpop.permute.xlu0 %5377 }
 0x603   : > { %9149 = vst [vmem:[#allocation31_spill] sm:$0xff] %v8279_v55 }
 0x604   : > { %4597 = vrot.lane.b32.xlu1 %v8099_v21, %s6349_s5 }
 0x605   : > { %4595 = vrot.lane.b32.xlu0 %v8106_v33, %s6349_s5 }
 0x606   : > { %v8287_v48 = vpop.permute.xlu1 %4877  ;;  %v3393_v22 = vpop.permute.xlu0 %3392 }
 0x607   : > { %9150 = vst [vmem:[#allocation32_spill] sm:$0xff] %v8287_v48 }
 0x608   : > { %4599 = vrot.lane.b32.xlu1 %v8117_v28, %s6349_s5 }
 0x609   : > { %4601 = vrot.lane.b32.xlu0 %v8124_v17, %s6349_s5 }
 0x60a   : > { %v8293_v30 = vpop.permute.xlu1 %5119 }
 0x60b   : > { %9151 = vst [vmem:[#allocation33_spill] sm:$0xff] %v8293_v30  ;;  %v8295_v55 = vpop.permute.xlu0 %3821 }
 0x60c   : > { %4603 = vrot.lane.b32.xlu1 %v8135_v37, %s6349_s5 }
 0x60d   : > { %4605 = vrot.lane.b32.xlu0 %v8141_v20, %s6349_s5  ;;  %s5706_s5 = scalar_lea.sflag [#allocation4], %s6501_s30 }
 0x60e   : > { %v8301_v58 = vpop.permute.xlu1 %5123 }
 0x60f   : > { %9152 = vst [vmem:[#allocation34_spill] sm:$0xff] %v8301_v58  ;;  %v8303_v48 = vpop.permute.xlu0 %4077 }
 0x610   : > { %4849 = vrot.lane.b32.xlu1 %v8081_v61, %s6350_s6 }
 0x611   : > { %4847 = vrot.lane.b32.xlu0 %v8088_v1, %s6350_s6 }
 0x612   : > { %v8309_v25 = vpop.permute.xlu1 %5127 }
 0x613   : > { %9153 = vst [vmem:[#allocation35_spill] sm:$0xff] %v8309_v25  ;;  %v8311_v30 = vpop.permute.xlu0 %4333 }
 0x614   : > { %4853 = vrot.lane.b32.xlu1 %v8099_v21, %s6350_s6 }
 0x615   : > { %4851 = vrot.lane.b32.xlu0 %v8106_v33, %s6350_s6 }
 0x616   : > { %v8317_v62 = vpop.permute.xlu1 %5129 }
 0x617   : > { %9154 = vst [vmem:[#allocation36_spill] sm:$0xff] %v8317_v62  ;;  %v8322_v58 = vsel %vm9155_vm13, %v8309_v25, %v8317_v62  ;;  %v8324_v60 = vpop.permute.xlu0 %4589  ;;  %vm9177_vm13 = vmmov %vm9170_vm0 }
 0x618   : > { %9156 = vst [vmem:[#allocation37_spill] sm:$0xff] %v8322_v58  ;;  %9157 = vst [vmem:[#allocation38_spill] sm:$0xff] %v8324_v60  ;;  %4855 = vrot.lane.b32.xlu1 %v8117_v28, %s6350_s6 }
 0x619   : > { %4857 = vrot.lane.b32.xlu0 %v8124_v17, %s6350_s6 }
 0x61a   : > { %v8330_v5 = vpop.permute.xlu1 %5133 }
 0x61b   : > { %9158 = vst [vmem:[#allocation39_spill] sm:$0xff] %v8330_v5  ;;  %v8334_v54 = vsel %vm9159_vm7, %v8330_v5, %v5136_v27  ;;  %v8336_v11 = vpop.permute.xlu0 %4845  ;;  %vm9178_vm7 = vmmov %vm9171_vm6 }
 0x61c   : > { %9160 = vst [vmem:[#allocation40_spill] sm:$0xff] %v8334_v54  ;;  %9161 = vst [vmem:[#allocation41_spill] sm:$0xff] %v8336_v11  ;;  %4859 = vrot.lane.b32.xlu1 %v8135_v37, %s6350_s6 }
 0x61d   : > { %4861 = vrot.lane.b32.xlu0 %v8141_v20, %s6350_s6  ;;  %s6271_s6 = scalar_lea.vmem %s5721_s21, 1024 }
 0x61e   : > { %v5376_v58 = vpop.permute.xlu1 %5375  ;;  %p6272_p13 = scmp.ne.s32.totalorder %s5721_s21, %s6271_s6 }
 0x61f   : > { %v8344_v62 = vsel %vm9162_vm14, %v5376_v58, %v8281_v16  ;;  %v8346_v25 = vpop.permute.xlu0 %5101  ;;  %v3440_v58 = vsel %vm9120_vm4, %v8029_v13, %v8041_v57  ;;  %v6173_v13 = vld [vmem:[#allocation5 + $0x4] sm:$0xf]  ;;  %vm9179_vm14 = vmmov %vm9130_vm3 }
 0x620   : > { %9163 = vst [vmem:[#allocation42_spill] sm:$0xff] %v8344_v62  ;;  %9164 = vst [vmem:[#allocation43_spill] sm:$0xff] %v8346_v25  ;;  %5105 = vrot.lane.b32.xlu1 %v8081_v61, %s6351_s10  ;;  %v3441_v25 = vsel %vm9167_vm2, %v8041_v57, %v8031_v56  ;;  %p6273_p1 = pnand %p6272_p13, %p9419_p0 }
 0x621   : > { %5103 = vrot.lane.b32.xlu0 %v8088_v1, %s6351_s10  ;;  %vm9182_vm4 = vmmov %vm9170_vm0 }
 0x622   : > { %v3397_v27 = vpop.permute.xlu1 %3396  ;;  %vm9183_vm2 = vmmov %vm9171_vm6  ;;  %p6274_p2 = pneg %p6273_p1 }
 0x623   : > { %v3395_v54 = vpop.permute.xlu0 %3394 }
 0x624   : > { %v3428_v5 = vsel %vm9165_vm10, %v3393_v22, %v3395_v54  ;;  %5109 = vrot.lane.b32.xlu1 %v8099_v21, %s6351_s10  ;;  %v3429_v11 = vsel %vm9166_vm5, %v3395_v54, %v3397_v27  ;;  %vm9180_vm10 = vmmov %vm9130_vm3 }
 0x625   : > { %5107 = vrot.lane.b32.xlu0 %v8106_v33, %s6351_s10  ;;  %3490 = vmatprep.subr.bf16.mxu0 %v3429_v11  ;;  %v3465_v11 = vsel %vm9172_vm12, %v3440_v58, 0  ;;  %vm9181_vm5 = vmmov %vm9170_vm0 }
 0x626   : > { %3491 = vmatpush1.bf16.msra.mxu0 %v3428_v5  ;;  %v3401_v62 = vpop.permute.xlu1 %3400  ;;  %v3442_v5 = vsel %vm9173_vm11, %v8031_v56, %v8049_v2  ;;  %vm9188_vm12 = vmmov %vm9183_vm2 }
 0x627   : > { %5895 = vmatprep.subr.msk.bf16.mxu0 %vm9168_vm8, %v3441_v25  ;;  %v3399_v22 = vpop.permute.xlu0 %3398  ;;  %v3471_v56 = vsel %vm9179_vm14, %v3442_v5, 0  ;;  %vm9184_vm8 = vmmov %vm9130_vm3 }
 0x628   : > { %v3430_v60 = vsel %vm9169_vm9, %v3397_v27, %v3399_v22  ;;  %5111 = vrot.lane.b32.xlu1 %v8117_v28, %s6351_s10  ;;  %v3431_v54 = vsel %vm9170_vm0, %v3399_v22, %v3401_v62  ;;  %v3443_v27 = vsel %vm9175_vm15, %v8049_v2, %v8043_v4  ;;  %vm9185_vm9 = vcmask 867328   ;;  %vm9186_vm0 = vmmov %vm9130_vm3 }
 0x629   : > { %5113 = vrot.lane.b32.xlu0 %v8124_v17, %s6351_s10  ;;  %5892 = vmatmul.mubr.msk.bf16.vlgmr.msra.gmra.mxu0 %vm9171_vm6, %v6173_v13  ;;  %vm9187_vm6 = vmmov %vm9185_vm9 }
 0x62a   : > { %3531 = vmatprep.subr.bf16.mxu1 %v3431_v54  ;;  %3571 = vmatpush1.bf16.msra.mxu0 %v3465_v11  ;;  %v3403_v57 = vpop.permute.xlu1 %3402  ;;  %v3640_v54 = vsel %vm9184_vm8, %v7822_v32, 0  ;;  %vm9189_vm11 = vmmov %vm9186_vm0 }
 0x62b   : > { %3532 = vmatpush1.bf16.msra.mxu1 %v3430_v60  ;;  %v3432_v25 = vsel %vm9174_vm1, %v3401_v62, %v3403_v57  ;;  %v3405_v22 = vpop.permute.xlu0 %3404  ;;  %3590 = vmatprep.mubr.bf16.mxu0 %v9176_v14  ;;  %v3644_v32 = vsel %vm9189_vm11, %v7867_v43, 0  ;;  %vm9190_vm1 = vmmov %vm9187_vm6 }
 0x62c   : > { %5897 = vmatprep.subr.msk.bf16.mxu1 %vm9130_vm3, %v3443_v27  ;;  %5115 = vrot.lane.b32.xlu1 %v8135_v37, %s6351_s10  ;;  %v3433_v58 = vsel %vm9177_vm13, %v3403_v57, %v3405_v22  ;;  %vm9191_vm15 = vmmov %vm9186_vm0 }
 0x62d   : > { %5117 = vrot.lane.b32.xlu0 %v8141_v20, %s6351_s10  ;;  %3572 = vmatprep.subr.bf16.mxu0 %v3433_v58  ;;  %vm9192_vm3 = vmmov %vm9183_vm2 }
 0x62e   : > { %5894 = vmatmul.mubr.msk.bf16.vlgmr.msra.gmra.mxu1 %vm9178_vm7, %v6173_v13  ;;  %3573 = vmatpush1.bf16.msra.mxu0 %v3432_v25  ;;  %v3407_v4 = vpop.permute.xlu1 %3406  ;;  %vm9193_vm13 = vmmov %vm9186_vm0 }
 0x62f   : > { %3612 = vmatpush1.bf16.msra.mxu1 %v3471_v56  ;;  %5899 = vmatprep.subr.msk.bf16.mxu0 %vm9180_vm10, %v7824_v9  ;;  %v3409_v2 = vpop.permute.xlu0 %3408  ;;  %v3434_v62 = vsel %vm9181_vm5, %v3405_v22, %v3407_v4  ;;  %v3648_v43 = vsel %vm9193_vm13, %v7898_v26, 0  ;;  %vm9194_vm7 = vmmov %vm9190_vm1  ;;  %vm9197_vm5 = vcmask 1031168   ;;  %v6176_v56 = vld [vmem:[%s6505_s9 + $0x10] sm:$0xff] }
 0x630   : > { %5361 = vrot.lane.b32.xlu1 %v8081_v61, %s6352_s11  ;;  %v3435_v60 = vsel %vm9182_vm4, %v3407_v4, %v3409_v2  ;;  %3631 = vmatprep.mubr.bf16.mxu1 %v9176_v14  ;;  %vm9195_vm14 = vmmov %vm9186_vm0  ;;  %v3865_v26 = vsel %vm9197_vm5, %v8057_v0, %v8051_v15 }
 0x631   : > { %5359 = vrot.lane.b32.xlu0 %v8088_v1, %s6352_s11  ;;  %5896 = vmatmul.mubr.msk.bf16.vlgmr.msra.gmra.mxu0 %vm9183_vm2, %v6173_v13  ;;  %vm9196_vm10 = vmmov %vm9190_vm1 }
 0x632   : > { %3613 = vmatprep.subr.bf16.mxu1 %v3435_v60  ;;  %3670 = vmatpush1.bf16.msra.mxu0 %v3640_v54  ;;  %v5380_v9 = vpop.permute.xlu1 %5379  ;;  %vm9198_vm4 = vmmov %vm9183_vm2 }
 0x633   : > { %3614 = vmatpush1.bf16.msra.mxu1 %v3434_v62  ;;  %v8403_v11 = vsel %vm9185_vm9, %v8281_v16, %v5380_v9  ;;  %3671 = vmatprep.subr.bf16.mxu0 %v8088_v1  ;;  %v5382_v57 = vpop.permute.xlu0 %5381  ;;  %vm9199_vm2 = vmmov %vm9186_vm0 }
 0x634   : > { %5901 = vmatprep.subr.msk.bf16.mxu1 %vm9186_vm0, %v7869_v50  ;;  %v8409_v5 = vsel %vm9187_vm6, %v5380_v9, %v5382_v57  ;;  %5365 = vrot.lane.b32.xlu1 %v8099_v21, %s6352_s11  ;;  %vm9200_vm8 = vmmov %vm9197_vm5 }
 0x635   : > { %5363 = vrot.lane.b32.xlu0 %v8106_v33, %s6352_s11  ;;  %3689 = vmatprep.mubr.bf16.mxu0 %v9176_v14  ;;  %vm9201_vm9 = vmmov %vm9190_vm1 }
 0x636   : > { %5898 = vmatmul.mubr.msk.bf16.vlgmr.msra.gmra.mxu1 %vm9188_vm12, %v6173_v13  ;;  %3672 = vmatpush1.bf16.msra.mxu0 %v7842_v29  ;;  %v5384_v1 = vpop.permute.xlu1 %5383  ;;  %v6174_v29 = vld [vmem:[#allocation5] sm:$0xf]  ;;  %vm9202_vm6 = vmmov %vm9190_vm1 }
 0x637   : > { %3711 = vmatpush1.bf16.msra.mxu1 %v3644_v32  ;;  %v8421_v50 = vsel %vm9190_vm1, %v5382_v57, %v5384_v1  ;;  %5903 = vmatprep.subr.msk.bf16.mxu0 %vm9191_vm15, %v7906_v45  ;;  %v8425_v16 = vpop.permute.xlu0 %5357  ;;  %vm9203_vm12 = vmmov %vm9186_vm0  ;;  %v6179_v57 = vld [vmem:[#allocation5 + $0x8] sm:$0xf] }
 0x638   : > { %3712 = vmatprep.subr.bf16.mxu1 %v8106_v33  ;;  %5367 = vrot.lane.b32.xlu1 %v8117_v28, %s6352_s11  ;;  %vm9204_vm11 = vmmov %vm9192_vm3 }
 0x639   : > { %5369 = vrot.lane.b32.xlu0 %v8124_v17, %s6352_s11  ;;  %5900 = vmatmul.mubr.msk.bf16.vlgmr.msra.gmra.mxu0 %vm9192_vm3, %v6174_v29  ;;  %vm9205_vm1 = vmmov %vm9197_vm5 }
 0x63a   : > { %3752 = vmatpush1.bf16.msra.mxu0 %v3648_v43  ;;  %v5386_v13 = vpop.permute.xlu1 %5385  ;;  %3730 = vmatprep.mubr.bf16.mxu1 %v9176_v14  ;;  %vm9206_vm15 = vmmov %vm9205_vm1  ;;  %v3872_v43 = vsel %vm9205_vm1, %v8111_v40, %v8077_v19 }
 0x63b   : > { %3713 = vmatpush1.bf16.msra.mxu1 %v8081_v61  ;;  %v8438_v45 = vsel %vm9194_vm7, %v5384_v1, %v5386_v13  ;;  %3753 = vmatprep.subr.bf16.mxu0 %v8117_v28  ;;  %v5388_v33 = vpop.permute.xlu0 %5387  ;;  %v3866_v28 = vsel %vm9200_vm8, %v8051_v15, %v8065_v38  ;;  %v6175_v15 = vld [vmem:[%s6505_s9 + $0x8] sm:$0xff]  ;;  %v3868_v22 = vsel %vm9206_vm15, %v8059_v8, %v8075_v39  ;;  %vm9207_vm3 = vmmov %vm9186_vm0 }
 0x63c   : > { %5905 = vmatprep.subr.msk.bf16.mxu1 %vm9195_vm14, %v7914_v52  ;;  %v8444_v25 = vsel %vm9196_vm10, %v5386_v13, %v5388_v33  ;;  %5371 = vrot.lane.b32.xlu1 %v8135_v37, %s6352_s11  ;;  %v3652_v52 = vsel %vm9199_vm2, %v7900_v41, 0  ;;  %v3882_v41 = vsel %vm9203_vm12, %v3865_v26, 0  ;;  %vm9208_vm13 = vmmov %vm9205_vm1 }
 0x63d   : > { %5373 = vrot.lane.b32.xlu0 %v8141_v20, %s6352_s11  ;;  %3771 = vmatprep.mubr.bf16.mxu0 %v9176_v14  ;;  %vm9209_vm7 = vmmov %vm9205_vm1 }
 0x63e   : > { %5902 = vmatmul.mubr.msk.bf16.vlgmr.msra.gmra.mxu1 %vm9198_vm4, %v6174_v29  ;;  %3754 = vmatpush1.bf16.msra.mxu0 %v8099_v21  ;;  %v5390_v61 = vpop.permute.xlu1 %5389  ;;  %vm9210_vm14 = vmmov %vm9205_vm1 }
 0x63f   : > { %3793 = vmatpush1.bf16.msra.mxu1 %v3652_v52  ;;  %v8462_v20 = vsel %vm9201_vm9, %v5388_v33, %v5390_v61  ;;  %5907 = vmatprep.subr.msk.bf16.mxu0 %vm9186_vm0, %v3866_v28  ;;  %v5392_v0 = vpop.permute.xlu0 %5391  ;;  %vm9211_vm10 = vmmov %vm9198_vm4  ;;  %v6180_v33 = vld [vmem:[%s6505_s9 + $0x28] sm:$0xff]  ;;  %v6181_v52 = vld [vmem:[%s6505_s9 + $0x30] sm:$0xff] }
 0x640   : > { %3794 = vmatprep.subr.bf16.mxu1 %v8135_v37  ;;  %v8467_v21 = vsel %vm9202_vm6, %v5390_v61, %v5392_v0  ;;  %3812 = vmatprep.mubr.bf16.mxu1 %v9176_v14  ;;  %v3867_v37 = vsel %vm9205_vm1, %v8065_v38, %v8059_v8  ;;  %v6177_v38 = vld [vmem:[%s6505_s9 + $0x18] sm:$0xff]  ;;  %v3869_v8 = vsel %vm9210_vm14, %v8075_v39, %v8093_v51  ;;  %vm9212_vm5 = vmmov %vm9186_vm0  ;;  %v6178_v39 = vld [vmem:[%s6505_s9 + $0x20] sm:$0xff] }
 0x641   : > { %5904 = vmatmul.mubr.msk.bf16.vlgmr.msra.gmra.mxu0 %vm9204_vm11, %v6174_v29  ;;  %5630 = vrot.lane.b32.xlu1 %v6175_v15, %s6348_s28  ;;  %vm9213_vm4 = vmmov %vm9205_vm1 }
 0x642   : > { %3918 = vmatpush1.bf16.msra.mxu0 %v3882_v41  ;;  %v3826_v27 = vpop.permute.xlu1 %3825  ;;  %3937 = vmatprep.mubr.bf16.mxu0 %v9176_v14  ;;  %vm9214_vm2 = vmmov %vm9186_vm0 }
 0x643   : > { %3795 = vmatpush1.bf16.msra.mxu1 %v8124_v17  ;;  %v3824_v58 = vpop.permute.xlu0 %3823  ;;  %5632 = vrot.lane.b32.xlu0 %v6176_v56, %s6348_s28  ;;  %v3888_v17 = vsel %vm9212_vm5, %v3867_v37, 0  ;;  %vm9215_vm8 = vmmov %vm9205_vm1 }
 0x644   : > { %5909 = vmatprep.subr.msk.bf16.mxu1 %vm9207_vm3, %v3868_v22  ;;  %v3857_v4 = vsel %vm9208_vm13, %v8295_v55, %v3824_v58  ;;  %v3858_v2 = vsel %vm9209_vm7, %v3824_v58, %v3826_v27  ;;  %v3870_v55 = vsel %vm9213_vm4, %v8093_v51, %v8067_v10  ;;  %vm9216_vm9 = vmmov %vm9205_vm1  ;;  %vm9223_vm13 = vcmask 965632   ;;  %v6183_v58 = vld [vmem:[%s6505_s9 + $0x40] sm:$0xff] }
 0x645   : > { %3919 = vmatprep.subr.bf16.mxu0 %v3858_v2  ;;  %5634 = vrot.lane.b32.xlu1 %v6177_v38, %s6348_s28  ;;  %vm9217_vm0 = vmmov %vm9211_vm10  ;;  %v6184_v2 = vld [vmem:[%s6505_s9 + $0x48] sm:$0xff] }
 0x646   : > { %5906 = vmatmul.mubr.msk.bf16.vlgmr.msra.gmra.mxu1 %vm9211_vm10, %v6174_v29  ;;  %3920 = vmatpush1.bf16.msra.mxu0 %v3857_v4  ;;  %v3830_v62 = vpop.permute.xlu1 %3829  ;;  %vm9218_vm6 = vmmov %vm9214_vm2 }
 0x647   : > { %3959 = vmatpush1.bf16.msra.mxu1 %v3888_v17  ;;  %5911 = vmatprep.subr.msk.bf16.mxu0 %vm9214_vm2, %v3870_v55  ;;  %v3828_v60 = vpop.permute.xlu0 %3827  ;;  %v3894_v51 = vsel %vm9218_vm6, %v3869_v8, 0  ;;  %vm9219_vm12 = vmmov %vm9205_vm1 }
 0x648   : > { %v3859_v54 = vsel %vm9215_vm8, %v3826_v27, %v3828_v60  ;;  %v3860_v9 = vsel %vm9216_vm9, %v3828_v60, %v3830_v62  ;;  %3978 = vmatprep.mubr.bf16.mxu1 %v9176_v14  ;;  %5636 = vrot.lane.b32.xlu0 %v6178_v39, %s6348_s28  ;;  %v3871_v1 = vsel %vm9219_vm12, %v8067_v10, %v8111_v40  ;;  %vm9220_vm11 = vmmov %vm9205_vm1 }
 0x649   : > { %5908 = vmatmul.mubr.msk.bf16.vlgmr.msra.gmra.mxu0 %vm9217_vm0, %v6179_v57  ;;  %3960 = vmatprep.subr.bf16.mxu1 %v3860_v9  ;;  %vm9221_vm15 = vmmov %vm9214_vm2  ;;  %v4121_v10 = vsel %vm9223_vm13, %v8129_v3, %v8095_v59  ;;  %v6182_v3 = vld [vmem:[%s6505_s9 + $0x38] sm:$0xff]  ;;  %s5968_s9 = sshll.u32 %s6404_s19, 10  ;;  %s6357_s19 = smov [#allocation8]  }
 0x64a   : > { %4000 = vmatpush1.bf16.msra.mxu0 %v3894_v51  ;;  %v3832_v32 = vpop.permute.xlu1 %3831  ;;  %4019 = vmatprep.mubr.bf16.mxu0 %v9176_v14  ;;  %vm9222_vm3 = vmmov %vm9205_vm1  ;;  %s6275_s10 = sshll.u32 %s6357_s19, 4  ;;  %s6276_s10 = int_to_ptr.vmem [resolvable:$false] %s6275_s10 }
 0x64b   : > { %3961 = vmatpush1.bf16.msra.mxu1 %v3859_v54  ;;  %v3861_v29 = vsel %vm9220_vm11, %v3830_v62, %v3832_v32  ;;  %v3834_v13 = vpop.permute.xlu0 %3833  ;;  %5638 = vrot.lane.b32.xlu1 %v6180_v33, %s6348_s28  ;;  %vm9224_vm7 = vmmov %vm9217_vm0  ;;  %s6277_s11 = scalar_lea.vmem %s6276_s10, 2048  ;;  %p6278_p4 = scmp.lt.s32.totalorder %s5721_s21, %s6276_s10 }
 0x64c   : > { %5913 = vmatprep.subr.msk.bf16.mxu1 %vm9221_vm15, %v3872_v43  ;;  %v3862_v26 = vsel %vm9222_vm3, %v3832_v32, %v3834_v13  ;;  %5640 = vrot.lane.b32.xlu0 %v6181_v52, %s6348_s28  ;;  %vm9225_vm14 = vmmov %vm9214_vm2  ;;  %p6279_p6 = scmp.lt.s32.totalorder %s6277_s11, %s6271_s6 }
 0x64d   : > { %4001 = vmatprep.subr.bf16.mxu0 %v3862_v26  ;;  %v3900_v19 = vsel %vm9225_vm14, %v3871_v1, 0  ;;  %vm9226_vm10 = vmmov %vm9223_vm13 }
 0x64e   : > { %5910 = vmatmul.mubr.msk.bf16.vlgmr.msra.gmra.mxu1 %vm9224_vm7, %v6179_v57  ;;  %4002 = vmatpush1.bf16.msra.mxu0 %v3861_v29  ;;  %v3836_v40 = vpop.permute.xlu1 %3835  ;;  %v4122_v61 = vsel %vm9226_vm10, %v8095_v59, %v8145_v24  ;;  %vm9227_vm5 = vmmov %vm9214_vm2  ;;  %p6280_p8 = por %p6279_p6, %p6278_p4 }
 0x64f   : > { %4041 = vmatpush1.bf16.msra.mxu1 %v3900_v19  ;;  %5915 = vmatprep.subr.msk.bf16.mxu0 %vm9227_vm5, %v4122_v61  ;;  %v3838_v28 = vpop.permute.xlu0 %3837  ;;  %vm9228_vm4 = vmmov %vm9205_vm1 }
 0x650   : > { %v3863_v0 = vsel %vm9228_vm4, %v3834_v13, %v3836_v40  ;;  %vm9229_vm2 = vmmov %vm9205_vm1  ;;  %4060 = vmatprep.mubr.bf16.mxu1 %v9176_v14  ;;  %5642 = vrot.lane.b32.xlu1 %v6182_v3, %s6348_s28  ;;  %p6281_p12 = pnand %p6280_p8, %p6274_p2 }
 0x651   : > { %v3864_v41 = vsel %vm9229_vm2, %v3836_v40, %v3838_v28  ;;  %vm9230_vm8 = vmmov %vm9227_vm5  ;;  %5644 = vrot.lane.b32.xlu0 %v6183_v58, %s6348_s28  ;;  %v9282_v58 = vld [vmem:[#allocation18_spill] sm:$0xff] }
 0x652   : > { %v4138_v15 = vsel %vm9230_vm8, %v4121_v10, 0  ;;  %vm9231_vm9 = vmmov %vm9217_vm0  ;;  %4042 = vmatprep.subr.bf16.mxu1 %v3864_v41  ;;  %v4082_v59 = vpop.permute.xlu1 %4081 }
 0x653   : > { %5912 = vmatmul.mubr.msk.bf16.vlgmr.msra.gmra.mxu0 %vm9231_vm9, %v6179_v57  ;;  %vm9232_vm0 = vmmov %vm9226_vm10  ;;  %4043 = vmatpush1.bf16.msra.mxu1 %v3863_v0  ;;  %v4080_v22 = vpop.permute.xlu0 %4079 }
 0x654   : > { %4174 = vmatpush1.bf16.msra.mxu0 %v4138_v15  ;;  %4193 = vmatprep.mubr.bf16.mxu0 %v9176_v14  ;;  %v4123_v27 = vsel %vm9232_vm0, %v8145_v24, %v8113_v36  ;;  %vm9233_vm6 = vmmov %vm9232_vm0  ;;  %v4128_v9 = vsel %vm9232_vm0, %v8169_v18, %v8147_v7 }
 0x655   : > { %v4124_v37 = vsel %vm9233_vm6, %v8113_v36, %v8153_v47  ;;  %vm9234_vm12 = vmmov %vm9227_vm5  ;;  %5646 = vrot.lane.b32.xlu1 %v6184_v2, %s6348_s28  ;;  %s8913_s28 = scalar_lea.hbm %s8955_s4, %s5968_s9 }
 0x656   : > { %5917 = vmatprep.subr.msk.bf16.mxu1 %vm9234_vm12, %v4124_v37  ;;  %vm9235_vm11 = vmmov %vm9232_vm0  ;;  %v4086_v38 = vpop.permute.xlu1 %4085 }
 0x657   : > { %v4113_v56 = vsel %vm9235_vm11, %v8303_v48, %v4080_v22  ;;  %vm9236_vm1 = vmmov %vm9232_vm0  ;;  %v4084_v8 = vpop.permute.xlu0 %4083  ;;  %vm9250_vm11 = vcmask 957440  }
 0x658   : > { %v4114_v4 = vsel %vm9236_vm1, %v4080_v22, %v4082_v59  ;;  %vm9237_vm15 = vmmov %vm9232_vm0  ;;  %v4377_v51 = vsel %vm9250_vm11, %v8177_v49, %v8155_v63 }
 0x659   : > { %4175 = vmatprep.subr.bf16.mxu0 %v4114_v4  ;;  %v4125_v24 = vsel %vm9237_vm15, %v8153_v47, %v8161_v44  ;;  %vm9238_vm3 = vmmov %vm9224_vm7  ;;  %v6185_v47 = vld [vmem:[#allocation5 + $0xc] sm:$0xf] }
 0x65a   : > { %5914 = vmatmul.mubr.msk.bf16.vlgmr.msra.gmra.mxu1 %vm9238_vm3, %v6179_v57  ;;  %4176 = vmatpush1.bf16.msra.mxu0 %v4113_v56  ;;  %vm9239_vm13 = vmmov %vm9227_vm5  ;;  %v4088_v60 = vpop.permute.xlu1 %4087 }
 0x65b   : > { %v4144_v36 = vsel %vm9239_vm13, %v4123_v27, 0  ;;  %vm9240_vm7 = vmmov %vm9232_vm0  ;;  %4234 = vmatprep.mubr.bf16.mxu1 %v9176_v14  ;;  %v4090_v39 = vpop.permute.xlu0 %4089  ;;  %v9278_v27 = vld [vmem:[#allocation16_spill] sm:$0xff] }
 0x65c   : > { %v4126_v48 = vsel %vm9240_vm7, %v8161_v44, %v8131_v23  ;;  %4215 = vmatpush1.bf16.msra.mxu1 %v4144_v36  ;;  %vm9241_vm14 = vmmov %vm9227_vm5 }
 0x65d   : > { %5919 = vmatprep.subr.msk.bf16.mxu0 %vm9241_vm14, %v4126_v48  ;;  %vm9242_vm10 = vmmov %vm9232_vm0 }
 0x65e   : > { %v4115_v17 = vsel %vm9242_vm10, %v4082_v59, %v4084_v8  ;;  %vm9243_vm5 = vmmov %vm9232_vm0  ;;  %v4092_v32 = vpop.permute.xlu1 %4091 }
 0x65f   : > { %v4116_v62 = vsel %vm9243_vm5, %v4084_v8, %v4086_v38  ;;  %vm9244_vm4 = vmmov %vm9238_vm3 }
 0x660   : > { %5916 = vmatmul.mubr.msk.bf16.vlgmr.msra.gmra.mxu0 %vm9244_vm4, %v6185_v47  ;;  %4216 = vmatprep.subr.bf16.mxu1 %v4116_v62  ;;  %vm9245_vm2 = vmmov %vm9230_vm8 }
 0x661   : > { %v4150_v55 = vsel %vm9245_vm2, %v4125_v24, 0  ;;  %4275 = vmatprep.mubr.bf16.mxu0 %v9176_v14  ;;  %vm9246_vm8 = vmmov %vm9232_vm0  ;;  %4217 = vmatpush1.bf16.msra.mxu1 %v4115_v17  ;;  %v9293_v17 = vld [vmem:[#allocation38_spill] sm:$0xff] }
 0x662   : > { %4256 = vmatpush1.bf16.msra.mxu0 %v4150_v55  ;;  %v4127_v44 = vsel %vm9246_vm8, %v8131_v23, %v8169_v18  ;;  %vm9247_vm9 = vmmov %vm9232_vm0  ;;  %v4094_v18 = vpop.permute.xlu0 %4093  ;;  %v4338_v43 = vpop.permute.xlu1 %4337  ;;  %v9296_v55 = vld [vmem:[#allocation22_spill] sm:$0xff] }
 0x663   : > { %v4117_v54 = vsel %vm9247_vm9, %v4086_v38, %v4088_v60  ;;  %vm9248_vm6 = vmmov %vm9245_vm2  ;;  %v9290_v38 = vld [vmem:[#allocation20_spill] sm:$0xff] }
 0x664   : > { %5921 = vmatprep.subr.msk.bf16.mxu1 %vm9248_vm6, %v4128_v9  ;;  %vm9249_vm12 = vmmov %vm9232_vm0  ;;  %v9300_v9 = vld [vmem:[#allocation14_spill] sm:$0xff] }
 0x665   : > { %v4118_v57 = vsel %vm9249_vm12, %v4088_v60, %v4090_v39  ;;  %vm9251_vm1 = vmmov %vm9238_vm3 }
 0x666   : > { %4257 = vmatprep.subr.bf16.mxu0 %v4118_v57  ;;  %5918 = vmatmul.mubr.msk.bf16.vlgmr.msra.gmra.mxu1 %vm9251_vm1, %v6185_v47  ;;  %vm9252_vm15 = vmmov %vm9245_vm2  ;;  %v4336_v33 = vpop.permute.xlu0 %4335  ;;  %v4342_v19 = vpop.permute.xlu1 %4341 }
 0x667   : > { %4258 = vmatpush1.bf16.msra.mxu0 %v4117_v54  ;;  %v4156_v23 = vsel %vm9252_vm15, %v4127_v44, 0  ;;  %vm9253_vm3 = vmmov %vm9250_vm11  ;;  %4316 = vmatprep.mubr.bf16.mxu1 %v9176_v14 }
 0x668   : > { %v4378_v7 = vsel %vm9253_vm3, %v8155_v63, %v8185_v31  ;;  %4297 = vmatpush1.bf16.msra.mxu1 %v4156_v23  ;;  %vm9254_vm13 = vmmov %vm9245_vm2 }
 0x669   : > { %5923 = vmatprep.subr.msk.bf16.mxu0 %vm9254_vm13, %v4378_v7  ;;  %vm9255_vm7 = vmmov %vm9232_vm0 }
 0x66a   : > { %v4119_v1 = vsel %vm9255_vm7, %v4090_v39, %v4092_v32  ;;  %vm9256_vm14 = vmmov %vm9232_vm0  ;;  %v4344_v0 = vpop.permute.xlu1 %4343 }
 0x66b   : > { %v4120_v29 = vsel %vm9256_vm14, %v4092_v32, %v4094_v18  ;;  %vm9257_vm10 = vmmov %vm9245_vm2  ;;  %v6187_v32 = vld [vmem:[#allocation5 + $0x14] sm:$0xf] }
 0x66c   : > { %v4394_v49 = vsel %vm9257_vm10, %v4377_v51, 0  ;;  %vm9258_vm5 = vmmov %vm9251_vm1  ;;  %4298 = vmatprep.subr.bf16.mxu1 %v4120_v29 }
 0x66d   : > { %5920 = vmatmul.mubr.msk.bf16.vlgmr.msra.gmra.mxu0 %vm9258_vm5, %v6185_v47  ;;  %vm9259_vm4 = vmmov %vm9253_vm3  ;;  %4299 = vmatpush1.bf16.msra.mxu1 %v4119_v1  ;;  %v9307_v1 = vld [vmem:[#allocation24_spill] sm:$0xff] }
 0x66e   : > { %4430 = vmatpush1.bf16.msra.mxu0 %v4394_v49  ;;  %4449 = vmatprep.mubr.bf16.mxu0 %v9176_v14  ;;  %v4379_v63 = vsel %vm9259_vm4, %v8185_v31, %v8163_v12  ;;  %vm9260_vm2 = vmmov %vm9253_vm3  ;;  %v4348_v22 = vpop.permute.xlu1 %4347 }
 0x66f   : > { %v4380_v13 = vsel %vm9260_vm2, %v8163_v12, %v8193_v42  ;;  %vm9261_vm8 = vmmov %vm9248_vm6 }
 0x670   : > { %5925 = vmatprep.subr.msk.bf16.mxu1 %vm9261_vm8, %v4380_v13  ;;  %vm9262_vm9 = vmmov %vm9260_vm2 }
 0x671   : > { %v4369_v26 = vsel %vm9262_vm9, %v8311_v30, %v4336_v33  ;;  %vm9263_vm0 = vmmov %vm9260_vm2  ;;  %v4340_v30 = vpop.permute.xlu0 %4339  ;;  %vm9279_vm9 = vcmask 949248  }
 0x672   : > { %v4370_v52 = vsel %vm9263_vm0, %v4336_v33, %v4338_v43  ;;  %vm9264_vm6 = vmmov %vm9263_vm0  ;;  %v4633_v37 = vsel %vm9279_vm9, %v9278_v27, %v8187_v35  ;;  %v4594_v24 = vpop.permute.xlu1 %4593  ;;  %v9330_v27 = vld [vmem:[#allocation41_spill] sm:$0xff] }
 0x673   : > { %4431 = vmatprep.subr.bf16.mxu0 %v4370_v52  ;;  %v4381_v10 = vsel %vm9264_vm6, %v8193_v42, %v8201_v6  ;;  %vm9265_vm12 = vmmov %vm9251_vm1  ;;  %v6186_v42 = vld [vmem:[#allocation5 + $0x10] sm:$0xf]  ;;  %v9315_v52 = vld [vmem:[#allocation26_spill] sm:$0xff] }
 0x674   : > { %5922 = vmatmul.mubr.msk.bf16.vlgmr.msra.gmra.mxu1 %vm9265_vm12, %v6185_v47  ;;  %4432 = vmatpush1.bf16.msra.mxu0 %v4369_v26  ;;  %vm9266_vm11 = vmmov %vm9261_vm8  ;;  %v9314_v26 = vld [vmem:[#allocation17_spill] sm:$0xff] }
 0x675   : > { %v4400_v31 = vsel %vm9266_vm11, %v4379_v63, 0  ;;  %vm9267_vm1 = vmmov %vm9263_vm0  ;;  %4490 = vmatprep.mubr.bf16.mxu1 %v9176_v14  ;;  %v4346_v15 = vpop.permute.xlu0 %4345 }
 0x676   : > { %v4382_v12 = vsel %vm9267_vm1, %v8201_v6, %v8171_v46  ;;  %4471 = vmatpush1.bf16.msra.mxu1 %v4400_v31  ;;  %vm9268_vm15 = vmmov %vm9261_vm8  ;;  %v4375_v56 = vsel %vm9267_vm1, %v4346_v15, %v4348_v22  ;;  %v4598_v54 = vpop.permute.xlu1 %4597 }
 0x677   : > { %5927 = vmatprep.subr.msk.bf16.mxu0 %vm9268_vm15, %v4382_v12  ;;  %vm9269_vm3 = vmmov %vm9263_vm0  ;;  %v9319_v12 = vld [vmem:[#allocation28_spill] sm:$0xff] }
 0x678   : > { %v4371_v40 = vsel %vm9269_vm3, %v4338_v43, %v4340_v30  ;;  %vm9270_vm13 = vmmov %vm9263_vm0  ;;  %v9310_v43 = vld [vmem:[#allocation15_spill] sm:$0xff] }
 0x679   : > { %v4372_v61 = vsel %vm9270_vm13, %v4340_v30, %v4342_v19  ;;  %vm9271_vm7 = vmmov %vm9258_vm5 }
 0x67a   : > { %5924 = vmatmul.mubr.msk.bf16.vlgmr.msra.gmra.mxu0 %vm9271_vm7, %v6186_v42  ;;  %4472 = vmatprep.subr.bf16.mxu1 %v4372_v61  ;;  %vm9272_vm14 = vmmov %vm9261_vm8  ;;  %v4600_v18 = vpop.permute.xlu1 %4599 }
 0x67b   : > { %v4406_v28 = vsel %vm9272_vm14, %v4381_v10, 0  ;;  %4531 = vmatprep.mubr.bf16.mxu0 %v9176_v14  ;;  %vm9273_vm10 = vmmov %vm9263_vm0  ;;  %4473 = vmatpush1.bf16.msra.mxu1 %v4371_v40 }
 0x67c   : > { %4512 = vmatpush1.bf16.msra.mxu0 %v4406_v28  ;;  %v4383_v6 = vsel %vm9273_vm10, %v8171_v46, %v8209_v34  ;;  %vm9274_vm5 = vmmov %vm9263_vm0 }
 0x67d   : > { %v4373_v41 = vsel %vm9274_vm5, %v4342_v19, %v4344_v0  ;;  %vm9275_vm4 = vmmov %vm9263_vm0 }
 0x67e   : > { %v4384_v3 = vsel %vm9275_vm4, %v8209_v34, %v8179_v53  ;;  %vm9276_vm2 = vmmov %vm9261_vm8  ;;  %v4350_v34 = vpop.permute.xlu0 %4349  ;;  %v4604_v19 = vpop.permute.xlu1 %4603 }
 0x67f   : > { %5929 = vmatprep.subr.msk.bf16.mxu1 %vm9276_vm2, %v4384_v3  ;;  %vm9277_vm8 = vmmov %vm9263_vm0  ;;  %v9327_v3 = vld [vmem:[#allocation30_spill] sm:$0xff] }
 0x680   : > { %v4374_v59 = vsel %vm9277_vm8, %v4344_v0, %v4346_v15  ;;  %vm9280_vm0 = vmmov %vm9271_vm7 }
 0x681   : > { %4513 = vmatprep.subr.bf16.mxu0 %v4374_v59  ;;  %5926 = vmatmul.mubr.msk.bf16.vlgmr.msra.gmra.mxu1 %vm9280_vm0, %v6186_v42  ;;  %vm9281_vm6 = vmmov %vm9276_vm2 }
 0x682   : > { %4514 = vmatpush1.bf16.msra.mxu0 %v4373_v41  ;;  %v4412_v46 = vsel %vm9281_vm6, %v4383_v6, 0  ;;  %vm9283_vm12 = vmmov %vm9279_vm9  ;;  %4572 = vmatprep.mubr.bf16.mxu1 %v9176_v14  ;;  %v4592_v8 = vpop.permute.xlu0 %4591  ;;  %v4850_v0 = vpop.permute.xlu1 %4849  ;;  %v9325_v6 = vld [vmem:[#allocation19_spill] sm:$0xff] }
 0x683   : > { %v4634_v53 = vsel %vm9283_vm12, %v8187_v35, %v9282_v58  ;;  %4553 = vmatpush1.bf16.msra.mxu1 %v4412_v46  ;;  %vm9284_vm11 = vmmov %vm9276_vm2  ;;  %v9288_v35 = vld [vmem:[#allocation13_spill] sm:$0xff] }
 0x684   : > { %5931 = vmatprep.subr.msk.bf16.mxu0 %vm9284_vm11, %v4634_v53  ;;  %vm9285_vm15 = vmmov %vm9267_vm1  ;;  %v9335_v53 = vld [vmem:[#allocation21_spill] sm:$0xff] }
 0x685   : > { %v4376_v4 = vsel %vm9285_vm15, %v4348_v22, %v4350_v34  ;;  %vm9286_vm3 = vmmov %vm9276_vm2  ;;  %v9333_v22 = vld [vmem:[#allocation31_spill] sm:$0xff] }
 0x686   : > { %v4650_v2 = vsel %vm9286_vm3, %v4633_v37, 0  ;;  %vm9287_vm13 = vmmov %vm9280_vm0  ;;  %4554 = vmatprep.subr.bf16.mxu1 %v4376_v4  ;;  %v4596_v57 = vpop.permute.xlu0 %4595  ;;  %v4854_v4 = vpop.permute.xlu1 %4853 }
 0x687   : > { %5928 = vmatmul.mubr.msk.bf16.vlgmr.msra.gmra.mxu0 %vm9287_vm13, %v6186_v42  ;;  %vm9289_vm7 = vmmov %vm9279_vm9  ;;  %4555 = vmatpush1.bf16.msra.mxu1 %v4375_v56 }
 0x688   : > { %4686 = vmatpush1.bf16.msra.mxu0 %v4650_v2  ;;  %4705 = vmatprep.mubr.bf16.mxu0 %v9176_v14  ;;  %v4635_v36 = vsel %vm9289_vm7, %v9282_v58, %v9288_v35  ;;  %vm9291_vm14 = vmmov %vm9289_vm7 }
 0x689   : > { %v4636_v48 = vsel %vm9291_vm14, %v9288_v35, %v9290_v38  ;;  %vm9292_vm10 = vmmov %vm9276_vm2 }
 0x68a   : > { %5933 = vmatprep.subr.msk.bf16.mxu1 %vm9292_vm10, %v4636_v48  ;;  %vm9294_vm5 = vmmov %vm9289_vm7  ;;  %v4602_v13 = vpop.permute.xlu0 %4601  ;;  %v4856_v48 = vpop.permute.xlu1 %4855 }
 0x68b   : > { %v4625_v62 = vsel %vm9294_vm5, %v9293_v17, %v4592_v8  ;;  %vm9295_vm4 = vmmov %vm9294_vm5  ;;  %vm9316_vm5 = vcmask 883712  }
 0x68c   : > { %v4626_v47 = vsel %vm9295_vm4, %v4592_v8, %v4594_v24  ;;  %vm9297_vm2 = vmmov %vm9295_vm4  ;;  %v4889_v10 = vsel %vm9316_vm5, %v9315_v52, %v9314_v26  ;;  %v9343_v8 = vld [vmem:[#allocation32_spill] sm:$0xff]  ;;  %v9366_v52 = vld [vmem:[#allocation43_spill] sm:$0xff] }
 0x68d   : > { %4687 = vmatprep.subr.bf16.mxu0 %v4626_v47  ;;  %v4637_v60 = vsel %vm9297_vm2, %v9290_v38, %v9296_v55  ;;  %vm9298_vm8 = vmmov %vm9280_vm0  ;;  %v6188_v38 = vld [vmem:[#allocation5 + $0x18] sm:$0xf] }
 0x68e   : > { %5930 = vmatmul.mubr.msk.bf16.vlgmr.msra.gmra.mxu1 %vm9298_vm8, %v6186_v42  ;;  %4688 = vmatpush1.bf16.msra.mxu0 %v4625_v62  ;;  %vm9299_vm9 = vmmov %vm9286_vm3  ;;  %v4606_v40 = vpop.permute.xlu0 %4605  ;;  %v9345_v62 = vld [vmem:[#allocation23_spill] sm:$0xff] }
 0x68f   : > { %v4656_v44 = vsel %vm9299_vm9, %v4635_v36, 0  ;;  %vm9301_vm0 = vmmov %vm9297_vm2  ;;  %4746 = vmatprep.mubr.bf16.mxu1 %v9176_v14 }
 0x690   : > { %v4638_v39 = vsel %vm9301_vm0, %v9296_v55, %v9300_v9  ;;  %4727 = vmatpush1.bf16.msra.mxu1 %v4656_v44  ;;  %vm9302_vm6 = vmmov %vm9286_vm3  ;;  %v4631_v61 = vsel %vm9301_vm0, %v4602_v13, %v4604_v19 }
 0x691   : > { %5935 = vmatprep.subr.msk.bf16.mxu0 %vm9302_vm6, %v4638_v39  ;;  %vm9303_vm12 = vmmov %vm9301_vm0  ;;  %v9351_v39 = vld [vmem:[#allocation33_spill] sm:$0xff] }
 0x692   : > { %v4627_v51 = vsel %vm9303_vm12, %v4594_v24, %v4596_v57  ;;  %vm9304_vm11 = vmmov %vm9301_vm0  ;;  %v4848_v59 = vpop.permute.xlu0 %4847 }
 0x693   : > { %v4628_v23 = vsel %vm9304_vm11, %v4596_v57, %v4598_v54  ;;  %vm9305_vm1 = vmmov %vm9298_vm8 }
 0x694   : > { %5932 = vmatmul.mubr.msk.bf16.vlgmr.msra.gmra.mxu0 %vm9305_vm1, %v6187_v32  ;;  %4728 = vmatprep.subr.bf16.mxu1 %v4628_v23  ;;  %vm9306_vm15 = vmmov %vm9286_vm3 }
 0x695   : > { %v4662_v7 = vsel %vm9306_vm15, %v4637_v60, 0  ;;  %4787 = vmatprep.mubr.bf16.mxu0 %v9176_v14  ;;  %vm9308_vm3 = vmmov %vm9301_vm0  ;;  %4729 = vmatpush1.bf16.msra.mxu1 %v4627_v51  ;;  %v9353_v51 = vld [vmem:[#allocation34_spill] sm:$0xff] }
 0x696   : > { %4768 = vmatpush1.bf16.msra.mxu0 %v4662_v7  ;;  %v4639_v29 = vsel %vm9308_vm3, %v9300_v9, %v9307_v1  ;;  %vm9309_vm13 = vmmov %vm9301_vm0  ;;  %v4852_v2 = vpop.permute.xlu0 %4851  ;;  %v9350_v9 = vld [vmem:[#allocation25_spill] sm:$0xff] }
 0x697   : > { %v4629_v49 = vsel %vm9309_vm13, %v4598_v54, %v4600_v18  ;;  %vm9311_vm7 = vmmov %vm9301_vm0 }
 0x698   : > { %v4640_v63 = vsel %vm9311_vm7, %v9307_v1, %v9310_v43  ;;  %vm9312_vm14 = vmmov %vm9302_vm6  ;;  %v9361_v43 = vld [vmem:[#allocation27_spill] sm:$0xff] }
 0x699   : > { %5937 = vmatprep.subr.msk.bf16.mxu1 %vm9312_vm14, %v4640_v63  ;;  %vm9313_vm10 = vmmov %vm9301_vm0 }
 0x69a   : > { %v4630_v33 = vsel %vm9313_vm10, %v4600_v18, %v4602_v13  ;;  %vm9317_vm4 = vmmov %vm9305_vm1  ;;  %v4858_v60 = vpop.permute.xlu0 %4857  ;;  %v9363_v13 = vld [vmem:[#allocation35_spill] sm:$0xff] }
 0x69b   : > { %4769 = vmatprep.subr.bf16.mxu0 %v4630_v33  ;;  %5934 = vmatmul.mubr.msk.bf16.vlgmr.msra.gmra.mxu1 %vm9317_vm4, %v6187_v32  ;;  %vm9318_vm2 = vmmov %vm9302_vm6 }
 0x69c   : > { %4770 = vmatpush1.bf16.msra.mxu0 %v4629_v49  ;;  %v4668_v31 = vsel %vm9318_vm2, %v4639_v29, 0  ;;  %vm9320_vm8 = vmmov %vm9316_vm5  ;;  %4828 = vmatprep.mubr.bf16.mxu1 %v9176_v14 }
 0x69d   : > { %v4890_v30 = vsel %vm9320_vm8, %v9314_v26, %v9319_v12  ;;  %4809 = vmatpush1.bf16.msra.mxu1 %v4668_v31  ;;  %vm9321_vm9 = vmmov %vm9318_vm2 }
 0x69e   : > { %5939 = vmatprep.subr.msk.bf16.mxu0 %vm9321_vm9, %v4890_v30  ;;  %vm9322_vm6 = vmmov %vm9301_vm0  ;;  %v4862_v7 = vpop.permute.xlu0 %4861  ;;  %v9371_v30 = vld [vmem:[#allocation36_spill] sm:$0xff] }
 0x69f   : > { %v4632_v42 = vsel %vm9322_vm6, %v4604_v19, %v4606_v40  ;;  %vm9323_vm12 = vmmov %vm9318_vm2 }
 0x6a0   : > { %v4906_v28 = vsel %vm9323_vm12, %v4889_v10, 0  ;;  %vm9324_vm11 = vmmov %vm9305_vm1  ;;  %4810 = vmatprep.subr.bf16.mxu1 %v4632_v42 }
 0x6a1   : > { %5936 = vmatmul.mubr.msk.bf16.vlgmr.msra.gmra.mxu0 %vm9324_vm11, %v6187_v32  ;;  %vm9326_vm1 = vmmov %vm9316_vm5  ;;  %4811 = vmatpush1.bf16.msra.mxu1 %v4631_v61 }
 0x6a2   : > { %4942 = vmatpush1.bf16.msra.mxu0 %v4906_v28  ;;  %4961 = vmatprep.mubr.bf16.mxu0 %v9176_v14  ;;  %v4891_v41 = vsel %vm9326_vm1, %v9319_v12, %v9325_v6  ;;  %vm9328_vm15 = vmmov %vm9326_vm1  ;;  %v4885_v55 = vsel %vm9326_vm1, %v4854_v4, %v4856_v48  ;;  %v5104_v26 = vpop.permute.xlu0 %5103  ;;  %v9370_v12 = vld [vmem:[#allocation29_spill] sm:$0xff] }
 0x6a3   : > { %v4892_v15 = vsel %vm9328_vm15, %v9325_v6, %v9327_v3  ;;  %vm9329_vm3 = vmmov %vm9318_vm2  ;;  %v9377_v6 = vld [vmem:[#allocation37_spill] sm:$0xff] }
 0x6a4   : > { %5941 = vmatprep.subr.msk.bf16.mxu1 %vm9329_vm3, %v4892_v15  ;;  %vm9331_vm13 = vmmov %vm9326_vm1 }
 0x6a5   : > { %v4881_v37 = vsel %vm9331_vm13, %v9330_v27, %v4848_v59  ;;  %vm9332_vm7 = vmmov %vm9326_vm1 }
 0x6a6   : > { %v4882_v46 = vsel %vm9332_vm7, %v4848_v59, %v4850_v0  ;;  %vm9334_vm14 = vmmov %vm9326_vm1  ;;  %vm9352_vm7 = vcmask 875520   ;;  %v5108_v42 = vpop.permute.xlu0 %5107  ;;  %v9379_v59 = vld [vmem:[#allocation39_spill] sm:$0xff] }
 0x6a7   : > { %4943 = vmatprep.subr.bf16.mxu0 %v4882_v46  ;;  %v4893_v58 = vsel %vm9334_vm14, %v9327_v3, %v9333_v22  ;;  %vm9336_vm10 = vmmov %vm9326_vm1  ;;  %v5145_v57 = vsel %vm9352_vm7, %v9351_v39, %v9350_v9  ;;  %v6189_v3 = vld [vmem:[#allocation5 + $0x1c] sm:$0xf] }
 0x6a8   : > { %v4894_v34 = vsel %vm9336_vm10, %v9333_v22, %v9335_v53  ;;  %vm9337_vm5 = vmmov %vm9317_vm4  ;;  %4944 = vmatpush1.bf16.msra.mxu0 %v4881_v37  ;;  %v9382_v22 = vld [vmem:[#allocation40_spill] sm:$0xff] }
 0x6a9   : > { %5938 = vmatmul.mubr.msk.bf16.vlgmr.msra.gmra.mxu1 %vm9337_vm5, %v6187_v32  ;;  %vm9338_vm4 = vmmov %vm9318_vm2  ;;  %5943 = vmatprep.subr.msk.bf16.mxu0 %vm9318_vm2, %v4894_v34  ;;  %v4860_v32 = vpop.permute.xlu1 %4859 }
 0x6aa   : > { %v4912_v56 = vsel %vm9338_vm4, %v4891_v41, 0  ;;  %vm9339_vm8 = vmmov %vm9326_vm1  ;;  %5002 = vmatprep.mubr.bf16.mxu1 %v9176_v14  ;;  %v5114_v46 = vpop.permute.xlu0 %5113 }
 0x6ab   : > { %4983 = vmatpush1.bf16.msra.mxu1 %v4912_v56  ;;  %v4883_v24 = vsel %vm9339_vm8, %v4850_v0, %v4852_v2  ;;  %vm9340_vm9 = vmmov %vm9326_vm1 }
 0x6ac   : > { %v4884_v35 = vsel %vm9340_vm9, %v4852_v2, %v4854_v4  ;;  %vm9341_vm0 = vmmov %vm9318_vm2 }
 0x6ad   : > { %v4918_v36 = vsel %vm9341_vm0, %v4893_v58, 0  ;;  %vm9342_vm6 = vmmov %vm9337_vm5  ;;  %4984 = vmatprep.subr.bf16.mxu1 %v4884_v35  ;;  %v5106_v49 = vpop.permute.xlu1 %5105 }
 0x6ae   : > { %5940 = vmatmul.mubr.msk.bf16.vlgmr.msra.gmra.mxu0 %vm9342_vm6, %v6188_v38  ;;  %vm9344_vm12 = vmmov %vm9326_vm1  ;;  %v5118_v56 = vpop.permute.xlu0 %5117 }
 0x6af   : > { %5024 = vmatpush1.bf16.msra.mxu0 %v4918_v36  ;;  %5043 = vmatprep.mubr.bf16.mxu0 %v9176_v14  ;;  %v4895_v17 = vsel %vm9344_vm12, %v9335_v53, %v9343_v8  ;;  %vm9346_vm11 = vmmov %vm9326_vm1 }
 0x6b0   : > { %v4896_v47 = vsel %vm9346_vm11, %v9343_v8, %v9345_v62  ;;  %4985 = vmatpush1.bf16.msra.mxu1 %v4883_v24  ;;  %vm9347_vm15 = vmmov %vm9341_vm0  ;;  %v9389_v24 = vld [vmem:[#allocation42_spill] sm:$0xff] }
 0x6b1   : > { %5945 = vmatprep.subr.msk.bf16.mxu1 %vm9347_vm15, %v4896_v47  ;;  %vm9348_vm3 = vmmov %vm9326_vm1  ;;  %v5110_v61 = vpop.permute.xlu1 %5109 }
 0x6b2   : > { %v4886_v44 = vsel %vm9348_vm3, %v4856_v48, %v4858_v60  ;;  %vm9349_vm13 = vmmov %vm9341_vm0 }
 0x6b3   : > { %5025 = vmatprep.subr.bf16.mxu0 %v4886_v44  ;;  %v4924_v54 = vsel %vm9349_vm13, %v4895_v17, 0  ;;  %vm9354_vm14 = vmmov %vm9352_vm7 }
 0x6b4   : > { %v5146_v23 = vsel %vm9354_vm14, %v9350_v9, %v9353_v51  ;;  %vm9355_vm10 = vmmov %vm9337_vm5  ;;  %5026 = vmatpush1.bf16.msra.mxu0 %v4885_v55  ;;  %v6190_v55 = vld [vmem:[#allocation5 + $0x20] sm:$0xf] }
 0x6b5   : > { %5942 = vmatmul.mubr.msk.bf16.vlgmr.msra.gmra.mxu1 %vm9355_vm10, %v6188_v38  ;;  %vm9356_vm5 = vmmov %vm9341_vm0  ;;  %v5112_v15 = vpop.permute.xlu1 %5111 }
 0x6b6   : > { %5065 = vmatpush1.bf16.msra.mxu1 %v4924_v54  ;;  %5947 = vmatprep.subr.msk.bf16.mxu0 %vm9356_vm5, %v5146_v23  ;;  %vm9357_vm4 = vmmov %vm9326_vm1  ;;  %v5174_v41 = vsel %vm9356_vm5, %v9377_v6, 0 }
 0x6b7   : > { %v4887_v18 = vsel %vm9357_vm4, %v4858_v60, %v4860_v32  ;;  %vm9358_vm2 = vmmov %vm9326_vm1  ;;  %5084 = vmatprep.mubr.bf16.mxu1 %v9176_v14 }
 0x6b8   : > { %v4888_v1 = vsel %vm9358_vm2, %v4860_v32, %v4862_v7  ;;  %vm9359_vm8 = vmmov %vm9341_vm0 }
 0x6b9   : > { %v5162_v29 = vsel %vm9359_vm8, %v5145_v57, 0  ;;  %vm9360_vm9 = vmmov %vm9342_vm6  ;;  %5066 = vmatprep.subr.bf16.mxu1 %v4888_v1  ;;  %v5116_v34 = vpop.permute.xlu1 %5115 }
 0x6ba   : > { %5944 = vmatmul.mubr.msk.bf16.vlgmr.msra.gmra.mxu0 %vm9360_vm9, %v6188_v38  ;;  %vm9362_vm0 = vmmov %vm9352_vm7  ;;  %5067 = vmatpush1.bf16.msra.mxu1 %v4887_v18 }
 0x6bb   : > { %5198 = vmatpush1.bf16.msra.mxu0 %v5162_v29  ;;  %5217 = vmatprep.mubr.bf16.mxu0 %v9176_v14  ;;  %v5147_v63 = vsel %vm9362_vm0, %v9353_v51, %v9361_v43  ;;  %vm9364_vm6 = vmmov %vm9362_vm0  ;;  %v5142_v58 = vsel %vm9362_vm0, %v5112_v15, %v5114_v46 }
 0x6bc   : > { %v5148_v33 = vsel %vm9364_vm6, %v9361_v43, %v9363_v13  ;;  %vm9365_vm12 = vmmov %vm9356_vm5 }
 0x6bd   : > { %5949 = vmatprep.subr.msk.bf16.mxu1 %vm9365_vm12, %v5148_v33  ;;  %vm9367_vm11 = vmmov %vm9362_vm0  ;;  %v5362_v36 = vpop.permute.xlu1 %5361 }
 0x6be   : > { %v5137_v10 = vsel %vm9367_vm11, %v9366_v52, %v5104_v26  ;;  %vm9368_vm1 = vmmov %vm9362_vm0 }
 0x6bf   : > { %v5138_v31 = vsel %vm9368_vm1, %v5104_v26, %v5106_v49  ;;  %vm9369_vm15 = vmmov %vm9356_vm5 }
 0x6c0   : > { %5199 = vmatprep.subr.bf16.mxu0 %v5138_v31  ;;  %v5168_v19 = vsel %vm9369_vm15, %v5147_v63, 0  ;;  %vm9372_vm3 = vmmov %vm9362_vm0 }
 0x6c1   : > { %v5150_v40 = vsel %vm9372_vm3, %v9371_v30, %v9370_v12  ;;  %vm9373_vm13 = vmmov %vm9360_vm9  ;;  %5200 = vmatpush1.bf16.msra.mxu0 %v5137_v10  ;;  %v5366_v17 = vpop.permute.xlu1 %5365 }
 0x6c2   : > { %5946 = vmatmul.mubr.msk.bf16.vlgmr.msra.gmra.mxu1 %vm9373_vm13, %v6188_v38  ;;  %vm9374_vm7 = vmmov %vm9356_vm5  ;;  %v5360_v38 = vpop.permute.xlu0 %5359 }
 0x6c3   : > { %5239 = vmatpush1.bf16.msra.mxu1 %v5168_v19  ;;  %5951 = vmatprep.subr.msk.bf16.mxu0 %vm9374_vm7, %v5150_v40  ;;  %vm9375_vm14 = vmmov %vm9362_vm0 }
 0x6c4   : > { %v5139_v28 = vsel %vm9375_vm14, %v5106_v49, %v5108_v42  ;;  %vm9376_vm10 = vmmov %vm9362_vm0  ;;  %5258 = vmatprep.mubr.bf16.mxu1 %v9176_v14  ;;  %vm9393_vm14 = vcmask 867328  }
 0x6c5   : > { %v5140_v0 = vsel %vm9376_vm10, %v5108_v42, %v5110_v61  ;;  %vm9378_vm4 = vmmov %vm9360_vm9 }
 0x6c6   : > { %5948 = vmatmul.mubr.msk.bf16.vlgmr.msra.gmra.mxu0 %vm9378_vm4, %v6189_v3  ;;  %5240 = vmatprep.subr.bf16.mxu1 %v5140_v0  ;;  %vm9380_vm2 = vmmov %vm9362_vm0  ;;  %v5364_v62 = vpop.permute.xlu0 %5363 }
 0x6c7   : > { %5280 = vmatpush1.bf16.msra.mxu0 %v5174_v41  ;;  %5299 = vmatprep.mubr.bf16.mxu0 %v9176_v14  ;;  %v5151_v27 = vsel %vm9380_vm2, %v9370_v12, %v9379_v59  ;;  %vm9381_vm8 = vmmov %vm9362_vm0 }
 0x6c8   : > { %5241 = vmatpush1.bf16.msra.mxu1 %v5139_v28  ;;  %v5141_v37 = vsel %vm9381_vm8, %v5110_v61, %v5112_v15  ;;  %vm9383_vm9 = vmmov %vm9356_vm5  ;;  %5281 = vmatprep.subr.bf16.mxu0 %v5142_v58 }
 0x6c9   : > { %5953 = vmatprep.subr.msk.bf16.mxu1 %vm9383_vm9, %v9382_v22  ;;  %vm9384_vm6 = vmmov %vm9356_vm5 }
 0x6ca   : > { %v5180_v53 = vsel %vm9384_vm6, %v5151_v27, 0  ;;  %vm9385_vm12 = vmmov %vm9378_vm4  ;;  %v5370_v60 = vpop.permute.xlu0 %5369 }
 0x6cb   : > { %5950 = vmatmul.mubr.msk.bf16.vlgmr.msra.gmra.mxu1 %vm9385_vm12, %v6189_v3  ;;  %5282 = vmatpush1.bf16.msra.mxu0 %v5141_v37  ;;  %vm9386_vm11 = vmmov %vm9356_vm5 }
 0x6cc   : > { %5321 = vmatpush1.bf16.msra.mxu1 %v5180_v53  ;;  %5955 = vmatprep.subr.msk.bf16.mxu0 %vm9386_vm11, %v8403_v11  ;;  %vm9387_vm1 = vmmov %vm9362_vm0  ;;  %v5393_v11 = vsel %vm9393_vm14, %v8425_v16, %v5360_v38 }
 0x6cd   : > { %v5143_v4 = vsel %vm9387_vm1, %v5114_v46, %v5116_v34  ;;  %vm9388_vm15 = vmmov %vm9362_vm0  ;;  %5340 = vmatprep.mubr.bf16.mxu1 %v9176_v14 }
 0x6ce   : > { %v5144_v2 = vsel %vm9388_vm15, %v5116_v34, %v5118_v56  ;;  %vm9390_vm3 = vmmov %vm9356_vm5  ;;  %v5374_v9 = vpop.permute.xlu0 %5373 }
 0x6cf   : > { %v5418_v35 = vsel %vm9390_vm3, %v9389_v24, 0  ;;  %vm9391_vm13 = vmmov %vm9378_vm4  ;;  %5322 = vmatprep.subr.bf16.mxu1 %v5144_v2 }
 0x6d0   : > { %5952 = vmatmul.mubr.msk.bf16.vlgmr.msra.gmra.mxu0 %vm9391_vm13, %v6189_v3  ;;  %5323 = vmatpush1.bf16.msra.mxu1 %v5143_v4  ;;  %vm9392_vm7 = vmmov %vm9390_vm3 }
 0x6d1   : > { %5454 = vmatpush1.bf16.msra.mxu0 %v5418_v35  ;;  %5473 = vmatprep.mubr.bf16.mxu0 %v9176_v14  ;;  %vm9394_vm10 = vmmov %vm9393_vm14 }
 0x6d2   : > { %5957 = vmatprep.subr.msk.bf16.mxu1 %vm9392_vm7, %v8421_v50  ;;  %v5394_v48 = vsel %vm9394_vm10, %v5360_v38, %v5362_v36  ;;  %vm9395_vm5 = vmmov %vm9390_vm3 }
 0x6d3   : > { %5455 = vmatprep.subr.bf16.mxu0 %v5394_v48  ;;  %v5424_v8 = vsel %vm9395_vm5, %v8409_v5, 0  ;;  %5954 = vmatmul.mubr.msk.bf16.vlgmr.msra.gmra.mxu1 %vm9378_vm4, %v6189_v3  ;;  %vm9396_vm2 = vmmov %vm9390_vm3  ;;  %v5368_v5 = vpop.permute.xlu1 %5367  ;;  %vm9410_vm5 = vcmask 957440  }
 0x6d4   : > { %5495 = vmatpush1.bf16.msra.mxu1 %v5424_v8  ;;  %vm9397_vm8 = vmmov %vm9394_vm10  ;;  %5514 = vmatprep.mubr.bf16.mxu1 %v9176_v14 }
 0x6d5   : > { %5456 = vmatpush1.bf16.msra.mxu0 %v5393_v11  ;;  %v5395_v50 = vsel %vm9397_vm8, %v5362_v36, %v5364_v62  ;;  %vm9398_vm9 = vmmov %vm9397_vm8 }
 0x6d6   : > { %5959 = vmatprep.subr.msk.bf16.mxu0 %vm9396_vm2, %v8444_v25  ;;  %v5396_v47 = vsel %vm9398_vm9, %v5364_v62, %v5366_v17  ;;  %vm9399_vm0 = vmmov %vm9396_vm2 }
 0x6d7   : > { %v5430_v16 = vsel %vm9399_vm0, %v8438_v45, 0  ;;  %vm9400_vm6 = vmmov %vm9378_vm4  ;;  %5496 = vmatprep.subr.bf16.mxu1 %v5396_v47  ;;  %v5372_v54 = vpop.permute.xlu1 %5371 }
 0x6d8   : > { %5956 = vmatmul.mubr.msk.bf16.vlgmr.msra.gmra.mxu0 %vm9400_vm6, %v6190_v55  ;;  %5497 = vmatpush1.bf16.msra.mxu1 %v5395_v50  ;;  %vm9401_vm12 = vmmov %vm9397_vm8 }
 0x6d9   : > { %5536 = vmatpush1.bf16.msra.mxu0 %v5430_v16  ;;  %5555 = vmatprep.mubr.bf16.mxu0 %v9176_v14  ;;  %v5397_v25 = vsel %vm9401_vm12, %v5366_v17, %v5368_v5  ;;  %vm9402_vm11 = vmmov %vm9399_vm0 }
 0x6da   : > { %5961 = vmatprep.subr.msk.bf16.mxu1 %vm9402_vm11, %v8467_v21  ;;  %vm9403_vm1 = vmmov %vm9397_vm8 }
 0x6db   : > { %v5398_v44 = vsel %vm9403_vm1, %v5368_v5, %v5370_v60  ;;  %vm9404_vm15 = vmmov %vm9399_vm0 }
 0x6dc   : > { %5537 = vmatprep.subr.bf16.mxu0 %v5398_v44  ;;  %v5436_v45 = vsel %vm9404_vm15, %v8462_v20, 0  ;;  %vm9405_vm3 = vmmov %vm9378_vm4 }
 0x6dd   : > { %5958 = vmatmul.mubr.msk.bf16.vlgmr.msra.gmra.mxu1 %vm9405_vm3, %v6190_v55  ;;  %5538 = vmatpush1.bf16.msra.mxu0 %v5397_v25  ;;  %vm9406_vm13 = vmmov %vm9403_vm1 }
 0x6de   : > { %5577 = vmatpush1.bf16.msra.mxu1 %v5436_v45  ;;  %5596 = vmatprep.mubr.bf16.mxu1 %v9176_v14  ;;  %v5399_v39 = vsel %vm9406_vm13, %v5370_v60, %v5372_v54  ;;  %vm9407_vm7 = vmmov %vm9403_vm1 }
 0x6df   : > { %v5400_v57 = vsel %vm9407_vm7, %v5372_v54, %v5374_v9  ;;  %vm9408_vm14 = vmmov %vm9405_vm3 }
 0x6e0   : > { %5960 = vmatmul.mubr.msk.bf16.vlgmr.msra.gmra.mxu0 %vm9408_vm14, %v6190_v55  ;;  %5578 = vmatprep.subr.bf16.mxu1 %v5400_v57  ;;  %vm9409_vm10 = vmmov %vm9405_vm3 }
 0x6e1   : > { %vm9411_vm4 = vmmov %vm9410_vm5 }
 0x6e2   : > { %5579 = vmatpush1.bf16.msra.mxu1 %v5399_v39  ;;  %vm9412_vm2 = vmmov %vm9411_vm4 }
 0x6e3   : > { %vm9413_vm8 = vmmov %vm9412_vm2 }
 0x6e4   : > { %vm9415_vm9 = vmmov %vm9412_vm2 }
 0x6e5   : > { %5962 = vmatmul.mubr.msk.bf16.vlgmr.msra.gmra.mxu1 %vm9409_vm10, %v6190_v55  ;;  %vm9416_vm12 = vmmov %vm9412_vm2 }
 0x6e6   : > { %vm9417_vm3 = vmmov %vm9412_vm2 }
 0x6e7   : > { %vm9418_vm7 = vmmov %vm9412_vm2 }
 0x6e9   : > { %v3510_v21 = vpop.f32.mrf.mxu0 }
 0x6eb   : > { %v3512_v20 = vpop.f32.mrf.mxu0 }
 0x6ed   : > { %v3514_v51 = vpop.f32.mrf.mxu0 }
 0x6ee   : > { %v3551_v23 = vpop.f32.mrf.mxu1 }
 0x6ef   : > { %v3515_v32 = vpop.f32.mrf.mxu0 }
 0x6f0   : > { %v3553_v7 = vpop.f32.mrf.mxu1 }
 0x6f1   : > { %v3592_v18 = vpop.f32.mrf.mxu0 }
 0x6f2   : > { %v3555_v1 = vpop.f32.mrf.mxu1 }
 0x6f3   : > { %v3594_v29 = vpop.f32.mrf.mxu0 }
 0x6f4   : > { %v3556_v14 = vpop.f32.mrf.mxu1 }
 0x6f5   : > { %v3596_v49 = vpop.f32.mrf.mxu0 }
 0x6f6   : > { %v3633_v43 = vpop.f32.mrf.mxu1 }
 0x6f7   : > { %v3597_v63 = vpop.f32.mrf.mxu0 }
 0x6f8   : > { %v3635_v13 = vpop.f32.mrf.mxu1 }
 0x6f9   : > { %v3691_v33 = vpop.f32.mrf.mxu0 }
 0x6fa   : > { %v3637_v26 = vpop.f32.mrf.mxu1  ;;  %v3692_v52 = vadd.f32 %v3691_v33, %v3510_v21 }
 0x6fb   : > { %v3693_v10 = vpop.f32.mrf.mxu0 }
 0x6fc   : > { %v3638_v31 = vpop.f32.mrf.mxu1  ;;  %v3694_v19 = vadd.f32 %v3693_v10, %v3512_v20 }
 0x6fd   : > { %v3695_v12 = vpop.f32.mrf.mxu0 }
 0x6fe   : > { %v3732_v30 = vpop.f32.mrf.mxu1 }
 0x6ff   : > { %v3733_v40 = vadd.f32 %v3732_v30, %v3551_v23  ;;  %v3696_v61 = vpop.f32.mrf.mxu0 }
 0x700   : > { %v3734_v42 = vpop.f32.mrf.mxu1 }
 0x701   : > { %v3735_v28 = vadd.f32 %v3734_v42, %v3553_v7  ;;  %v3773_v0 = vpop.f32.mrf.mxu0 }
 0x702   : > { %v3736_v6 = vpop.f32.mrf.mxu1  ;;  %v3774_v41 = vadd.f32 %v3773_v0, %v3592_v18 }
 0x703   : > { %v3775_v3 = vpop.f32.mrf.mxu0 }
 0x704   : > { %v3737_v15 = vpop.f32.mrf.mxu1  ;;  %v3776_v59 = vadd.f32 %v3775_v3, %v3594_v29 }
 0x705   : > { %v3777_v27 = vpop.f32.mrf.mxu0 }
 0x706   : > { %v3814_v37 = vpop.f32.mrf.mxu1 }
 0x707   : > { %v3815_v46 = vadd.f32 %v3814_v37, %v3633_v43  ;;  %v3778_v22 = vpop.f32.mrf.mxu0 }
 0x708   : > { %v3816_v58 = vpop.f32.mrf.mxu1 }
 0x709   : > { %v3817_v53 = vadd.f32 %v3816_v58, %v3635_v13  ;;  %v3939_v34 = vpop.f32.mrf.mxu0 }
 0x70a   : > { %v3818_v56 = vpop.f32.mrf.mxu1  ;;  %v4069_v4 = vadd.f32 %v3939_v34, %v3692_v52 }
 0x70b   : > { %v3941_v2 = vpop.f32.mrf.mxu0 }
 0x70c   : > { %v3819_v24 = vpop.f32.mrf.mxu1  ;;  %v4070_v35 = vadd.f32 %v3941_v2, %v3694_v19 }
 0x70d   : > { %v3943_v36 = vpop.f32.mrf.mxu0 }
 0x70e   : > { %v3980_v38 = vpop.f32.mrf.mxu1 }
 0x70f   : > { %v4071_v11 = vadd.f32 %v3980_v38, %v3733_v40  ;;  %v3944_v48 = vpop.f32.mrf.mxu0 }
 0x710   : > { %v3982_v8 = vpop.f32.mrf.mxu1 }
 0x711   : > { %v4072_v17 = vadd.f32 %v3982_v8, %v3735_v28 }
 0x712   : > { %v3984_v50 = vpop.f32.mrf.mxu1 }
 0x713   : > { %v4021_v62 = vpop.f32.mrf.mxu0 }
 0x714   : > { %v4073_v47 = vadd.f32 %v4021_v62, %v3774_v41  ;;  %v3985_v55 = vpop.f32.mrf.mxu1 }
 0x715   : > { %v4023_v16 = vpop.f32.mrf.mxu0 }
 0x716   : > { %v4074_v5 = vadd.f32 %v4023_v16, %v3776_v59 }
 0x717   : > { %v4025_v25 = vpop.f32.mrf.mxu0 }
 0x719   : > { %v4026_v45 = vpop.f32.mrf.mxu0 }
 0x71a   : > { %v4062_v60 = vpop.f32.mrf.mxu1 }
 0x71b   : > { %v4075_v44 = vadd.f32 %v4062_v60, %v3815_v46 }
 0x71c   : > { %v4064_v54 = vpop.f32.mrf.mxu1 }
 0x71d   : > { %v4076_v9 = vadd.f32 %v4064_v54, %v3817_v53 }
 0x71e   : > { %v4066_v57 = vpop.f32.mrf.mxu1 }
 0x720   : > { %v4195_v39 = vpop.f32.mrf.mxu0  ;;  %v4067_v51 = vpop.f32.mrf.mxu1 }
 0x721   : > { %v8807_v21 = vadd.f32 %v4195_v39, %v4069_v4 }
 0x722   : > { %v4197_v20 = vpop.f32.mrf.mxu0 }
 0x723   : > { %v8809_v23 = vadd.f32 %v4197_v20, %v4070_v35 }
 0x724   : > { %v4199_v32 = vpop.f32.mrf.mxu0 }
 0x726   : > { %v4236_v7 = vpop.f32.mrf.mxu1  ;;  %v4200_v1 = vpop.f32.mrf.mxu0 }
 0x727   : > { %v8811_v18 = vadd.f32 %v4236_v7, %v4071_v11 }
 0x728   : > { %v4238_v29 = vpop.f32.mrf.mxu1 }
 0x729   : > { %v8813_v14 = vadd.f32 %v4238_v29, %v4072_v17 }
 0x72a   : > { %v4240_v43 = vpop.f32.mrf.mxu1 }
 0x72c   : > { %v4241_v33 = vpop.f32.mrf.mxu1 }
 0x72d   : > { %v4277_v49 = vpop.f32.mrf.mxu0 }
 0x72e   : > { %v8815_v63 = vadd.f32 %v4277_v49, %v4073_v47 }
 0x72f   : > { %v4279_v13 = vpop.f32.mrf.mxu0 }
 0x730   : > { %v8817_v26 = vadd.f32 %v4279_v13, %v4074_v5 }
 0x731   : > { %v4281_v52 = vpop.f32.mrf.mxu0 }
 0x732   : > { %v5631_v52 = vpop.permute.xlu1 %5630 }
 0x733   : > { %v4282_v19 = vpop.f32.mrf.mxu0 }
 0x734   : > { %v4318_v10 = vpop.f32.mrf.mxu1  ;;  %v5633_v19 = vpop.permute.xlu0 %5632 }
 0x735   : > { %v8819_v31 = vadd.f32 %v4318_v10, %v4075_v44 }
 0x736   : > { %v4320_v12 = vpop.f32.mrf.mxu1 }
 0x737   : > { %v8821_v30 = vadd.f32 %v4320_v12, %v4076_v9 }
 0x738   : > { %v4322_v61 = vpop.f32.mrf.mxu1 }
 0x73a   : > { %v4451_v40 = vpop.f32.mrf.mxu0  ;;  %v4323_v28 = vpop.f32.mrf.mxu1 }
 0x73c   : > { %v4453_v42 = vpop.f32.mrf.mxu0 }
 0x73e   : > { %v4455_v0 = vpop.f32.mrf.mxu0 }
 0x740   : > { %v4456_v41 = vpop.f32.mrf.mxu0 }
 0x741   : > { %v8823_v6 = vpop.f32.mrf.mxu1  ;;  %v4581_v41 = vadd.f32 %v4451_v40, %v8807_v21 }
 0x743   : > { %v8825_v3 = vpop.f32.mrf.mxu1 }
 0x745   : > { %v4496_v59 = vpop.f32.mrf.mxu1 }
 0x747   : > { %v8827_v15 = vpop.f32.mrf.mxu0  ;;  %v4497_v37 = vpop.f32.mrf.mxu1 }
 0x748   : > { %v5635_v37 = vpop.permute.xlu1 %5634 }
 0x749   : > { %v8829_v27 = vpop.f32.mrf.mxu0 }
 0x74b   : > { %v4537_v46 = vpop.f32.mrf.mxu0 }
 0x74c   : > { %v5639_v40 = vpop.permute.xlu1 %5638 }
 0x74d   : > { %v4538_v58 = vpop.f32.mrf.mxu0 }
 0x74e   : > { %v8831_v22 = vpop.f32.mrf.mxu1  ;;  %v5637_v58 = vpop.permute.xlu0 %5636 }
 0x750   : > { %v8833_v53 = vpop.f32.mrf.mxu1 }
 0x752   : > { %v4578_v56 = vpop.f32.mrf.mxu1 }
 0x753   : > { %v4582_v56 = vadd.f32 %v4453_v42, %v8809_v23 }
 0x754   : > { %v4707_v34 = vpop.f32.mrf.mxu0  ;;  %v4579_v2 = vpop.f32.mrf.mxu1 }
 0x755   : > { %v4837_v2 = vadd.f32 %v4707_v34, %v4581_v41  ;;  %v5649_v34 = vsel %vm9410_vm5, %v5631_v52, %v5633_v19  ;;  %v4587_v52 = vadd.f32 %v8831_v22, %v8819_v31 }
 0x756   : > { %v4709_v4 = vpop.f32.mrf.mxu0 }
 0x758   : > { %v4711_v24 = vpop.f32.mrf.mxu0 }
 0x75a   : > { %v4712_v36 = vpop.f32.mrf.mxu0 }
 0x75b   : > { %v4748_v35 = vpop.f32.mrf.mxu1 }
 0x75d   : > { %v8835_v38 = vpop.f32.mrf.mxu1 }
 0x75f   : > { %v4752_v48 = vpop.f32.mrf.mxu1 }
 0x760   : > { %v4838_v48 = vadd.f32 %v4709_v4, %v4582_v56  ;;  %v5650_v4 = vsel %vm9411_vm4, %v5633_v19, %v5635_v37 }
 0x761   : > { %v8837_v11 = vpop.f32.mrf.mxu0  ;;  %v4753_v17 = vpop.f32.mrf.mxu1 }
 0x763   : > { %v8839_v8 = vpop.f32.mrf.mxu0 }
 0x765   : > { %v4793_v62 = vpop.f32.mrf.mxu0 }
 0x767   : > { %v4794_v47 = vpop.f32.mrf.mxu0 }
 0x768   : > { %v4583_v47 = vadd.f32 %v8823_v6, %v8811_v18 }
 0x769   : > { %v8841_v50 = vpop.f32.mrf.mxu1 }
 0x76a   : > { %v4839_v23 = vadd.f32 %v4748_v35, %v4583_v47 }
 0x76b   : > { %v8843_v16 = vpop.f32.mrf.mxu1 }
 0x76d   : > { %v4834_v5 = vpop.f32.mrf.mxu1 }
 0x76e   : > { %v4963_v55 = vpop.f32.mrf.mxu0 }
 0x76f   : > { %v4835_v60 = vpop.f32.mrf.mxu1  ;;  %v5093_v17 = vadd.f32 %v4963_v55, %v4837_v2  ;;  %v5641_v55 = vpop.permute.xlu0 %5640 }
 0x770   : > { %v4965_v25 = vpop.f32.mrf.mxu0  ;;  %v5643_v2 = vpop.permute.xlu1 %5642 }
 0x771   : > { %v5094_v60 = vadd.f32 %v4965_v25, %v4838_v48  ;;  %v5654_v47 = vsel %vm9416_vm12, %v5641_v55, %v5643_v2 }
 0x772   : > { %v4967_v44 = vpop.f32.mrf.mxu0 }
 0x774   : > { %v4968_v54 = vpop.f32.mrf.mxu0 }
 0x775   : > { %v5004_v45 = vpop.f32.mrf.mxu1  ;;  %v4584_v54 = vadd.f32 %v8825_v3, %v8813_v14 }
 0x776   : > { %v5095_v3 = vadd.f32 %v5004_v45, %v4839_v23  ;;  %v4588_v45 = vadd.f32 %v8833_v53, %v8821_v30 }
 0x777   : > { %v5006_v9 = vpop.f32.mrf.mxu1  ;;  %v4840_v14 = vadd.f32 %v8835_v38, %v4584_v54 }
 0x778   : > { %v4844_v30 = vadd.f32 %v8843_v16, %v4588_v45 }
 0x779   : > { %v5008_v57 = vpop.f32.mrf.mxu1 }
 0x77a   : > { %v8845_v39 = vpop.f32.mrf.mxu0  ;;  %v4585_v57 = vadd.f32 %v8827_v15, %v8815_v63 }
 0x77b   : > { %v5009_v51 = vpop.f32.mrf.mxu1 }
 0x77c   : > { %v8847_v20 = vpop.f32.mrf.mxu0  ;;  %v5651_v51 = vsel %vm9412_vm2, %v5635_v37, %v5637_v58 }
 0x77e   : > { %v5049_v32 = vpop.f32.mrf.mxu0 }
 0x77f   : > { %v4586_v32 = vadd.f32 %v8829_v27, %v8817_v26  ;;  %v5096_v26 = vadd.f32 %v5006_v9, %v4840_v14 }
 0x780   : > { %v5050_v1 = vpop.f32.mrf.mxu0 }
 0x781   : > { %v5652_v1 = vsel %vm9413_vm8, %v5637_v58, %v5639_v40 }
 0x782   : > { %v8849_v7 = vpop.f32.mrf.mxu1 }
 0x784   : > { %v8851_v29 = vpop.f32.mrf.mxu1 }
 0x786   : > { %v5219_v49 = vpop.f32.mrf.mxu0  ;;  %v5090_v43 = vpop.f32.mrf.mxu1 }
 0x787   : > { %v5349_v44 = vadd.f32 %v5219_v49, %v5093_v17  ;;  %v4841_v49 = vadd.f32 %v8837_v11, %v4585_v57  ;;  %v9414_v43 = vld [vmem:[#allocation12_spill] sm:$0xff] }
 0x788   : > { %v5221_v13 = vpop.f32.mrf.mxu0  ;;  %v5091_v33 = vpop.f32.mrf.mxu1 }
 0x789   : > { %v5350_v18 = vadd.f32 %v5221_v13, %v5094_v60  ;;  %v5653_v13 = vsel %vm9415_vm9, %v5639_v40, %v5641_v55  ;;  %v5097_v11 = vadd.f32 %v8845_v39, %v4841_v49 }
 0x78a   : > { %v5223_v10 = vpop.f32.mrf.mxu0 }
 0x78b   : > { %v5260_v12 = vpop.f32.mrf.mxu1  ;;  %v4842_v10 = vadd.f32 %v8839_v8, %v4586_v32 }
 0x78c   : > { %v5224_v61 = vpop.f32.mrf.mxu0  ;;  %v5351_v27 = vadd.f32 %v5260_v12, %v5095_v3 }
 0x78d   : > { %v5262_v28 = vpop.f32.mrf.mxu1  ;;  %v5098_v37 = vadd.f32 %v8847_v20, %v4842_v10 }
 0x78e   : > { %v5352_v31 = vadd.f32 %v5262_v28, %v5096_v26 }
 0x78f   : > { %v5264_v59 = vpop.f32.mrf.mxu1 }
 0x790   : > { %v5301_v0 = vpop.f32.mrf.mxu0  ;;  %v4843_v59 = vadd.f32 %v8841_v50, %v4587_v52 }
 0x791   : > { %v5265_v24 = vpop.f32.mrf.mxu1  ;;  %v5353_v9 = vadd.f32 %v5301_v0, %v5097_v11 }
 0x792   : > { %v5303_v46 = vpop.f32.mrf.mxu0  ;;  %v5099_v17 = vadd.f32 %v8849_v7, %v4843_v59 }
 0x793   : > { %v8855_v62 = vpop.f32.mrf.mxu1  ;;  %v5354_v53 = vadd.f32 %v5303_v46, %v5098_v37 }
 0x794   : > { %v5305_v36 = vpop.f32.mrf.mxu0  ;;  %v5355_v7 = vadd.f32 %v8855_v62, %v5099_v17  ;;  %v5647_v62 = vpop.permute.xlu1 %5646 }
 0x795   : > { %v8859_v21 = vpop.f32.mrf.mxu1 }
 0x796   : > { %v5306_v5 = vpop.f32.mrf.mxu0 }
 0x797   : > { %v5346_v6 = vpop.f32.mrf.mxu1  ;;  %v5100_v5 = vadd.f32 %v8851_v29, %v4844_v30  ;;  %v5645_v29 = vpop.permute.xlu0 %5644 }
 0x798   : > { %v5475_v42 = vpop.f32.mrf.mxu0  ;;  %v5656_v52 = vsel %vm9418_vm7, %v5645_v29, %v5647_v62 }
 0x799   : > { %v5605_v25 = vadd.f32 %v5475_v42, %v5349_v44  ;;  %v5347_v63 = vpop.f32.mrf.mxu1 }
 0x79a   : > { %v5477_v35 = vpop.f32.mrf.mxu0 }
 0x79b   : > { %v5613_v33 = vadd.f32 %v5605_v25, %v9414_v43  ;;  %v5606_v15 = vadd.f32 %v5477_v35, %v5350_v18 }
 0x79c   : > { %v5479_v38 = vpop.f32.mrf.mxu0 }
 0x79d   : > { %v5614_v19 = vadd.f32 %v5606_v15, %v9414_v43  ;;  %v5665_v61 = vadd.f32 %v5649_v34, %v5613_v33  ;;  %v5516_v41 = vpop.f32.mrf.mxu1  ;;  %v5655_v33 = vsel %vm9417_vm3, %v5643_v2, %v5645_v29 }
 0x79e   : > { %v5607_v22 = vadd.f32 %v5516_v41, %v5351_v27  ;;  %v5480_v8 = vpop.f32.mrf.mxu0 }
 0x79f   : > { %vm5673_vm0 = vcmp.ge.f32.partialorder %v5665_v61, 0.0  ;;  %v5681_v12 = vmul.f32 0.01, %v5665_v61  ;;  %v5666_v58 = vadd.f32 %v5650_v4, %v5614_v19  ;;  %v5518_v56 = vpop.f32.mrf.mxu1  ;;  %v5356_v4 = vadd.f32 %v8859_v21, %v5100_v5 }
 0x7a0   : > { %v5615_v39 = vadd.f32 %v5607_v22, %v9414_v43  ;;  %v5608_v24 = vadd.f32 %v5518_v56, %v5352_v31  ;;  %v5557_v36 = vpop.f32.mrf.mxu0 }
 0x7a1   : > { %v5689_v48 = vsel %vm5673_vm0, %v5665_v61, %v5681_v12  ;;  %vm5674_vm6 = vcmp.ge.f32.partialorder %v5666_v58, 0.0  ;;  %v5682_v50 = vmul.f32 0.01, %v5666_v58  ;;  %v5520_v20 = vpop.f32.mrf.mxu1  ;;  %v5609_v28 = vadd.f32 %v5557_v36, %v5353_v9 }
 0x7a2   : > { %5697 = vst [vmem:[%s8888_s8] sm:$0xff] %v5689_v48  ;;  %v5616_v0 = vadd.f32 %v5608_v24, %v9414_v43  ;;  %v5667_v16 = vadd.f32 %v5651_v51, %v5615_v39  ;;  %v5559_v46 = vpop.f32.mrf.mxu0 }
 0x7a3   : > { %v5690_v60 = vsel %vm5674_vm6, %v5666_v58, %v5682_v50  ;;  %v5617_v44 = vadd.f32 %v5609_v28, %v9414_v43  ;;  %v5521_v40 = vpop.f32.mrf.mxu1  ;;  %v5610_v54 = vadd.f32 %v5559_v46, %v5354_v53 }
 0x7a4   : > { %5698 = vst [vmem:[%s8888_s8 + $0x8] sm:$0xff] %v5690_v60  ;;  %vm5675_vm11 = vcmp.ge.f32.partialorder %v5667_v16, 0.0  ;;  %v5683_v23 = vmul.f32 0.01, %v5667_v16  ;;  %v5668_v42 = vadd.f32 %v5652_v1, %v5616_v0  ;;  %v5561_v34 = vpop.f32.mrf.mxu0 }
 0x7a5   : > { %v5618_v57 = vadd.f32 %v5610_v54, %v9414_v43  ;;  %v5669_v55 = vadd.f32 %v5653_v13, %v5617_v44  ;;  %v5598_v18 = vpop.f32.mrf.mxu1 }
 0x7a6   : > { %v5691_v6 = vsel %vm5675_vm11, %v5667_v16, %v5683_v23  ;;  %vm5676_vm1 = vcmp.ge.f32.partialorder %v5668_v42, 0.0  ;;  %v5684_v25 = vmul.f32 0.01, %v5668_v42  ;;  %v5611_v51 = vadd.f32 %v5598_v18, %v5355_v7  ;;  %v5562_v32 = vpop.f32.mrf.mxu0 }
 0x7a7   : > { %5699 = vst [vmem:[%s8888_s8 + $0x10] sm:$0xff] %v5691_v6  ;;  %vm5677_vm15 = vcmp.ge.f32.partialorder %v5669_v55, 0.0  ;;  %v5685_v14 = vmul.f32 0.01, %v5669_v55  ;;  %v5670_v3 = vadd.f32 %v5654_v47, %v5618_v57  ;;  %v5600_v35 = vpop.f32.mrf.mxu1 }
 0x7a8   : > { %v5692_v21 = vsel %vm5676_vm1, %v5668_v42, %v5684_v25  ;;  %v5619_v1 = vadd.f32 %v5611_v51, %v9414_v43  ;;  %v5612_v49 = vadd.f32 %v5600_v35, %v5356_v4 }
 0x7a9   : > { %5700 = vst [vmem:[%s8888_s8 + $0x18] sm:$0xff] %v5692_v21  ;;  %v5693_v63 = vsel %vm5677_vm15, %v5669_v55, %v5685_v14  ;;  %vm5678_vm13 = vcmp.ge.f32.partialorder %v5670_v3, 0.0  ;;  %v5686_v15 = vmul.f32 0.01, %v5670_v3  ;;  %v5602_v13 = vpop.f32.mrf.mxu1 }
 0x7aa   : > { %5701 = vst [vmem:[%s8888_s8 + $0x20] sm:$0xff] %v5693_v63  ;;  %v5620_v10 = vadd.f32 %v5612_v49, %v9414_v43  ;;  %v5671_v26 = vadd.f32 %v5655_v33, %v5619_v1 }
 0x7ab   : > { %v5694_v27 = vsel %vm5678_vm13, %v5670_v3, %v5686_v15  ;;  %v5603_v38 = vpop.f32.mrf.mxu1 }
 0x7ac   : > { %5702 = vst [vmem:[%s8888_s8 + $0x28] sm:$0xff] %v5694_v27  ;;  %vm5679_vm14 = vcmp.ge.f32.partialorder %v5671_v26, 0.0  ;;  %v5687_v45 = vmul.f32 0.01, %v5671_v26  ;;  %v5672_v11 = vadd.f32 %v5656_v52, %v5620_v10 }
 0x7ae   : > { %v5695_v19 = vsel %vm5679_vm14, %v5671_v26, %v5687_v45  ;;  %vm5680_vm10 = vcmp.ge.f32.partialorder %v5672_v11, 0.0  ;;  %v5688_v61 = vmul.f32 0.01, %v5672_v11 }
 0x7af   : > { %5703 = vst [vmem:[%s8888_s8 + $0x30] sm:$0xff] %v5695_v19 }
 0x7b0   : > { %v5696_v43 = vsel %vm5680_vm10, %v5672_v11, %v5688_v61 }
 0x7b1   : > { %5704 = vst [vmem:[%s8888_s8 + $0x38] sm:$0xff] %v5696_v43 }
 0x7b2   : > { %6284 = shalt.err (!%p6281_p12)
}
 0x7b3   : > { %s6285_s24 = scalar_lea.hbm %s8913_s28, 1024  ;;  %s6289_s14 = scalar_lea.hbm %s8955_s4, 2048 }
 0x7b4   : > { %p6286_p11 = scmp.ne.s32.totalorder %s8913_s28, %s6285_s24  ;;  %p6290_p5 = scmp.lt.s32.totalorder %s8913_s28, %s8955_s4 }
 0x7b5   : > { %p6291_p9 = scmp.lt.s32.totalorder %s6289_s14, %s6285_s24 }
 0x7b6   : > { %p6287_p7 = pnand %p6286_p11, %p9419_p0 }
 0x7b7   : > { %p6292_p3 = por %p6291_p9, %p6290_p5 }
 0x7b8   : > { %p6288_p10 = pneg %p6287_p7 }
 0x7ba   : > { %p6293_p13 = pnand %p6292_p3, %p6288_p10 }
 0x7bc   : > { %6296 = shalt.err (!%p6293_p13)
}
 0x7bd   : > { %5982 = dma.vmem_to_hbm [thread:$0]  (%p9419_p0), %s5721_s21, 1024, %s8913_s28, %s5706_s5  }
 0x7be PF: > { %s5732_s7 = sand.u32 1, %s6327_s15   ;;  %p9420_p1 = scmp.ne.s32.totalorder %s8995_s22, 0 }
 0x7bf   : > { %p9421_p2 = scmp.ge.s32.totalorder %s6339_s18, 2  ;;  %s5733_s8 = scalar_lea.sflag [#allocation4], %s5732_s7 }
 0x7c1   : > { %p5996_p4 = pnand %p9421_p2, %p9420_p1 }
 0x7c3   : > { %p5997_p6 = pneg %p5996_p4 }
 0x7c5   : > { %6322 = dma.done.wait (%p5997_p6), %s5733_s8, 1024  }
 0x7c6   : > { %6324 = vsyncadd (%p5997_p6), %s5733_s8, 4294966272  ;;  %p18_p8 = scmp.ge.s32.totalorder %s6437_s29, 4   ;;  %s9422_s15 = smov %s6331_s16 }
 0x7c7   : > { %s9423_s16 = smov %s6335_s17  ;;  %s9424_s17 = smov %s6464_s12 }
 0x7c8   : > { %s9425_s18 = smov %s6437_s29  ;;  %20 = sbr.rel (!%p18_p8) target bundleno = 6 (0x6), region = 94 }
 0x7cd   :  { %5738 = vsyncpa [#allocation3], 1 }
 0x7ce   :  { %5740 = vsyncpa [#allocation3 + $0x1], 1 }
 0x7cf   :  { %5741 = vsyncpa [#allocation6], 1 }
 0x7d0   :  { %5742 = vsyncpa [#allocation4], 1 }
 0x7d1   :  { %5744 = vsyncpa [#allocation4 + $0x1], 1 }

</bundles_post_ra>
